<compile_context>
chip_gen: v7x
topology: tpu7x:2x2x1
jax: 0.10.0
libtpu: 0.0.40
codegen_flags: <defaults>
</compile_context>

<pallas_src>
import functools

import jax
import jax.numpy as jnp
import numpy as np
from jax import lax
from jax.experimental import pallas as pl
from jax.experimental.pallas import tpu as pltpu

RNNDIM = 64  # default RnnDim of the module


def _sigmoid(x):
    # sigmoid(x) == 0.5 * (tanh(x/2) + 1): tanh lowers to the EUP slot and avoids
    # both the f32 VPU divide and exp overflow of 1/(1+exp(-x)).
    return 0.5 * (jnp.tanh(0.5 * x) + 1.0)


def _round_up(x, m):
    return (x + m - 1) // m * m


# ----------------------------------------------------------------------------
# Kernel 1: row-tiled matmul + bias (+ReLU)  (conv im2col GEMMs)
# ----------------------------------------------------------------------------
def _linear_kernel(x_ref, w_ref, b_ref, o_ref, *, relu):
    y = jnp.dot(x_ref[...], w_ref[...], preferred_element_type=jnp.float32)
    y = y + b_ref[...]
    if relu:
        y = jnp.maximum(y, 0.0)
    o_ref[...] = y


def _pick_row_tile(M):
    """Largest of a few exactly-dividing row tiles (>=256 rows, 8-aligned)."""
    for nb in (2, 3, 4):
        tm = M // nb
        if M % nb == 0 and tm % 8 == 0 and tm >= 256:
            return tm
    return M  # single full-array tile


def pallas_linear(x, w, b, relu=False):
    """y = [relu](x @ w + b); rows tiled over an exactly-divisible 1-D grid."""
    M, K = x.shape
    Kw, N = w.shape
    assert K == Kw
    Mp = _round_up(M, 8)
    if Mp != M:  # fallback only; never hit for the HERDR shapes here
        x = jnp.pad(x, ((0, Mp - M), (0, 0)))
    tm = _pick_row_tile(Mp)
    out = pl.pallas_call(
        functools.partial(_linear_kernel, relu=relu),
        out_shape=jax.ShapeDtypeStruct((Mp, N), jnp.float32),
        grid=(Mp // tm,),
        in_specs=[
            pl.BlockSpec((tm, K), lambda i: (i, 0)),
            pl.BlockSpec((K, N), lambda i: (0, 0)),
            pl.BlockSpec((1, N), lambda i: (0, 0)),
        ],
        out_specs=pl.BlockSpec((tm, N), lambda i: (i, 0)),
        compiler_params=pltpu.CompilerParams(
            dimension_semantics=("parallel",)),
    )(x, w, b)
    return out[:M] if Mp != M else out


# ----------------------------------------------------------------------------
# Kernel 2: max pooling over a (P, S, L) patch stack (ReLU already fused in conv)
# ----------------------------------------------------------------------------
def _maxpool_kernel(x_ref, o_ref):
    m = x_ref[0]
    for p in range(1, x_ref.shape[0]):      # static unrolled window reduction
        m = jnp.maximum(m, x_ref[p])
    o_ref[...] = m


def maxpool(x_nhwc, pool, stride):
    B, H, W, C = x_nhwc.shape
    Ho = (H - pool) // stride + 1
    Wo = (W - pool) // stride + 1
    cols = [x_nhwc[:, i:i + stride * Ho:stride, j:j + stride * Wo:stride, :]
            for i in range(pool) for j in range(pool)]
    P = pool * pool
    total = B * Ho * Wo * C
    stacked = jnp.stack(cols, axis=0)                 # (P, B, Ho, Wo, C)
    if total % 128 == 0:
        S, L = total // 128, 128                      # lane-dense vld/vst
    else:
        S, L = B * Ho * Wo, C                         # fallback layout
    p = stacked.reshape(P, S, L)
    y = pl.pallas_call(
        _maxpool_kernel,
        out_shape=jax.ShapeDtypeStruct((S, L), jnp.float32),
    )(p)
    return y.reshape(B, Ho, Wo, C)


# ----------------------------------------------------------------------------
# im2col patch extraction (indexing only; compute stays in Pallas)
# ----------------------------------------------------------------------------
def _extract_patches(x_nhwc, k, stride):
    B, H, W, C = x_nhwc.shape
    Ho = (H - k) // stride + 1
    Wo = (W - k) // stride + 1
    cols = []
    for i in range(k):
        for j in range(k):
            cols.append(x_nhwc[:, i:i + stride * Ho:stride,
                               j:j + stride * Wo:stride, :])
    p = jnp.stack(cols, axis=3)  # (B, Ho, Wo, k*k, C)
    return p, Ho, Wo


def conv_gemm(x_nhwc, w_kn, b_1n, k, stride, pad_k_to=None):
    """Convolution as an im2col GEMM with fused ReLU (weights already (K, N))."""
    p, Ho, Wo = _extract_patches(x_nhwc, k, stride)
    B = x_nhwc.shape[0]
    pm = p.reshape(B * Ho * Wo, -1)
    K = pm.shape[1]
    if pad_k_to is not None and pad_k_to > K:
        pm = jnp.pad(pm, ((0, 0), (0, pad_k_to - K)))
    y = pallas_linear(pm, w_kn, b_1n, relu=True)
    return y.reshape(B, Ho, Wo, w_kn.shape[1])


# ----------------------------------------------------------------------------
# Kernel 3: fused head
#   conv3 -> fc1 -> fc2 -> init_hidden -> (batched act1/act2/LSTM input proj)
#   -> LSTM recurrence -> out1 -> out2, all in one launch.
# ----------------------------------------------------------------------------
def _head_kernel(x_ref, a_ref,
                 w3_ref, b3_ref, wf1_ref, bf1_ref, wf2_ref, bf2_ref,
                 wi1_ref, bi1_ref, wi2_ref, bi2_ref,
                 wa1_ref, ba1_ref, wa2_ref, ba2_ref,
                 wih_ref, bl_ref, whh_ref,
                 wo1_ref, bo1_ref, wo2_ref, bo2_ref,
                 o_ref, gx_ref, h_all_ref,
                 *, T, B, Bp, H, broadcast_obs):
    def fc(v, w_ref, b_ref, relu):
        y = jnp.dot(v, w_ref[...], preferred_element_type=jnp.float32) + b_ref[...]
        return jnp.maximum(y, 0.0) if relu else y

    # ---- obs head: conv3 (1x1 spatial) -> fc1 -> fc2 -> ih1 -> ih2 ----
    obs = fc(x_ref[...], w3_ref, b3_ref, True)       # conv3 + ReLU
    obs = fc(obs, wf1_ref, bf1_ref, True)            # fc1 + ReLU
    obs = fc(obs, wf2_ref, bf2_ref, False)           # fc2
    obs = fc(obs, wi1_ref, bi1_ref, True)            # init_hidden[0] + ReLU
    obs = fc(obs, wi2_ref, bi2_ref, False)           # init_hidden[2] -> (B_img, 2H)
    h = obs[:, :H]
    c = obs[:, H:]
    if broadcast_obs:                                 # obs batch == 1 -> repeat
        h = jnp.broadcast_to(h, (B, H))
        c = jnp.broadcast_to(c, (B, H))

    # ---- time-invariant projections, batched over all T*Bp rows ----
    z = fc(a_ref[...], wa1_ref, ba1_ref, True)        # act1 + ReLU   (T*Bp, 16)
    z = fc(z, wa2_ref, ba2_ref, False)                # act2          (T*Bp, 16)
    gx_ref[...] = fc(z, wih_ref, bl_ref, False)       # x@Wih + b     (T*Bp, 4H)

    h_all_ref[...] = jnp.zeros_like(h_all_ref)

    # ---- LSTM recurrence: only h @ Whh + gate math per step ----
    for t in range(T):
        g = gx_ref[t * Bp:t * Bp + B, :] + jnp.dot(
            h, whh_ref[...], preferred_element_type=jnp.float32)
        i = _sigmoid(g[:, 0 * H:1 * H])
        f = _sigmoid(g[:, 1 * H:2 * H])
        gg = jnp.tanh(g[:, 2 * H:3 * H])
        o = _sigmoid(g[:, 3 * H:4 * H])
        c = f * c + i * gg
        h = o * jnp.tanh(c)
        h_all_ref[t * Bp:t * Bp + B, :] = h           # aligned (t*Bp) store

    # ---- model_out applied once to all hidden states ----
    y = fc(h_all_ref[...], wo1_ref, bo1_ref, True)    # (T*Bp, 32)
    o_ref[...] = fc(y, wo2_ref, bo2_ref, False)       # (T*Bp, 1)


def pallas_head(x_feat, a_flat, gp, *, T, B_act, Bp, B_img):
    kernel = functools.partial(
        _head_kernel, T=T, B=B_act, Bp=Bp, H=RNNDIM,
        broadcast_obs=(B_img == 1 and B_act > 1))
    return pl.pallas_call(
        kernel,
        out_shape=jax.ShapeDtypeStruct((T * Bp, 1), jnp.float32),
        scratch_shapes=[pltpu.VMEM((T * Bp, 4 * RNNDIM), jnp.float32),
                        pltpu.VMEM((T * Bp, RNNDIM), jnp.float32)],
    )(x_feat, a_flat,
      gp["conv3_w"], gp["conv3_b"],
      gp["fc1_w"], gp["fc1_b"], gp["fc2_w"], gp["fc2_b"],
      gp["ih1_w"], gp["ih1_b"], gp["ih2_w"], gp["ih2_b"],
      gp["act1_w"], gp["act1_b"], gp["act2_w"], gp["act2_b"],
      gp["lstm_wih"], gp["lstm_b"], gp["lstm_whh"],
      gp["out1_w"], gp["out1_b"], gp["out2_w"], gp["out2_b"])


# ----------------------------------------------------------------------------
# Parameters (deterministic synthetic init; shapes from HERDR.__init__)
# ----------------------------------------------------------------------------
def init_params(key):
    def dense(k, fin, fout):
        k1, k2 = jax.random.split(k)
        w = jax.random.normal(k1, (fin, fout), jnp.float32) / jnp.sqrt(fin)
        b = jax.random.normal(k2, (fout,), jnp.float32) * 0.01
        return w, b

    def conv(k, cout, cin, ks):
        k1, k2 = jax.random.split(k)
        w = jax.random.normal(k1, (cout, cin, ks, ks), jnp.float32) / jnp.sqrt(cin * ks * ks)
        b = jax.random.normal(k2, (cout,), jnp.float32) * 0.01
        return w, b

    keys = jax.random.split(key, 12)
    p = {}
    p["conv1"] = conv(keys[0], 32, 3, 5)
    p["conv2"] = conv(keys[1], 64, 32, 3)
    p["conv3"] = conv(keys[2], 64, 64, 3)
    p["fc1"] = dense(keys[3], 64, 256)          # LazyLinear -> 64 feats for 64x64 img
    p["fc2"] = dense(keys[4], 256, 128)
    p["act1"] = dense(keys[5], 2, 16)
    p["act2"] = dense(keys[6], 16, 16)
    p["ih1"] = dense(keys[7], 128, 128)
    p["ih2"] = dense(keys[8], 128, 2 * RNNDIM)
    p["out1"] = dense(keys[9], RNNDIM, 32)
    p["out2"] = dense(keys[10], 32, 1)
    k1, k2, k3, k4 = jax.random.split(keys[11], 4)
    p["lstm_wih_t"] = jax.random.normal(k1, (16, 4 * RNNDIM), jnp.float32) / jnp.sqrt(16.0)
    p["lstm_whh_t"] = jax.random.normal(k2, (RNNDIM, 4 * RNNDIM), jnp.float32) / jnp.sqrt(float(RNNDIM))
    p["lstm_bih"] = jax.random.normal(k3, (4 * RNNDIM,), jnp.float32) * 0.01
    p["lstm_bhh"] = jax.random.normal(k4, (4 * RNNDIM,), jnp.float32) * 0.01
    return p


def prepare_params(p):
    """One-time, outside-the-jit weight-side transforms -> GEMM-ready params."""
    gp = {}
    # conv1: transpose to (K,N), fold img/255 - 0.5 into weights/bias, pad K to 8x
    w1, b1 = p["conv1"]
    wm1 = jnp.transpose(w1, (2, 3, 1, 0)).reshape(-1, w1.shape[0])     # (75, 32)
    b1f = b1 - 0.5 * jnp.sum(wm1, axis=0)      # (x/255 - 0.5)@W + b == x@(W/255) + b'
    wm1 = wm1 / 255.0
    kpad = _round_up(wm1.shape[0], 8)
    wm1 = jnp.pad(wm1, ((0, kpad - wm1.shape[0]), (0, 0)))             # (80, 32)
    gp["conv1_w"], gp["conv1_b"] = wm1, b1f.reshape(1, -1)
    # conv2 / conv3 as GEMMs
    for name in ("conv2", "conv3"):
        w, b = p[name]
        gp[name + "_w"] = jnp.transpose(w, (2, 3, 1, 0)).reshape(-1, w.shape[0])
        gp[name + "_b"] = b.reshape(1, -1)
    # dense layers
    for name in ("fc1", "fc2", "ih1", "ih2", "act1", "act2", "out1", "out2"):
        w, b = p[name]
        gp[name + "_w"] = w
        gp[name + "_b"] = b.reshape(1, -1)
    # LSTM: pre-sum the two biases
    gp["lstm_wih"] = p["lstm_wih_t"]
    gp["lstm_whh"] = p["lstm_whh_t"]
    gp["lstm_b"] = (p["lstm_bih"] + p["lstm_bhh"]).reshape(1, -1)
    return gp


# ----------------------------------------------------------------------------
# HERDR forward (Pallas path)
# ----------------------------------------------------------------------------
def herdr_forward(gp, img_nchw, action):
    B_img = img_nchw.shape[0]
    B_act, T = action.shape[0], action.shape[1]
    assert B_img == B_act or B_img == 1

    # obs_pre conv trunk: ReLU fused into the convs, pools are pure max
    # (max(relu(x)) == relu(max(x))).
    x = jnp.transpose(img_nchw, (0, 2, 3, 1))                  # NCHW -> NHWC
    x = conv_gemm(x, gp["conv1_w"], gp["conv1_b"], k=5, stride=2,
                  pad_k_to=gp["conv1_w"].shape[0])             # norm folded into W
    x = maxpool(x, 4, 2)
    x = conv_gemm(x, gp["conv2_w"], gp["conv2_b"], k=3, stride=2)
    x = maxpool(x, 2, 2)

    # conv3 patches; spatial collapses to 1x1 for 64x64 input, so NHWC flatten
    # == NCHW flatten and conv3 becomes a dense layer inside the fused head.
    p3, Ho3, Wo3 = _extract_patches(x, 3, 2)
    assert Ho3 == 1 and Wo3 == 1, "64x64 input assumed (LazyLinear -> 64 features)"
    x_feat = p3.reshape(B_img, -1)                             # (B_img, 576)

    # Pad the action batch to a sublane multiple so every per-step slice of the
    # precomputed gate inputs starts 8-aligned (pad rows are discarded).
    Bp = _round_up(B_act, 8)
    a_tbf = jnp.transpose(action, (1, 0, 2))                   # (T, B, 2)
    if Bp != B_act:
        a_tbf = jnp.pad(a_tbf, ((0, 0), (0, Bp - B_act), (0, 0)))
    a_flat = a_tbf.reshape(T * Bp, action.shape[2])

    out = pallas_head(x_feat, a_flat, gp, T=T, B_act=B_act, Bp=Bp, B_img=B_img)
    out = out.reshape(T, Bp, 1)[:, :B_act]                     # drop pad rows
    return jnp.transpose(out, (1, 0, 2))                       # (B, T, 1)


# ----------------------------------------------------------------------------
# Pure-JAX reference (for correctness check only)
# ----------------------------------------------------------------------------
def ref_forward(params, img_nchw, action):
    def lin(x, wb, relu=False):
        w, b = wb
        y = x @ w + b
        return jnp.maximum(y, 0.0) if relu else y

    dn = ("NCHW", "OIHW", "NCHW")
    w1, b1 = params["conv1"]; w2, b2 = params["conv2"]; w3, b3 = params["conv3"]
    x = img_nchw / 255.0 - 0.5
    x = lax.conv_general_dilated(x, w1, (2, 2), "VALID", dimension_numbers=dn) + b1[None, :, None, None]
    x = lax.reduce_window(x, -jnp.inf, lax.max, (1, 1, 4, 4), (1, 1, 2, 2), "VALID")
    x = jnp.maximum(x, 0.0)
    x = lax.conv_general_dilated(x, w2, (2, 2), "VALID", dimension_numbers=dn) + b2[None, :, None, None]
    x = lax.reduce_window(x, -jnp.inf, lax.max, (1, 1, 2, 2), (1, 1, 2, 2), "VALID")
    x = jnp.maximum(x, 0.0)
    x = lax.conv_general_dilated(x, w3, (2, 2), "VALID", dimension_numbers=dn) + b3[None, :, None, None]
    x = jnp.maximum(x, 0.0)
    x = x.reshape(x.shape[0], -1)
    x = lin(x, params["fc1"], True)
    obs = lin(x, params["fc2"])
    obs = lin(obs, params["ih1"], True)
    obs = lin(obs, params["ih2"])
    Hx, Cx = obs[:, :RNNDIM], obs[:, RNNDIM:]
    B_act, T = action.shape[0], action.shape[1]
    if img_nchw.shape[0] == 1:
        Hx = jnp.broadcast_to(Hx, (B_act, RNNDIM))
        Cx = jnp.broadcast_to(Cx, (B_act, RNNDIM))
    a = lin(action.reshape(B_act * T, 2), params["act1"], True)
    a = lin(a, params["act2"]).reshape(B_act, T, 16).transpose(1, 0, 2)
    lstm_b = params["lstm_bih"] + params["lstm_bhh"]

    def step(carry, xt):
        h, c = carry
        g = xt @ params["lstm_wih_t"] + h @ params["lstm_whh_t"] + lstm_b
        H = RNNDIM
        i = _sigmoid(g[:, :H]); f = _sigmoid(g[:, H:2 * H])
        gg = jnp.tanh(g[:, 2 * H:3 * H]); o = _sigmoid(g[:, 3 * H:])
        c = f * c + i * gg
        h = o * jnp.tanh(c)
        return (h, c), h

    (_, _), hs = lax.scan(step, (Hx, Cx), a)
    out = hs.transpose(1, 0, 2)
    o = lin(out.reshape(B_act * T, RNNDIM), params["out1"], True)
    o = lin(o, params["out2"])
    return o.reshape(B_act, T, 1)


if __name__ == "__main__":
    key = jax.random.PRNGKey(0)
    pkey, ikey, akey = jax.random.split(key, 3)
    params = init_params(pkey)
    gemm_params = prepare_params(params)   # one-time weight-side transforms

    B, T = 2, 8  # batch of 2 images + 2 action sequences of horizon 8
    img = jax.random.uniform(ikey, (B, 3, 64, 64), jnp.float32, 0.0, 255.0)
    action = jax.random.normal(akey, (B, T, 2), jnp.float32)

    fwd = jax.jit(herdr_forward)
    out = jax.block_until_ready(fwd(gemm_params, img, action))
    assert out.shape == (B, T, 1)

    with jax.default_matmul_precision("float32"):
        ref = ref_forward(params, img, action)
    np.testing.assert_allclose(np.asarray(out), np.asarray(ref), rtol=5e-3, atol=5e-3)

    print("KERNEL_OK")
</pallas_src>

<mosaic_0001>
module attributes {stable_mosaic.version = 11 : i64} {
  func.func @_linear_kernel(%arg0: i32, %arg1: memref<600x80xf32, #tpu.memory_space<vmem>>, %arg2: memref<80x32xf32, #tpu.memory_space<vmem>>, %arg3: memref<1x32xf32, #tpu.memory_space<vmem>>, %arg4: memref<600x32xf32, #tpu.memory_space<vmem>>) attributes {dimension_semantics = [#tpu.dimension_semantics<parallel>], iteration_bounds = array<i64: 3>, scalar_prefetch = 0 : i64, scratch_operands = 0 : i64, tpu.core_type = #tpu.core_type<tc>, window_params = [{transform_indices = @transform_0, window_bounds = array<i64: 600, 80>}, {pipeline_mode = #tpu.pipeline_mode<synchronous>, transform_indices = @transform_1, window_bounds = array<i64: 80, 32>}, {pipeline_mode = #tpu.pipeline_mode<synchronous>, transform_indices = @transform_2, window_bounds = array<i64: 1, 32>}, {transform_indices = @transform_3, window_bounds = array<i64: 600, 32>}]} {
    %c0 = arith.constant 0 : index
    %c0_0 = arith.constant 0 : index
    %0 = vector.load %arg1[%c0, %c0_0] : memref<600x80xf32, #tpu.memory_space<vmem>>, vector<600x80xf32>
    %c0_1 = arith.constant 0 : index
    %c0_2 = arith.constant 0 : index
    %1 = vector.load %arg2[%c0_1, %c0_2] : memref<80x32xf32, #tpu.memory_space<vmem>>, vector<80x32xf32>
    %cst = arith.constant dense<0.000000e+00> : vector<600x32xf32>
    %2 = tpu.matmul %0, %1, %cst {dimension_numbers = #tpu.dot_dimension_numbers<[1], [0], [0], [1], [0, 0, 1, 1], [], []>} : vector<600x80xf32>, vector<80x32xf32>, vector<600x32xf32> -> vector<600x32xf32>
    %c0_3 = arith.constant 0 : index
    %c0_4 = arith.constant 0 : index
    %3 = vector.load %arg3[%c0_3, %c0_4] : memref<1x32xf32, #tpu.memory_space<vmem>>, vector<1x32xf32>
    %4 = vector.broadcast %3 : vector<1x32xf32> to vector<600x32xf32>
    %5 = arith.addf %2, %4 : vector<600x32xf32>
    %cst_5 = arith.constant 0.000000e+00 : f32
    %6 = vector.broadcast %cst_5 : f32 to vector<600x32xf32>
    %7 = arith.maximumf %5, %6 : vector<600x32xf32>
    %c0_6 = arith.constant 0 : index
    %c0_7 = arith.constant 0 : index
    %8 = vector.load %arg4[%c0_6, %c0_7] : memref<600x32xf32, #tpu.memory_space<vmem>>, vector<600x32xf32>
    tpu.vector_store %arg4[%c0_6, %c0_7], %7 {strides = array<i32>} : memref<600x32xf32, #tpu.memory_space<vmem>>, vector<600x32xf32>,
    return
  }
  func.func @transform_0(%arg0: i32) -> (i32, i32) {
    %c0_i32 = arith.constant 0 : i32
    %c0_i32_0 = arith.constant 0 : i32
    return %arg0, %c0_i32 : i32, i32
  }
  func.func @transform_1(%arg0: i32) -> (i32, i32) {
    %c0_i32 = arith.constant 0 : i32
    %c0_i32_0 = arith.constant 0 : i32
    %c0_i32_1 = arith.constant 0 : i32
    return %c0_i32, %c0_i32_0 : i32, i32
  }
  func.func @transform_2(%arg0: i32) -> (i32, i32) {
    %c0_i32 = arith.constant 0 : i32
    %c0_i32_0 = arith.constant 0 : i32
    %c0_i32_1 = arith.constant 0 : i32
    return %c0_i32, %c0_i32_0 : i32, i32
  }
  func.func @transform_3(%arg0: i32) -> (i32, i32) {
    %c0_i32 = arith.constant 0 : i32
    %c0_i32_0 = arith.constant 0 : i32
    return %arg0, %c0_i32 : i32, i32
  }
}

module attributes {stable_mosaic.version = 11 : i64} {
  func.func @_maxpool_kernel(%arg0: memref<16x98x128xf32, #tpu.memory_space<vmem>>, %arg1: memref<98x128xf32, #tpu.memory_space<vmem>>) attributes {dimension_semantics = [], scalar_prefetch = 0 : i64, scratch_operands = 0 : i64, tpu.core_type = #tpu.core_type<tc>} {
    %c0 = arith.constant 0 : index
    %c0_0 = arith.constant 0 : index
    %c0_1 = arith.constant 0 : index
    %0 = vector.load %arg0[%c0, %c0_0, %c0_1] : memref<16x98x128xf32, #tpu.memory_space<vmem>>, vector<1x98x128xf32>
    %1 = vector.shape_cast %0 : vector<1x98x128xf32> to vector<98x128xf32>
    %c1 = arith.constant 1 : index
    %c0_2 = arith.constant 0 : index
    %c0_3 = arith.constant 0 : index
    %2 = vector.load %arg0[%c1, %c0_2, %c0_3] : memref<16x98x128xf32, #tpu.memory_space<vmem>>, vector<1x98x128xf32>
    %3 = vector.shape_cast %2 : vector<1x98x128xf32> to vector<98x128xf32>
    %4 = arith.maximumf %1, %3 : vector<98x128xf32>
    %c2 = arith.constant 2 : index
    %c0_4 = arith.constant 0 : index
    %c0_5 = arith.constant 0 : index
    %5 = vector.load %arg0[%c2, %c0_4, %c0_5] : memref<16x98x128xf32, #tpu.memory_space<vmem>>, vector<1x98x128xf32>
    %6 = vector.shape_cast %5 : vector<1x98x128xf32> to vector<98x128xf32>
    %7 = arith.maximumf %4, %6 : vector<98x128xf32>
    %c3 = arith.constant 3 : index
    %c0_6 = arith.constant 0 : index
    %c0_7 = arith.constant 0 : index
    %8 = vector.load %arg0[%c3, %c0_6, %c0_7] : memref<16x98x128xf32, #tpu.memory_space<vmem>>, vector<1x98x128xf32>
    %9 = vector.shape_cast %8 : vector<1x98x128xf32> to vector<98x128xf32>
    %10 = arith.maximumf %7, %9 : vector<98x128xf32>
    %c4 = arith.constant 4 : index
    %c0_8 = arith.constant 0 : index
    %c0_9 = arith.constant 0 : index
    %11 = vector.load %arg0[%c4, %c0_8, %c0_9] : memref<16x98x128xf32, #tpu.memory_space<vmem>>, vector<1x98x128xf32>
    %12 = vector.shape_cast %11 : vector<1x98x128xf32> to vector<98x128xf32>
    %13 = arith.maximumf %10, %12 : vector<98x128xf32>
    %c5 = arith.constant 5 : index
    %c0_10 = arith.constant 0 : index
    %c0_11 = arith.constant 0 : index
    %14 = vector.load %arg0[%c5, %c0_10, %c0_11] : memref<16x98x128xf32, #tpu.memory_space<vmem>>, vector<1x98x128xf32>
    %15 = vector.shape_cast %14 : vector<1x98x128xf32> to vector<98x128xf32>
    %16 = arith.maximumf %13, %15 : vector<98x128xf32>
    %c6 = arith.constant 6 : index
    %c0_12 = arith.constant 0 : index
    %c0_13 = arith.constant 0 : index
    %17 = vector.load %arg0[%c6, %c0_12, %c0_13] : memref<16x98x128xf32, #tpu.memory_space<vmem>>, vector<1x98x128xf32>
    %18 = vector.shape_cast %17 : vector<1x98x128xf32> to vector<98x128xf32>
    %19 = arith.maximumf %16, %18 : vector<98x128xf32>
    %c7 = arith.constant 7 : index
    %c0_14 = arith.constant 0 : index
    %c0_15 = arith.constant 0 : index
    %20 = vector.load %arg0[%c7, %c0_14, %c0_15] : memref<16x98x128xf32, #tpu.memory_space<vmem>>, vector<1x98x128xf32>
    %21 = vector.shape_cast %20 : vector<1x98x128xf32> to vector<98x128xf32>
    %22 = arith.maximumf %19, %21 : vector<98x128xf32>
    %c8 = arith.constant 8 : index
    %c0_16 = arith.constant 0 : index
    %c0_17 = arith.constant 0 : index
    %23 = vector.load %arg0[%c8, %c0_16, %c0_17] : memref<16x98x128xf32, #tpu.memory_space<vmem>>, vector<1x98x128xf32>
    %24 = vector.shape_cast %23 : vector<1x98x128xf32> to vector<98x128xf32>
    %25 = arith.maximumf %22, %24 : vector<98x128xf32>
    %c9 = arith.constant 9 : index
    %c0_18 = arith.constant 0 : index
    %c0_19 = arith.constant 0 : index
    %26 = vector.load %arg0[%c9, %c0_18, %c0_19] : memref<16x98x128xf32, #tpu.memory_space<vmem>>, vector<1x98x128xf32>
    %27 = vector.shape_cast %26 : vector<1x98x128xf32> to vector<98x128xf32>
    %28 = arith.maximumf %25, %27 : vector<98x128xf32>
    %c10 = arith.constant 10 : index
    %c0_20 = arith.constant 0 : index
    %c0_21 = arith.constant 0 : index
    %29 = vector.load %arg0[%c10, %c0_20, %c0_21] : memref<16x98x128xf32, #tpu.memory_space<vmem>>, vector<1x98x128xf32>
    %30 = vector.shape_cast %29 : vector<1x98x128xf32> to vector<98x128xf32>
    %31 = arith.maximumf %28, %30 : vector<98x128xf32>
    %c11 = arith.constant 11 : index
    %c0_22 = arith.constant 0 : index
    %c0_23 = arith.constant 0 : index
    %32 = vector.load %arg0[%c11, %c0_22, %c0_23] : memref<16x98x128xf32, #tpu.memory_space<vmem>>, vector<1x98x128xf32>
    %33 = vector.shape_cast %32 : vector<1x98x128xf32> to vector<98x128xf32>
    %34 = arith.maximumf %31, %33 : vector<98x128xf32>
    %c12 = arith.constant 12 : index
    %c0_24 = arith.constant 0 : index
    %c0_25 = arith.constant 0 : index
    %35 = vector.load %arg0[%c12, %c0_24, %c0_25] : memref<16x98x128xf32, #tpu.memory_space<vmem>>, vector<1x98x128xf32>
    %36 = vector.shape_cast %35 : vector<1x98x128xf32> to vector<98x128xf32>
    %37 = arith.maximumf %34, %36 : vector<98x128xf32>
    %c13 = arith.constant 13 : index
    %c0_26 = arith.constant 0 : index
    %c0_27 = arith.constant 0 : index
    %38 = vector.load %arg0[%c13, %c0_26, %c0_27] : memref<16x98x128xf32, #tpu.memory_space<vmem>>, vector<1x98x128xf32>
    %39 = vector.shape_cast %38 : vector<1x98x128xf32> to vector<98x128xf32>
    %40 = arith.maximumf %37, %39 : vector<98x128xf32>
    %c14 = arith.constant 14 : index
    %c0_28 = arith.constant 0 : index
    %c0_29 = arith.constant 0 : index
    %41 = vector.load %arg0[%c14, %c0_28, %c0_29] : memref<16x98x128xf32, #tpu.memory_space<vmem>>, vector<1x98x128xf32>
    %42 = vector.shape_cast %41 : vector<1x98x128xf32> to vector<98x128xf32>
    %43 = arith.maximumf %40, %42 : vector<98x128xf32>
    %c15 = arith.constant 15 : index
    %c0_30 = arith.constant 0 : index
    %c0_31 = arith.constant 0 : index
    %44 = vector.load %arg0[%c15, %c0_30, %c0_31] : memref<16x98x128xf32, #tpu.memory_space<vmem>>, vector<1x98x128xf32>
    %45 = vector.shape_cast %44 : vector<1x98x128xf32> to vector<98x128xf32>
    %46 = arith.maximumf %43, %45 : vector<98x128xf32>
    %c0_32 = arith.constant 0 : index
    %c0_33 = arith.constant 0 : index
    %47 = vector.load %arg1[%c0_32, %c0_33] : memref<98x128xf32, #tpu.memory_space<vmem>>, vector<98x128xf32>
    tpu.vector_store %arg1[%c0_32, %c0_33], %46 {strides = array<i32>} : memref<98x128xf32, #tpu.memory_space<vmem>>, vector<98x128xf32>,
    return
  }
}

module attributes {stable_mosaic.version = 11 : i64} {
  func.func @_linear_kernel(%arg0: i32, %arg1: memref<72x288xf32, #tpu.memory_space<vmem>>, %arg2: memref<288x64xf32, #tpu.memory_space<vmem>>, %arg3: memref<1x64xf32, #tpu.memory_space<vmem>>, %arg4: memref<72x64xf32, #tpu.memory_space<vmem>>) attributes {dimension_semantics = [#tpu.dimension_semantics<parallel>], iteration_bounds = array<i64: 1>, scalar_prefetch = 0 : i64, scratch_operands = 0 : i64, tpu.core_type = #tpu.core_type<tc>, window_params = [{transform_indices = @transform_0, window_bounds = array<i64: 72, 288>}, {pipeline_mode = #tpu.pipeline_mode<synchronous>, transform_indices = @transform_1, window_bounds = array<i64: 288, 64>}, {pipeline_mode = #tpu.pipeline_mode<synchronous>, transform_indices = @transform_2, window_bounds = array<i64: 1, 64>}, {transform_indices = @transform_3, window_bounds = array<i64: 72, 64>}]} {
    %c0 = arith.constant 0 : index
    %c0_0 = arith.constant 0 : index
    %0 = vector.load %arg1[%c0, %c0_0] : memref<72x288xf32, #tpu.memory_space<vmem>>, vector<72x288xf32>
    %c0_1 = arith.constant 0 : index
    %c0_2 = arith.constant 0 : index
    %1 = vector.load %arg2[%c0_1, %c0_2] : memref<288x64xf32, #tpu.memory_space<vmem>>, vector<288x64xf32>
    %cst = arith.constant dense<0.000000e+00> : vector<72x64xf32>
    %2 = tpu.matmul %0, %1, %cst {dimension_numbers = #tpu.dot_dimension_numbers<[1], [0], [0], [1], [0, 0, 1, 1], [], []>} : vector<72x288xf32>, vector<288x64xf32>, vector<72x64xf32> -> vector<72x64xf32>
    %c0_3 = arith.constant 0 : index
    %c0_4 = arith.constant 0 : index
    %3 = vector.load %arg3[%c0_3, %c0_4] : memref<1x64xf32, #tpu.memory_space<vmem>>, vector<1x64xf32>
    %4 = vector.broadcast %3 : vector<1x64xf32> to vector<72x64xf32>
    %5 = arith.addf %2, %4 : vector<72x64xf32>
    %cst_5 = arith.constant 0.000000e+00 : f32
    %6 = vector.broadcast %cst_5 : f32 to vector<72x64xf32>
    %7 = arith.maximumf %5, %6 : vector<72x64xf32>
    %c0_6 = arith.constant 0 : index
    %c0_7 = arith.constant 0 : index
    %8 = vector.load %arg4[%c0_6, %c0_7] : memref<72x64xf32, #tpu.memory_space<vmem>>, vector<72x64xf32>
    tpu.vector_store %arg4[%c0_6, %c0_7], %7 {strides = array<i32>} : memref<72x64xf32, #tpu.memory_space<vmem>>, vector<72x64xf32>,
    return
  }
  func.func @transform_0(%arg0: i32) -> (i32, i32) {
    %c0_i32 = arith.constant 0 : i32
    %c0_i32_0 = arith.constant 0 : i32
    return %arg0, %c0_i32 : i32, i32
  }
  func.func @transform_1(%arg0: i32) -> (i32, i32) {
    %c0_i32 = arith.constant 0 : i32
    %c0_i32_0 = arith.constant 0 : i32
    %c0_i32_1 = arith.constant 0 : i32
    return %c0_i32, %c0_i32_0 : i32, i32
  }
  func.func @transform_2(%arg0: i32) -> (i32, i32) {
    %c0_i32 = arith.constant 0 : i32
    %c0_i32_0 = arith.constant 0 : i32
    %c0_i32_1 = arith.constant 0 : i32
    return %c0_i32, %c0_i32_0 : i32, i32
  }
  func.func @transform_3(%arg0: i32) -> (i32, i32) {
    %c0_i32 = arith.constant 0 : i32
    %c0_i32_0 = arith.constant 0 : i32
    return %arg0, %c0_i32 : i32, i32
  }
}

module attributes {stable_mosaic.version = 11 : i64} {
  func.func @_maxpool_kernel(%arg0: memref<4x9x128xf32, #tpu.memory_space<vmem>>, %arg1: memref<9x128xf32, #tpu.memory_space<vmem>>) attributes {dimension_semantics = [], scalar_prefetch = 0 : i64, scratch_operands = 0 : i64, tpu.core_type = #tpu.core_type<tc>} {
    %c0 = arith.constant 0 : index
    %c0_0 = arith.constant 0 : index
    %c0_1 = arith.constant 0 : index
    %0 = vector.load %arg0[%c0, %c0_0, %c0_1] : memref<4x9x128xf32, #tpu.memory_space<vmem>>, vector<1x9x128xf32>
    %1 = vector.shape_cast %0 : vector<1x9x128xf32> to vector<9x128xf32>
    %c1 = arith.constant 1 : index
    %c0_2 = arith.constant 0 : index
    %c0_3 = arith.constant 0 : index
    %2 = vector.load %arg0[%c1, %c0_2, %c0_3] : memref<4x9x128xf32, #tpu.memory_space<vmem>>, vector<1x9x128xf32>
    %3 = vector.shape_cast %2 : vector<1x9x128xf32> to vector<9x128xf32>
    %4 = arith.maximumf %1, %3 : vector<9x128xf32>
    %c2 = arith.constant 2 : index
    %c0_4 = arith.constant 0 : index
    %c0_5 = arith.constant 0 : index
    %5 = vector.load %arg0[%c2, %c0_4, %c0_5] : memref<4x9x128xf32, #tpu.memory_space<vmem>>, vector<1x9x128xf32>
    %6 = vector.shape_cast %5 : vector<1x9x128xf32> to vector<9x128xf32>
    %7 = arith.maximumf %4, %6 : vector<9x128xf32>
    %c3 = arith.constant 3 : index
    %c0_6 = arith.constant 0 : index
    %c0_7 = arith.constant 0 : index
    %8 = vector.load %arg0[%c3, %c0_6, %c0_7] : memref<4x9x128xf32, #tpu.memory_space<vmem>>, vector<1x9x128xf32>
    %9 = vector.shape_cast %8 : vector<1x9x128xf32> to vector<9x128xf32>
    %10 = arith.maximumf %7, %9 : vector<9x128xf32>
    %c0_8 = arith.constant 0 : index
    %c0_9 = arith.constant 0 : index
    %11 = vector.load %arg1[%c0_8, %c0_9] : memref<9x128xf32, #tpu.memory_space<vmem>>, vector<9x128xf32>
    tpu.vector_store %arg1[%c0_8, %c0_9], %10 {strides = array<i32>} : memref<9x128xf32, #tpu.memory_space<vmem>>, vector<9x128xf32>,
    return
  }
}

module attributes {stable_mosaic.version = 11 : i64} {
  func.func @_head_kernel(%arg0: memref<2x576xf32, #tpu.memory_space<vmem>>, %arg1: memref<64x2xf32, #tpu.memory_space<vmem>>, %arg2: memref<576x64xf32, #tpu.memory_space<vmem>>, %arg3: memref<1x64xf32, #tpu.memory_space<vmem>>, %arg4: memref<64x256xf32, #tpu.memory_space<vmem>>, %arg5: memref<1x256xf32, #tpu.memory_space<vmem>>, %arg6: memref<256x128xf32, #tpu.memory_space<vmem>>, %arg7: memref<1x128xf32, #tpu.memory_space<vmem>>, %arg8: memref<128x128xf32, #tpu.memory_space<vmem>>, %arg9: memref<1x128xf32, #tpu.memory_space<vmem>>, %arg10: memref<128x128xf32, #tpu.memory_space<vmem>>, %arg11: memref<1x128xf32, #tpu.memory_space<vmem>>, %arg12: memref<2x16xf32, #tpu.memory_space<vmem>>, %arg13: memref<1x16xf32, #tpu.memory_space<vmem>>, %arg14: memref<16x16xf32, #tpu.memory_space<vmem>>, %arg15: memref<1x16xf32, #tpu.memory_space<vmem>>, %arg16: memref<16x256xf32, #tpu.memory_space<vmem>>, %arg17: memref<1x256xf32, #tpu.memory_space<vmem>>, %arg18: memref<64x256xf32, #tpu.memory_space<vmem>>, %arg19: memref<64x32xf32, #tpu.memory_space<vmem>>, %arg20: memref<1x32xf32, #tpu.memory_space<vmem>>, %arg21: memref<32x1xf32, #tpu.memory_space<vmem>>, %arg22: memref<1x1xf32, #tpu.memory_space<vmem>>, %arg23: memref<64x1xf32, #tpu.memory_space<vmem>>, %arg24: memref<64x256xf32, #tpu.memory_space<vmem>>, %arg25: memref<64x64xf32, #tpu.memory_space<vmem>>) attributes {dimension_semantics = [], scalar_prefetch = 0 : i64, scratch_operands = 2 : i64, tpu.core_type = #tpu.core_type<tc>} {
    %c0 = arith.constant 0 : index
    %c0_0 = arith.constant 0 : index
    %0 = vector.load %arg0[%c0, %c0_0] : memref<2x576xf32, #tpu.memory_space<vmem>>, vector<2x576xf32>
    %c0_1 = arith.constant 0 : index
    %c0_2 = arith.constant 0 : index
    %1 = vector.load %arg2[%c0_1, %c0_2] : memref<576x64xf32, #tpu.memory_space<vmem>>, vector<576x64xf32>
    %cst = arith.constant dense<0.000000e+00> : vector<2x64xf32>
    %2 = tpu.matmul %0, %1, %cst {dimension_numbers = #tpu.dot_dimension_numbers<[1], [0], [0], [1], [0, 0, 1, 1], [], []>} : vector<2x576xf32>, vector<576x64xf32>, vector<2x64xf32> -> vector<2x64xf32>
    %c0_3 = arith.constant 0 : index
    %c0_4 = arith.constant 0 : index
    %3 = vector.load %arg3[%c0_3, %c0_4] : memref<1x64xf32, #tpu.memory_space<vmem>>, vector<1x64xf32>
    %4 = vector.broadcast %3 : vector<1x64xf32> to vector<2x64xf32>
    %5 = arith.addf %2, %4 : vector<2x64xf32>
    %cst_5 = arith.constant 0.000000e+00 : f32
    %6 = vector.broadcast %cst_5 : f32 to vector<2x64xf32>
    %7 = arith.maximumf %5, %6 : vector<2x64xf32>
    %c0_6 = arith.constant 0 : index
    %c0_7 = arith.constant 0 : index
    %8 = vector.load %arg4[%c0_6, %c0_7] : memref<64x256xf32, #tpu.memory_space<vmem>>, vector<64x256xf32>
    %cst_8 = arith.constant dense<0.000000e+00> : vector<2x256xf32>
    %9 = tpu.matmul %7, %8, %cst_8 {dimension_numbers = #tpu.dot_dimension_numbers<[1], [0], [0], [1], [0, 0, 1, 1], [], []>} : vector<2x64xf32>, vector<64x256xf32>, vector<2x256xf32> -> vector<2x256xf32>
    %c0_9 = arith.constant 0 : index
    %c0_10 = arith.constant 0 : index
    %10 = vector.load %arg5[%c0_9, %c0_10] : memref<1x256xf32, #tpu.memory_space<vmem>>, vector<1x256xf32>
    %11 = vector.broadcast %10 : vector<1x256xf32> to vector<2x256xf32>
    %12 = arith.addf %9, %11 : vector<2x256xf32>
    %cst_11 = arith.constant 0.000000e+00 : f32
    %13 = vector.broadcast %cst_11 : f32 to vector<2x256xf32>
    %14 = arith.maximumf %12, %13 : vector<2x256xf32>
    %c0_12 = arith.constant 0 : index
    %c0_13 = arith.constant 0 : index
    %15 = vector.load %arg6[%c0_12, %c0_13] : memref<256x128xf32, #tpu.memory_space<vmem>>, vector<256x128xf32>
    %cst_14 = arith.constant dense<0.000000e+00> : vector<2x128xf32>
    %16 = tpu.matmul %14, %15, %cst_14 {dimension_numbers = #tpu.dot_dimension_numbers<[1], [0], [0], [1], [0, 0, 1, 1], [], []>} : vector<2x256xf32>, vector<256x128xf32>, vector<2x128xf32> -> vector<2x128xf32>
    %c0_15 = arith.constant 0 : index
    %c0_16 = arith.constant 0 : index
    %17 = vector.load %arg7[%c0_15, %c0_16] : memref<1x128xf32, #tpu.memory_space<vmem>>, vector<1x128xf32>
    %18 = vector.broadcast %17 : vector<1x128xf32> to vector<2x128xf32>
    %19 = arith.addf %16, %18 : vector<2x128xf32>
    %c0_17 = arith.constant 0 : index
    %c0_18 = arith.constant 0 : index
    %20 = vector.load %arg8[%c0_17, %c0_18] : memref<128x128xf32, #tpu.memory_space<vmem>>, vector<128x128xf32>
    %cst_19 = arith.constant dense<0.000000e+00> : vector<2x128xf32>
    %21 = tpu.matmul %19, %20, %cst_19 {dimension_numbers = #tpu.dot_dimension_numbers<[1], [0], [0], [1], [0, 0, 1, 1], [], []>} : vector<2x128xf32>, vector<128x128xf32>, vector<2x128xf32> -> vector<2x128xf32>
    %c0_20 = arith.constant 0 : index
    %c0_21 = arith.constant 0 : index
    %22 = vector.load %arg9[%c0_20, %c0_21] : memref<1x128xf32, #tpu.memory_space<vmem>>, vector<1x128xf32>
    %23 = vector.broadcast %22 : vector<1x128xf32> to vector<2x128xf32>
    %24 = arith.addf %21, %23 : vector<2x128xf32>
    %cst_22 = arith.constant 0.000000e+00 : f32
    %25 = vector.broadcast %cst_22 : f32 to vector<2x128xf32>
    %26 = arith.maximumf %24, %25 : vector<2x128xf32>
    %c0_23 = arith.constant 0 : index
    %c0_24 = arith.constant 0 : index
    %27 = vector.load %arg10[%c0_23, %c0_24] : memref<128x128xf32, #tpu.memory_space<vmem>>, vector<128x128xf32>
    %cst_25 = arith.constant dense<0.000000e+00> : vector<2x128xf32>
    %28 = tpu.matmul %26, %27, %cst_25 {dimension_numbers = #tpu.dot_dimension_numbers<[1], [0], [0], [1], [0, 0, 1, 1], [], []>} : vector<2x128xf32>, vector<128x128xf32>, vector<2x128xf32> -> vector<2x128xf32>
    %c0_26 = arith.constant 0 : index
    %c0_27 = arith.constant 0 : index
    %29 = vector.load %arg11[%c0_26, %c0_27] : memref<1x128xf32, #tpu.memory_space<vmem>>, vector<1x128xf32>
    %30 = vector.broadcast %29 : vector<1x128xf32> to vector<2x128xf32>
    %31 = arith.addf %28, %30 : vector<2x128xf32>
    %32 = vector.extract_strided_slice %31 {offsets = [0, 0], sizes = [2, 64], strides = [1, 1]} : vector<2x128xf32> to vector<2x64xf32>
    %33 = vector.extract_strided_slice %31 {offsets = [0, 64], sizes = [2, 64], strides = [1, 1]} : vector<2x128xf32> to vector<2x64xf32>
    %c0_28 = arith.constant 0 : index
    %c0_29 = arith.constant 0 : index
    %34 = vector.load %arg1[%c0_28, %c0_29] : memref<64x2xf32, #tpu.memory_space<vmem>>, vector<64x2xf32>
    %c0_30 = arith.constant 0 : index
    %c0_31 = arith.constant 0 : index
    %35 = vector.load %arg12[%c0_30, %c0_31] : memref<2x16xf32, #tpu.memory_space<vmem>>, vector<2x16xf32>
    %cst_32 = arith.constant dense<0.000000e+00> : vector<64x16xf32>
    %36 = tpu.matmul %34, %35, %cst_32 {dimension_numbers = #tpu.dot_dimension_numbers<[1], [0], [0], [1], [0, 0, 1, 1], [], []>} : vector<64x2xf32>, vector<2x16xf32>, vector<64x16xf32> -> vector<64x16xf32>
    %c0_33 = arith.constant 0 : index
    %c0_34 = arith.constant 0 : index
    %37 = vector.load %arg13[%c0_33, %c0_34] : memref<1x16xf32, #tpu.memory_space<vmem>>, vector<1x16xf32>
    %38 = vector.broadcast %37 : vector<1x16xf32> to vector<64x16xf32>
    %39 = arith.addf %36, %38 : vector<64x16xf32>
    %cst_35 = arith.constant 0.000000e+00 : f32
    %40 = vector.broadcast %cst_35 : f32 to vector<64x16xf32>
    %41 = arith.maximumf %39, %40 : vector<64x16xf32>
    %c0_36 = arith.constant 0 : index
    %c0_37 = arith.constant 0 : index
    %42 = vector.load %arg14[%c0_36, %c0_37] : memref<16x16xf32, #tpu.memory_space<vmem>>, vector<16x16xf32>
    %cst_38 = arith.constant dense<0.000000e+00> : vector<64x16xf32>
    %43 = tpu.matmul %41, %42, %cst_38 {dimension_numbers = #tpu.dot_dimension_numbers<[1], [0], [0], [1], [0, 0, 1, 1], [], []>} : vector<64x16xf32>, vector<16x16xf32>, vector<64x16xf32> -> vector<64x16xf32>
    %c0_39 = arith.constant 0 : index
    %c0_40 = arith.constant 0 : index
    %44 = vector.load %arg15[%c0_39, %c0_40] : memref<1x16xf32, #tpu.memory_space<vmem>>, vector<1x16xf32>
    %45 = vector.broadcast %44 : vector<1x16xf32> to vector<64x16xf32>
    %46 = arith.addf %43, %45 : vector<64x16xf32>
    %c0_41 = arith.constant 0 : index
    %c0_42 = arith.constant 0 : index
    %47 = vector.load %arg16[%c0_41, %c0_42] : memref<16x256xf32, #tpu.memory_space<vmem>>, vector<16x256xf32>
    %cst_43 = arith.constant dense<0.000000e+00> : vector<64x256xf32>
    %48 = tpu.matmul %46, %47, %cst_43 {dimension_numbers = #tpu.dot_dimension_numbers<[1], [0], [0], [1], [0, 0, 1, 1], [], []>} : vector<64x16xf32>, vector<16x256xf32>, vector<64x256xf32> -> vector<64x256xf32>
    %c0_44 = arith.constant 0 : index
    %c0_45 = arith.constant 0 : index
    %49 = vector.load %arg17[%c0_44, %c0_45] : memref<1x256xf32, #tpu.memory_space<vmem>>, vector<1x256xf32>
    %50 = vector.broadcast %49 : vector<1x256xf32> to vector<64x256xf32>
    %51 = arith.addf %48, %50 : vector<64x256xf32>
    %c0_46 = arith.constant 0 : index
    %c0_47 = arith.constant 0 : index
    %52 = vector.load %arg24[%c0_46, %c0_47] : memref<64x256xf32, #tpu.memory_space<vmem>>, vector<64x256xf32>
    tpu.vector_store %arg24[%c0_46, %c0_47], %51 {strides = array<i32>} : memref<64x256xf32, #tpu.memory_space<vmem>>, vector<64x256xf32>,
    %cst_48 = arith.constant 0.000000e+00 : f32
    %53 = vector.broadcast %cst_48 : f32 to vector<64x64xf32>
    %c0_49 = arith.constant 0 : index
    %c0_50 = arith.constant 0 : index
    %54 = vector.load %arg25[%c0_49, %c0_50] : memref<64x64xf32, #tpu.memory_space<vmem>>, vector<64x64xf32>
    tpu.vector_store %arg25[%c0_49, %c0_50], %53 {strides = array<i32>} : memref<64x64xf32, #tpu.memory_space<vmem>>, vector<64x64xf32>,
    %c0_51 = arith.constant 0 : index
    %c0_52 = arith.constant 0 : index
    %55 = vector.load %arg24[%c0_51, %c0_52] : memref<64x256xf32, #tpu.memory_space<vmem>>, vector<2x256xf32>
    %c0_53 = arith.constant 0 : index
    %c0_54 = arith.constant 0 : index
    %56 = vector.load %arg18[%c0_53, %c0_54] : memref<64x256xf32, #tpu.memory_space<vmem>>, vector<64x256xf32>
    %cst_55 = arith.constant dense<0.000000e+00> : vector<2x256xf32>
    %57 = tpu.matmul %32, %56, %cst_55 {dimension_numbers = #tpu.dot_dimension_numbers<[1], [0], [0], [1], [0, 0, 1, 1], [], []>} : vector<2x64xf32>, vector<64x256xf32>, vector<2x256xf32> -> vector<2x256xf32>
    %58 = arith.addf %55, %57 : vector<2x256xf32>
    %59 = vector.extract_strided_slice %58 {offsets = [0, 0], sizes = [2, 64], strides = [1, 1]} : vector<2x256xf32> to vector<2x64xf32>
    %cst_56 = arith.constant 5.000000e-01 : f32
    %60 = vector.broadcast %cst_56 : f32 to vector<2x64xf32>
    %61 = arith.mulf %60, %59 : vector<2x64xf32>
    %62 = math.tanh %61 : vector<2x64xf32>
    %cst_57 = arith.constant 1.000000e+00 : f32
    %63 = vector.broadcast %cst_57 : f32 to vector<2x64xf32>
    %64 = arith.addf %62, %63 : vector<2x64xf32>
    %cst_58 = arith.constant 5.000000e-01 : f32
    %65 = vector.broadcast %cst_58 : f32 to vector<2x64xf32>
    %66 = arith.mulf %65, %64 : vector<2x64xf32>
    %67 = vector.extract_strided_slice %58 {offsets = [0, 64], sizes = [2, 64], strides = [1, 1]} : vector<2x256xf32> to vector<2x64xf32>
    %cst_59 = arith.constant 5.000000e-01 : f32
    %68 = vector.broadcast %cst_59 : f32 to vector<2x64xf32>
    %69 = arith.mulf %68, %67 : vector<2x64xf32>
    %70 = math.tanh %69 : vector<2x64xf32>
    %cst_60 = arith.constant 1.000000e+00 : f32
    %71 = vector.broadcast %cst_60 : f32 to vector<2x64xf32>
    %72 = arith.addf %70, %71 : vector<2x64xf32>
    %cst_61 = arith.constant 5.000000e-01 : f32
    %73 = vector.broadcast %cst_61 : f32 to vector<2x64xf32>
    %74 = arith.mulf %73, %72 : vector<2x64xf32>
    %75 = vector.extract_strided_slice %58 {offsets = [0, 128], sizes = [2, 64], strides = [1, 1]} : vector<2x256xf32> to vector<2x64xf32>
    %76 = math.tanh %75 : vector<2x64xf32>
    %77 = vector.extract_strided_slice %58 {offsets = [0, 192], sizes = [2, 64], strides = [1, 1]} : vector<2x256xf32> to vector<2x64xf32>
    %cst_62 = arith.constant 5.000000e-01 : f32
    %78 = vector.broadcast %cst_62 : f32 to vector<2x64xf32>
    %79 = arith.mulf %78, %77 : vector<2x64xf32>
    %80 = math.tanh %79 : vector<2x64xf32>
    %cst_63 = arith.constant 1.000000e+00 : f32
    %81 = vector.broadcast %cst_63 : f32 to vector<2x64xf32>
    %82 = arith.addf %80, %81 : vector<2x64xf32>
    %cst_64 = arith.constant 5.000000e-01 : f32
    %83 = vector.broadcast %cst_64 : f32 to vector<2x64xf32>
    %84 = arith.mulf %83, %82 : vector<2x64xf32>
    %85 = arith.mulf %74, %33 : vector<2x64xf32>
    %86 = arith.mulf %66, %76 : vector<2x64xf32>
    %87 = arith.addf %85, %86 : vector<2x64xf32>
    %88 = math.tanh %87 : vector<2x64xf32>
    %89 = arith.mulf %84, %88 : vector<2x64xf32>
    %c0_65 = arith.constant 0 : index
    %c0_66 = arith.constant 0 : index
    %90 = vector.load %arg25[%c0_65, %c0_66] : memref<64x64xf32, #tpu.memory_space<vmem>>, vector<2x64xf32>
    tpu.vector_store %arg25[%c0_65, %c0_66], %89 {strides = array<i32>} : memref<64x64xf32, #tpu.memory_space<vmem>>, vector<2x64xf32>,
    %c8 = arith.constant 8 : index
    %c0_67 = arith.constant 0 : index
    %91 = vector.load %arg24[%c8, %c0_67] : memref<64x256xf32, #tpu.memory_space<vmem>>, vector<2x256xf32>
    %c0_68 = arith.constant 0 : index
    %c0_69 = arith.constant 0 : index
    %92 = vector.load %arg18[%c0_68, %c0_69] : memref<64x256xf32, #tpu.memory_space<vmem>>, vector<64x256xf32>
    %cst_70 = arith.constant dense<0.000000e+00> : vector<2x256xf32>
    %93 = tpu.matmul %89, %92, %cst_70 {dimension_numbers = #tpu.dot_dimension_numbers<[1], [0], [0], [1], [0, 0, 1, 1], [], []>} : vector<2x64xf32>, vector<64x256xf32>, vector<2x256xf32> -> vector<2x256xf32>
    %94 = arith.addf %91, %93 : vector<2x256xf32>
    %95 = vector.extract_strided_slice %94 {offsets = [0, 0], sizes = [2, 64], strides = [1, 1]} : vector<2x256xf32> to vector<2x64xf32>
    %cst_71 = arith.constant 5.000000e-01 : f32
    %96 = vector.broadcast %cst_71 : f32 to vector<2x64xf32>
    %97 = arith.mulf %96, %95 : vector<2x64xf32>
    %98 = math.tanh %97 : vector<2x64xf32>
    %cst_72 = arith.constant 1.000000e+00 : f32
    %99 = vector.broadcast %cst_72 : f32 to vector<2x64xf32>
    %100 = arith.addf %98, %99 : vector<2x64xf32>
    %cst_73 = arith.constant 5.000000e-01 : f32
    %101 = vector.broadcast %cst_73 : f32 to vector<2x64xf32>
    %102 = arith.mulf %101, %100 : vector<2x64xf32>
    %103 = vector.extract_strided_slice %94 {offsets = [0, 64], sizes = [2, 64], strides = [1, 1]} : vector<2x256xf32> to vector<2x64xf32>
    %cst_74 = arith.constant 5.000000e-01 : f32
    %104 = vector.broadcast %cst_74 : f32 to vector<2x64xf32>
    %105 = arith.mulf %104, %103 : vector<2x64xf32>
    %106 = math.tanh %105 : vector<2x64xf32>
    %cst_75 = arith.constant 1.000000e+00 : f32
    %107 = vector.broadcast %cst_75 : f32 to vector<2x64xf32>
    %108 = arith.addf %106, %107 : vector<2x64xf32>
    %cst_76 = arith.constant 5.000000e-01 : f32
    %109 = vector.broadcast %cst_76 : f32 to vector<2x64xf32>
    %110 = arith.mulf %109, %108 : vector<2x64xf32>
    %111 = vector.extract_strided_slice %94 {offsets = [0, 128], sizes = [2, 64], strides = [1, 1]} : vector<2x256xf32> to vector<2x64xf32>
    %112 = math.tanh %111 : vector<2x64xf32>
    %113 = vector.extract_strided_slice %94 {offsets = [0, 192], sizes = [2, 64], strides = [1, 1]} : vector<2x256xf32> to vector<2x64xf32>
    %cst_77 = arith.constant 5.000000e-01 : f32
    %114 = vector.broadcast %cst_77 : f32 to vector<2x64xf32>
    %115 = arith.mulf %114, %113 : vector<2x64xf32>
    %116 = math.tanh %115 : vector<2x64xf32>
    %cst_78 = arith.constant 1.000000e+00 : f32
    %117 = vector.broadcast %cst_78 : f32 to vector<2x64xf32>
    %118 = arith.addf %116, %117 : vector<2x64xf32>
    %cst_79 = arith.constant 5.000000e-01 : f32
    %119 = vector.broadcast %cst_79 : f32 to vector<2x64xf32>
    %120 = arith.mulf %119, %118 : vector<2x64xf32>
    %121 = arith.mulf %110, %87 : vector<2x64xf32>
    %122 = arith.mulf %102, %112 : vector<2x64xf32>
    %123 = arith.addf %121, %122 : vector<2x64xf32>
    %124 = math.tanh %123 : vector<2x64xf32>
    %125 = arith.mulf %120, %124 : vector<2x64xf32>
    %c8_80 = arith.constant 8 : index
    %c0_81 = arith.constant 0 : index
    %126 = vector.load %arg25[%c8_80, %c0_81] : memref<64x64xf32, #tpu.memory_space<vmem>>, vector<2x64xf32>
    tpu.vector_store %arg25[%c8_80, %c0_81], %125 {strides = array<i32>} : memref<64x64xf32, #tpu.memory_space<vmem>>, vector<2x64xf32>,
    %c16 = arith.constant 16 : index
    %c0_82 = arith.constant 0 : index
    %127 = vector.load %arg24[%c16, %c0_82] : memref<64x256xf32, #tpu.memory_space<vmem>>, vector<2x256xf32>
    %c0_83 = arith.constant 0 : index
    %c0_84 = arith.constant 0 : index
    %128 = vector.load %arg18[%c0_83, %c0_84] : memref<64x256xf32, #tpu.memory_space<vmem>>, vector<64x256xf32>
    %cst_85 = arith.constant dense<0.000000e+00> : vector<2x256xf32>
    %129 = tpu.matmul %125, %128, %cst_85 {dimension_numbers = #tpu.dot_dimension_numbers<[1], [0], [0], [1], [0, 0, 1, 1], [], []>} : vector<2x64xf32>, vector<64x256xf32>, vector<2x256xf32> -> vector<2x256xf32>
    %130 = arith.addf %127, %129 : vector<2x256xf32>
    %131 = vector.extract_strided_slice %130 {offsets = [0, 0], sizes = [2, 64], strides = [1, 1]} : vector<2x256xf32> to vector<2x64xf32>
    %cst_86 = arith.constant 5.000000e-01 : f32
    %132 = vector.broadcast %cst_86 : f32 to vector<2x64xf32>
    %133 = arith.mulf %132, %131 : vector<2x64xf32>
    %134 = math.tanh %133 : vector<2x64xf32>
    %cst_87 = arith.constant 1.000000e+00 : f32
    %135 = vector.broadcast %cst_87 : f32 to vector<2x64xf32>
    %136 = arith.addf %134, %135 : vector<2x64xf32>
    %cst_88 = arith.constant 5.000000e-01 : f32
    %137 = vector.broadcast %cst_88 : f32 to vector<2x64xf32>
    %138 = arith.mulf %137, %136 : vector<2x64xf32>
    %139 = vector.extract_strided_slice %130 {offsets = [0, 64], sizes = [2, 64], strides = [1, 1]} : vector<2x256xf32> to vector<2x64xf32>
    %cst_89 = arith.constant 5.000000e-01 : f32
    %140 = vector.broadcast %cst_89 : f32 to vector<2x64xf32>
    %141 = arith.mulf %140, %139 : vector<2x64xf32>
    %142 = math.tanh %141 : vector<2x64xf32>
    %cst_90 = arith.constant 1.000000e+00 : f32
    %143 = vector.broadcast %cst_90 : f32 to vector<2x64xf32>
    %144 = arith.addf %142, %143 : vector<2x64xf32>
    %cst_91 = arith.constant 5.000000e-01 : f32
    %145 = vector.broadcast %cst_91 : f32 to vector<2x64xf32>
    %146 = arith.mulf %145, %144 : vector<2x64xf32>
    %147 = vector.extract_strided_slice %130 {offsets = [0, 128], sizes = [2, 64], strides = [1, 1]} : vector<2x256xf32> to vector<2x64xf32>
    %148 = math.tanh %147 : vector<2x64xf32>
    %149 = vector.extract_strided_slice %130 {offsets = [0, 192], sizes = [2, 64], strides = [1, 1]} : vector<2x256xf32> to vector<2x64xf32>
    %cst_92 = arith.constant 5.000000e-01 : f32
    %150 = vector.broadcast %cst_92 : f32 to vector<2x64xf32>
    %151 = arith.mulf %150, %149 : vector<2x64xf32>
    %152 = math.tanh %151 : vector<2x64xf32>
    %cst_93 = arith.constant 1.000000e+00 : f32
    %153 = vector.broadcast %cst_93 : f32 to vector<2x64xf32>
    %154 = arith.addf %152, %153 : vector<2x64xf32>
    %cst_94 = arith.constant 5.000000e-01 : f32
    %155 = vector.broadcast %cst_94 : f32 to vector<2x64xf32>
    %156 = arith.mulf %155, %154 : vector<2x64xf32>
    %157 = arith.mulf %146, %123 : vector<2x64xf32>
    %158 = arith.mulf %138, %148 : vector<2x64xf32>
    %159 = arith.addf %157, %158 : vector<2x64xf32>
    %160 = math.tanh %159 : vector<2x64xf32>
    %161 = arith.mulf %156, %160 : vector<2x64xf32>
    %c16_95 = arith.constant 16 : index
    %c0_96 = arith.constant 0 : index
    %162 = vector.load %arg25[%c16_95, %c0_96] : memref<64x64xf32, #tpu.memory_space<vmem>>, vector<2x64xf32>
    tpu.vector_store %arg25[%c16_95, %c0_96], %161 {strides = array<i32>} : memref<64x64xf32, #tpu.memory_space<vmem>>, vector<2x64xf32>,
    %c24 = arith.constant 24 : index
    %c0_97 = arith.constant 0 : index
    %163 = vector.load %arg24[%c24, %c0_97] : memref<64x256xf32, #tpu.memory_space<vmem>>, vector<2x256xf32>
    %c0_98 = arith.constant 0 : index
    %c0_99 = arith.constant 0 : index
    %164 = vector.load %arg18[%c0_98, %c0_99] : memref<64x256xf32, #tpu.memory_space<vmem>>, vector<64x256xf32>
    %cst_100 = arith.constant dense<0.000000e+00> : vector<2x256xf32>
    %165 = tpu.matmul %161, %164, %cst_100 {dimension_numbers = #tpu.dot_dimension_numbers<[1], [0], [0], [1], [0, 0, 1, 1], [], []>} : vector<2x64xf32>, vector<64x256xf32>, vector<2x256xf32> -> vector<2x256xf32>
    %166 = arith.addf %163, %165 : vector<2x256xf32>
    %167 = vector.extract_strided_slice %166 {offsets = [0, 0], sizes = [2, 64], strides = [1, 1]} : vector<2x256xf32> to vector<2x64xf32>
    %cst_101 = arith.constant 5.000000e-01 : f32
    %168 = vector.broadcast %cst_101 : f32 to vector<2x64xf32>
    %169 = arith.mulf %168, %167 : vector<2x64xf32>
    %170 = math.tanh %169 : vector<2x64xf32>
    %cst_102 = arith.constant 1.000000e+00 : f32
    %171 = vector.broadcast %cst_102 : f32 to vector<2x64xf32>
    %172 = arith.addf %170, %171 : vector<2x64xf32>
    %cst_103 = arith.constant 5.000000e-01 : f32
    %173 = vector.broadcast %cst_103 : f32 to vector<2x64xf32>
    %174 = arith.mulf %173, %172 : vector<2x64xf32>
    %175 = vector.extract_strided_slice %166 {offsets = [0, 64], sizes = [2, 64], strides = [1, 1]} : vector<2x256xf32> to vector<2x64xf32>
    %cst_104 = arith.constant 5.000000e-01 : f32
    %176 = vector.broadcast %cst_104 : f32 to vector<2x64xf32>
    %177 = arith.mulf %176, %175 : vector<2x64xf32>
    %178 = math.tanh %177 : vector<2x64xf32>
    %cst_105 = arith.constant 1.000000e+00 : f32
    %179 = vector.broadcast %cst_105 : f32 to vector<2x64xf32>
    %180 = arith.addf %178, %179 : vector<2x64xf32>
    %cst_106 = arith.constant 5.000000e-01 : f32
    %181 = vector.broadcast %cst_106 : f32 to vector<2x64xf32>
    %182 = arith.mulf %181, %180 : vector<2x64xf32>
    %183 = vector.extract_strided_slice %166 {offsets = [0, 128], sizes = [2, 64], strides = [1, 1]} : vector<2x256xf32> to vector<2x64xf32>
    %184 = math.tanh %183 : vector<2x64xf32>
    %185 = vector.extract_strided_slice %166 {offsets = [0, 192], sizes = [2, 64], strides = [1, 1]} : vector<2x256xf32> to vector<2x64xf32>
    %cst_107 = arith.constant 5.000000e-01 : f32
    %186 = vector.broadcast %cst_107 : f32 to vector<2x64xf32>
    %187 = arith.mulf %186, %185 : vector<2x64xf32>
    %188 = math.tanh %187 : vector<2x64xf32>
    %cst_108 = arith.constant 1.000000e+00 : f32
    %189 = vector.broadcast %cst_108 : f32 to vector<2x64xf32>
    %190 = arith.addf %188, %189 : vector<2x64xf32>
    %cst_109 = arith.constant 5.000000e-01 : f32
    %191 = vector.broadcast %cst_109 : f32 to vector<2x64xf32>
    %192 = arith.mulf %191, %190 : vector<2x64xf32>
    %193 = arith.mulf %182, %159 : vector<2x64xf32>
    %194 = arith.mulf %174, %184 : vector<2x64xf32>
    %195 = arith.addf %193, %194 : vector<2x64xf32>
    %196 = math.tanh %195 : vector<2x64xf32>
    %197 = arith.mulf %192, %196 : vector<2x64xf32>
    %c24_110 = arith.constant 24 : index
    %c0_111 = arith.constant 0 : index
    %198 = vector.load %arg25[%c24_110, %c0_111] : memref<64x64xf32, #tpu.memory_space<vmem>>, vector<2x64xf32>
    tpu.vector_store %arg25[%c24_110, %c0_111], %197 {strides = array<i32>} : memref<64x64xf32, #tpu.memory_space<vmem>>, vector<2x64xf32>,
    %c32 = arith.constant 32 : index
    %c0_112 = arith.constant 0 : index
    %199 = vector.load %arg24[%c32, %c0_112] : memref<64x256xf32, #tpu.memory_space<vmem>>, vector<2x256xf32>
    %c0_113 = arith.constant 0 : index
    %c0_114 = arith.constant 0 : index
    %200 = vector.load %arg18[%c0_113, %c0_114] : memref<64x256xf32, #tpu.memory_space<vmem>>, vector<64x256xf32>
    %cst_115 = arith.constant dense<0.000000e+00> : vector<2x256xf32>
    %201 = tpu.matmul %197, %200, %cst_115 {dimension_numbers = #tpu.dot_dimension_numbers<[1], [0], [0], [1], [0, 0, 1, 1], [], []>} : vector<2x64xf32>, vector<64x256xf32>, vector<2x256xf32> -> vector<2x256xf32>
    %202 = arith.addf %199, %201 : vector<2x256xf32>
    %203 = vector.extract_strided_slice %202 {offsets = [0, 0], sizes = [2, 64], strides = [1, 1]} : vector<2x256xf32> to vector<2x64xf32>
    %cst_116 = arith.constant 5.000000e-01 : f32
    %204 = vector.broadcast %cst_116 : f32 to vector<2x64xf32>
    %205 = arith.mulf %204, %203 : vector<2x64xf32>
    %206 = math.tanh %205 : vector<2x64xf32>
    %cst_117 = arith.constant 1.000000e+00 : f32
    %207 = vector.broadcast %cst_117 : f32 to vector<2x64xf32>
    %208 = arith.addf %206, %207 : vector<2x64xf32>
    %cst_118 = arith.constant 5.000000e-01 : f32
    %209 = vector.broadcast %cst_118 : f32 to vector<2x64xf32>
    %210 = arith.mulf %209, %208 : vector<2x64xf32>
    %211 = vector.extract_strided_slice %202 {offsets = [0, 64], sizes = [2, 64], strides = [1, 1]} : vector<2x256xf32> to vector<2x64xf32>
    %cst_119 = arith.constant 5.000000e-01 : f32
    %212 = vector.broadcast %cst_119 : f32 to vector<2x64xf32>
    %213 = arith.mulf %212, %211 : vector<2x64xf32>
    %214 = math.tanh %213 : vector<2x64xf32>
    %cst_120 = arith.constant 1.000000e+00 : f32
    %215 = vector.broadcast %cst_120 : f32 to vector<2x64xf32>
    %216 = arith.addf %214, %215 : vector<2x64xf32>
    %cst_121 = arith.constant 5.000000e-01 : f32
    %217 = vector.broadcast %cst_121 : f32 to vector<2x64xf32>
    %218 = arith.mulf %217, %216 : vector<2x64xf32>
    %219 = vector.extract_strided_slice %202 {offsets = [0, 128], sizes = [2, 64], strides = [1, 1]} : vector<2x256xf32> to vector<2x64xf32>
    %220 = math.tanh %219 : vector<2x64xf32>
    %221 = vector.extract_strided_slice %202 {offsets = [0, 192], sizes = [2, 64], strides = [1, 1]} : vector<2x256xf32> to vector<2x64xf32>
    %cst_122 = arith.constant 5.000000e-01 : f32
    %222 = vector.broadcast %cst_122 : f32 to vector<2x64xf32>
    %223 = arith.mulf %222, %221 : vector<2x64xf32>
    %224 = math.tanh %223 : vector<2x64xf32>
    %cst_123 = arith.constant 1.000000e+00 : f32
    %225 = vector.broadcast %cst_123 : f32 to vector<2x64xf32>
    %226 = arith.addf %224, %225 : vector<2x64xf32>
    %cst_124 = arith.constant 5.000000e-01 : f32
    %227 = vector.broadcast %cst_124 : f32 to vector<2x64xf32>
    %228 = arith.mulf %227, %226 : vector<2x64xf32>
    %229 = arith.mulf %218, %195 : vector<2x64xf32>
    %230 = arith.mulf %210, %220 : vector<2x64xf32>
    %231 = arith.addf %229, %230 : vector<2x64xf32>
    %232 = math.tanh %231 : vector<2x64xf32>
    %233 = arith.mulf %228, %232 : vector<2x64xf32>
    %c32_125 = arith.constant 32 : index
    %c0_126 = arith.constant 0 : index
    %234 = vector.load %arg25[%c32_125, %c0_126] : memref<64x64xf32, #tpu.memory_space<vmem>>, vector<2x64xf32>
    tpu.vector_store %arg25[%c32_125, %c0_126], %233 {strides = array<i32>} : memref<64x64xf32, #tpu.memory_space<vmem>>, vector<2x64xf32>,
    %c40 = arith.constant 40 : index
    %c0_127 = arith.constant 0 : index
    %235 = vector.load %arg24[%c40, %c0_127] : memref<64x256xf32, #tpu.memory_space<vmem>>, vector<2x256xf32>
    %c0_128 = arith.constant 0 : index
    %c0_129 = arith.constant 0 : index
    %236 = vector.load %arg18[%c0_128, %c0_129] : memref<64x256xf32, #tpu.memory_space<vmem>>, vector<64x256xf32>
    %cst_130 = arith.constant dense<0.000000e+00> : vector<2x256xf32>
    %237 = tpu.matmul %233, %236, %cst_130 {dimension_numbers = #tpu.dot_dimension_numbers<[1], [0], [0], [1], [0, 0, 1, 1], [], []>} : vector<2x64xf32>, vector<64x256xf32>, vector<2x256xf32> -> vector<2x256xf32>
    %238 = arith.addf %235, %237 : vector<2x256xf32>
    %239 = vector.extract_strided_slice %238 {offsets = [0, 0], sizes = [2, 64], strides = [1, 1]} : vector<2x256xf32> to vector<2x64xf32>
    %cst_131 = arith.constant 5.000000e-01 : f32
    %240 = vector.broadcast %cst_131 : f32 to vector<2x64xf32>
    %241 = arith.mulf %240, %239 : vector<2x64xf32>
    %242 = math.tanh %241 : vector<2x64xf32>
    %cst_132 = arith.constant 1.000000e+00 : f32
    %243 = vector.broadcast %cst_132 : f32 to vector<2x64xf32>
    %244 = arith.addf %242, %243 : vector<2x64xf32>
    %cst_133 = arith.constant 5.000000e-01 : f32
    %245 = vector.broadcast %cst_133 : f32 to vector<2x64xf32>
    %246 = arith.mulf %245, %244 : vector<2x64xf32>
    %247 = vector.extract_strided_slice %238 {offsets = [0, 64], sizes = [2, 64], strides = [1, 1]} : vector<2x256xf32> to vector<2x64xf32>
    %cst_134 = arith.constant 5.000000e-01 : f32
    %248 = vector.broadcast %cst_134 : f32 to vector<2x64xf32>
    %249 = arith.mulf %248, %247 : vector<2x64xf32>
    %250 = math.tanh %249 : vector<2x64xf32>
    %cst_135 = arith.constant 1.000000e+00 : f32
    %251 = vector.broadcast %cst_135 : f32 to vector<2x64xf32>
    %252 = arith.addf %250, %251 : vector<2x64xf32>
    %cst_136 = arith.constant 5.000000e-01 : f32
    %253 = vector.broadcast %cst_136 : f32 to vector<2x64xf32>
    %254 = arith.mulf %253, %252 : vector<2x64xf32>
    %255 = vector.extract_strided_slice %238 {offsets = [0, 128], sizes = [2, 64], strides = [1, 1]} : vector<2x256xf32> to vector<2x64xf32>
    %256 = math.tanh %255 : vector<2x64xf32>
    %257 = vector.extract_strided_slice %238 {offsets = [0, 192], sizes = [2, 64], strides = [1, 1]} : vector<2x256xf32> to vector<2x64xf32>
    %cst_137 = arith.constant 5.000000e-01 : f32
    %258 = vector.broadcast %cst_137 : f32 to vector<2x64xf32>
    %259 = arith.mulf %258, %257 : vector<2x64xf32>
    %260 = math.tanh %259 : vector<2x64xf32>
    %cst_138 = arith.constant 1.000000e+00 : f32
    %261 = vector.broadcast %cst_138 : f32 to vector<2x64xf32>
    %262 = arith.addf %260, %261 : vector<2x64xf32>
    %cst_139 = arith.constant 5.000000e-01 : f32
    %263 = vector.broadcast %cst_139 : f32 to vector<2x64xf32>
    %264 = arith.mulf %263, %262 : vector<2x64xf32>
    %265 = arith.mulf %254, %231 : vector<2x64xf32>
    %266 = arith.mulf %246, %256 : vector<2x64xf32>
    %267 = arith.addf %265, %266 : vector<2x64xf32>
    %268 = math.tanh %267 : vector<2x64xf32>
    %269 = arith.mulf %264, %268 : vector<2x64xf32>
    %c40_140 = arith.constant 40 : index
    %c0_141 = arith.constant 0 : index
    %270 = vector.load %arg25[%c40_140, %c0_141] : memref<64x64xf32, #tpu.memory_space<vmem>>, vector<2x64xf32>
    tpu.vector_store %arg25[%c40_140, %c0_141], %269 {strides = array<i32>} : memref<64x64xf32, #tpu.memory_space<vmem>>, vector<2x64xf32>,
    %c48 = arith.constant 48 : index
    %c0_142 = arith.constant 0 : index
    %271 = vector.load %arg24[%c48, %c0_142] : memref<64x256xf32, #tpu.memory_space<vmem>>, vector<2x256xf32>
    %c0_143 = arith.constant 0 : index
    %c0_144 = arith.constant 0 : index
    %272 = vector.load %arg18[%c0_143, %c0_144] : memref<64x256xf32, #tpu.memory_space<vmem>>, vector<64x256xf32>
    %cst_145 = arith.constant dense<0.000000e+00> : vector<2x256xf32>
    %273 = tpu.matmul %269, %272, %cst_145 {dimension_numbers = #tpu.dot_dimension_numbers<[1], [0], [0], [1], [0, 0, 1, 1], [], []>} : vector<2x64xf32>, vector<64x256xf32>, vector<2x256xf32> -> vector<2x256xf32>
    %274 = arith.addf %271, %273 : vector<2x256xf32>
    %275 = vector.extract_strided_slice %274 {offsets = [0, 0], sizes = [2, 64], strides = [1, 1]} : vector<2x256xf32> to vector<2x64xf32>
    %cst_146 = arith.constant 5.000000e-01 : f32
    %276 = vector.broadcast %cst_146 : f32 to vector<2x64xf32>
    %277 = arith.mulf %276, %275 : vector<2x64xf32>
    %278 = math.tanh %277 : vector<2x64xf32>
    %cst_147 = arith.constant 1.000000e+00 : f32
    %279 = vector.broadcast %cst_147 : f32 to vector<2x64xf32>
    %280 = arith.addf %278, %279 : vector<2x64xf32>
    %cst_148 = arith.constant 5.000000e-01 : f32
    %281 = vector.broadcast %cst_148 : f32 to vector<2x64xf32>
    %282 = arith.mulf %281, %280 : vector<2x64xf32>
    %283 = vector.extract_strided_slice %274 {offsets = [0, 64], sizes = [2, 64], strides = [1, 1]} : vector<2x256xf32> to vector<2x64xf32>
    %cst_149 = arith.constant 5.000000e-01 : f32
    %284 = vector.broadcast %cst_149 : f32 to vector<2x64xf32>
    %285 = arith.mulf %284, %283 : vector<2x64xf32>
    %286 = math.tanh %285 : vector<2x64xf32>
    %cst_150 = arith.constant 1.000000e+00 : f32
    %287 = vector.broadcast %cst_150 : f32 to vector<2x64xf32>
    %288 = arith.addf %286, %287 : vector<2x64xf32>
    %cst_151 = arith.constant 5.000000e-01 : f32
    %289 = vector.broadcast %cst_151 : f32 to vector<2x64xf32>
    %290 = arith.mulf %289, %288 : vector<2x64xf32>
    %291 = vector.extract_strided_slice %274 {offsets = [0, 128], sizes = [2, 64], strides = [1, 1]} : vector<2x256xf32> to vector<2x64xf32>
    %292 = math.tanh %291 : vector<2x64xf32>
    %293 = vector.extract_strided_slice %274 {offsets = [0, 192], sizes = [2, 64], strides = [1, 1]} : vector<2x256xf32> to vector<2x64xf32>
    %cst_152 = arith.constant 5.000000e-01 : f32
    %294 = vector.broadcast %cst_152 : f32 to vector<2x64xf32>
    %295 = arith.mulf %294, %293 : vector<2x64xf32>
    %296 = math.tanh %295 : vector<2x64xf32>
    %cst_153 = arith.constant 1.000000e+00 : f32
    %297 = vector.broadcast %cst_153 : f32 to vector<2x64xf32>
    %298 = arith.addf %296, %297 : vector<2x64xf32>
    %cst_154 = arith.constant 5.000000e-01 : f32
    %299 = vector.broadcast %cst_154 : f32 to vector<2x64xf32>
    %300 = arith.mulf %299, %298 : vector<2x64xf32>
    %301 = arith.mulf %290, %267 : vector<2x64xf32>
    %302 = arith.mulf %282, %292 : vector<2x64xf32>
    %303 = arith.addf %301, %302 : vector<2x64xf32>
    %304 = math.tanh %303 : vector<2x64xf32>
    %305 = arith.mulf %300, %304 : vector<2x64xf32>
    %c48_155 = arith.constant 48 : index
    %c0_156 = arith.constant 0 : index
    %306 = vector.load %arg25[%c48_155, %c0_156] : memref<64x64xf32, #tpu.memory_space<vmem>>, vector<2x64xf32>
    tpu.vector_store %arg25[%c48_155, %c0_156], %305 {strides = array<i32>} : memref<64x64xf32, #tpu.memory_space<vmem>>, vector<2x64xf32>,
    %c56 = arith.constant 56 : index
    %c0_157 = arith.constant 0 : index
    %307 = vector.load %arg24[%c56, %c0_157] : memref<64x256xf32, #tpu.memory_space<vmem>>, vector<2x256xf32>
    %c0_158 = arith.constant 0 : index
    %c0_159 = arith.constant 0 : index
    %308 = vector.load %arg18[%c0_158, %c0_159] : memref<64x256xf32, #tpu.memory_space<vmem>>, vector<64x256xf32>
    %cst_160 = arith.constant dense<0.000000e+00> : vector<2x256xf32>
    %309 = tpu.matmul %305, %308, %cst_160 {dimension_numbers = #tpu.dot_dimension_numbers<[1], [0], [0], [1], [0, 0, 1, 1], [], []>} : vector<2x64xf32>, vector<64x256xf32>, vector<2x256xf32> -> vector<2x256xf32>
    %310 = arith.addf %307, %309 : vector<2x256xf32>
    %311 = vector.extract_strided_slice %310 {offsets = [0, 0], sizes = [2, 64], strides = [1, 1]} : vector<2x256xf32> to vector<2x64xf32>
    %cst_161 = arith.constant 5.000000e-01 : f32
    %312 = vector.broadcast %cst_161 : f32 to vector<2x64xf32>
    %313 = arith.mulf %312, %311 : vector<2x64xf32>
    %314 = math.tanh %313 : vector<2x64xf32>
    %cst_162 = arith.constant 1.000000e+00 : f32
    %315 = vector.broadcast %cst_162 : f32 to vector<2x64xf32>
    %316 = arith.addf %314, %315 : vector<2x64xf32>
    %cst_163 = arith.constant 5.000000e-01 : f32
    %317 = vector.broadcast %cst_163 : f32 to vector<2x64xf32>
    %318 = arith.mulf %317, %316 : vector<2x64xf32>
    %319 = vector.extract_strided_slice %310 {offsets = [0, 64], sizes = [2, 64], strides = [1, 1]} : vector<2x256xf32> to vector<2x64xf32>
    %cst_164 = arith.constant 5.000000e-01 : f32
    %320 = vector.broadcast %cst_164 : f32 to vector<2x64xf32>
    %321 = arith.mulf %320, %319 : vector<2x64xf32>
    %322 = math.tanh %321 : vector<2x64xf32>
    %cst_165 = arith.constant 1.000000e+00 : f32
    %323 = vector.broadcast %cst_165 : f32 to vector<2x64xf32>
    %324 = arith.addf %322, %323 : vector<2x64xf32>
    %cst_166 = arith.constant 5.000000e-01 : f32
    %325 = vector.broadcast %cst_166 : f32 to vector<2x64xf32>
    %326 = arith.mulf %325, %324 : vector<2x64xf32>
    %327 = vector.extract_strided_slice %310 {offsets = [0, 128], sizes = [2, 64], strides = [1, 1]} : vector<2x256xf32> to vector<2x64xf32>
    %328 = math.tanh %327 : vector<2x64xf32>
    %329 = vector.extract_strided_slice %310 {offsets = [0, 192], sizes = [2, 64], strides = [1, 1]} : vector<2x256xf32> to vector<2x64xf32>
    %cst_167 = arith.constant 5.000000e-01 : f32
    %330 = vector.broadcast %cst_167 : f32 to vector<2x64xf32>
    %331 = arith.mulf %330, %329 : vector<2x64xf32>
    %332 = math.tanh %331 : vector<2x64xf32>
    %cst_168 = arith.constant 1.000000e+00 : f32
    %333 = vector.broadcast %cst_168 : f32 to vector<2x64xf32>
    %334 = arith.addf %332, %333 : vector<2x64xf32>
    %cst_169 = arith.constant 5.000000e-01 : f32
    %335 = vector.broadcast %cst_169 : f32 to vector<2x64xf32>
    %336 = arith.mulf %335, %334 : vector<2x64xf32>
    %337 = arith.mulf %326, %303 : vector<2x64xf32>
    %338 = arith.mulf %318, %328 : vector<2x64xf32>
    %339 = arith.addf %337, %338 : vector<2x64xf32>
    %340 = math.tanh %339 : vector<2x64xf32>
    %341 = arith.mulf %336, %340 : vector<2x64xf32>
    %c56_170 = arith.constant 56 : index
    %c0_171 = arith.constant 0 : index
    %342 = vector.load %arg25[%c56_170, %c0_171] : memref<64x64xf32, #tpu.memory_space<vmem>>, vector<2x64xf32>
    tpu.vector_store %arg25[%c56_170, %c0_171], %341 {strides = array<i32>} : memref<64x64xf32, #tpu.memory_space<vmem>>, vector<2x64xf32>,
    %c0_172 = arith.constant 0 : index
    %c0_173 = arith.constant 0 : index
    %343 = vector.load %arg25[%c0_172, %c0_173] : memref<64x64xf32, #tpu.memory_space<vmem>>, vector<64x64xf32>
    %c0_174 = arith.constant 0 : index
    %c0_175 = arith.constant 0 : index
    %344 = vector.load %arg19[%c0_174, %c0_175] : memref<64x32xf32, #tpu.memory_space<vmem>>, vector<64x32xf32>
    %cst_176 = arith.constant dense<0.000000e+00> : vector<64x32xf32>
    %345 = tpu.matmul %343, %344, %cst_176 {dimension_numbers = #tpu.dot_dimension_numbers<[1], [0], [0], [1], [0, 0, 1, 1], [], []>} : vector<64x64xf32>, vector<64x32xf32>, vector<64x32xf32> -> vector<64x32xf32>
    %c0_177 = arith.constant 0 : index
    %c0_178 = arith.constant 0 : index
    %346 = vector.load %arg20[%c0_177, %c0_178] : memref<1x32xf32, #tpu.memory_space<vmem>>, vector<1x32xf32>
    %347 = vector.broadcast %346 : vector<1x32xf32> to vector<64x32xf32>
    %348 = arith.addf %345, %347 : vector<64x32xf32>
    %cst_179 = arith.constant 0.000000e+00 : f32
    %349 = vector.broadcast %cst_179 : f32 to vector<64x32xf32>
    %350 = arith.maximumf %348, %349 : vector<64x32xf32>
    %c0_180 = arith.constant 0 : index
    %c0_181 = arith.constant 0 : index
    %351 = vector.load %arg21[%c0_180, %c0_181] : memref<32x1xf32, #tpu.memory_space<vmem>>, vector<32x1xf32>
    %cst_182 = arith.constant dense<0.000000e+00> : vector<64x1xf32>
    %352 = tpu.matmul %350, %351, %cst_182 {dimension_numbers = #tpu.dot_dimension_numbers<[1], [0], [0], [1], [0, 0, 1, 1], [], []>} : vector<64x32xf32>, vector<32x1xf32>, vector<64x1xf32> -> vector<64x1xf32>
    %c0_183 = arith.constant 0 : index
    %c0_184 = arith.constant 0 : index
    %353 = vector.load %arg22[%c0_183, %c0_184] : memref<1x1xf32, #tpu.memory_space<vmem>>, vector<1x1xf32>
    %354 = vector.broadcast %353 : vector<1x1xf32> to vector<64x1xf32>
    %355 = arith.addf %352, %354 : vector<64x1xf32>
    %c0_185 = arith.constant 0 : index
    %c0_186 = arith.constant 0 : index
    %356 = vector.load %arg23[%c0_185, %c0_186] : memref<64x1xf32, #tpu.memory_space<vmem>>, vector<64x1xf32>
    tpu.vector_store %arg23[%c0_185, %c0_186], %355 {strides = array<i32>} : memref<64x1xf32, #tpu.memory_space<vmem>>, vector<64x1xf32>,
    return
  }
}

</mosaic_0001>

<bundles_post_ra>
// kernel: herdr_forward.5
= control target key start
LH: loop header
LB: loop body
LE: loop exit
PB: predicated region body
PF: predicated region fallthrough
CT: control target
= control target key end

     0   :  { %s1621_s12 = smov 0   ;;  %s2209_s0 = inlined_call_operand.vmem [shape: f32[1800,80], index: 0, kind: input, shape index: {}]   ;;  %s2210_s1 = inlined_call_operand.vmem [shape: f32[80,32], index: 1, kind: input, shape index: {}]   ;;  %s2211_s2 = inlined_call_operand.vmem [shape: f32[1,32], index: 2, kind: input, shape index: {}]   ;;  %s2212_s3 = inlined_call_operand.vmem [shape: f32[1800,32], index: 3, kind: output, shape index: {}]  }
   0x1 LB: > { %s1139_s13 = sadd.s32 4294967295, %s1596_s12   ;;  %p1143_p0 = scmp.ge.s32.totalorder %s1596_s12, 1  ;;  %s1596_s12 = sphi %s1621_s12, %s13_s12  }
   0x2   : > { %p138_p1 = scmp.lt.s32.totalorder %s1596_s12, 4 }
   0x4   : > { %p139_p2 = pnand %p1143_p0, %p138_p1 }
   0x5   : > { %v249_v0 = vld [vmem:[%s2210_s1] sm:$0xff] (!%p139_p2)  ;;  %v250_v1 = vld [vmem:[%s2210_s1 + $0x8] sm:$0xff] (!%p139_p2)  ;;  %v251_v2 = vld [vmem:[%s2210_s1 + $0x10] sm:$0xff] (!%p139_p2)  ;;  %v1598_v3 = vmov (!%p139_p2), 0.0|0.0   ;;  %s162_s22 = smul.u32 (!%p139_p2), 75, %s1139_s13  ;;  %vm1599_vm0 = vmmov (!%p139_p2), 0  }
   0x6   : > { %142 = sbr.rel (%p139_p2) target bundleno = 392 (0x188), region = 32  ;;  %1554 = vmatprep.subr.bf16.mxu0 (!%p139_p2), %v1598_v3  ;;  %v1555_v4 = vpack.c.bf16 (!%p139_p2), %v250_v1, %v249_v0  ;;  %1569 = vmatprep.subr.bf16.mxu1 (!%p139_p2), %v1598_v3  ;;  %v252_v5 = vld [vmem:[%s2210_s1 + $0x18] sm:$0xff] (!%p139_p2)  ;;  %v1600_v6 = vmov (!%p139_p2), 0.0   ;;  %v253_v8 = vld [vmem:[%s2210_s1 + $0x20] sm:$0xff] (!%p139_p2)  ;;  %v254_v9 = vld [vmem:[%s2210_s1 + $0x28] sm:$0xff] (!%p139_p2)  ;;  %vm266_vm1 = vcmask (!%p139_p2), 654336  }
   0x7   : > { %1329 = vmatprep.mubr.msk.f32.mxu0 (!%p139_p2), %vm1599_vm0, %v1600_v6  ;;  %1443 = vmatprep.mubr.msk.f32.mxu1 (!%p139_p2), %vm1599_vm0, %v1600_v6  ;;  %v1558_v7 = vpack.c.bf16 (!%p139_p2), %v252_v5, %v251_v2  ;;  %p163_p3 = scmp.lt.s32.totalorder (!%p139_p2), %s162_s22, 224  ;;  %v1561_v10 = vpack.c.bf16 (!%p139_p2), %v254_v9, %v253_v8  ;;  %v255_v11 = vld [vmem:[%s2210_s1 + $0x30] sm:$0xff] (!%p139_p2)  ;;  %v256_v12 = vld [vmem:[%s2210_s1 + $0x38] sm:$0xff] (!%p139_p2)  ;;  %v257_v14 = vld [vmem:[%s2210_s1 + $0x40] sm:$0xff] (!%p139_p2)  ;;  %vm1007_vm2 = vcmask (!%p139_p2), 261120  }
   0x8   : > { %1556 = vmatpush3.bf16.msra.mxu0 (!%p139_p2), %v1555_v4  ;;  %1574 = vmatpush3.bf16.msra.mxu1 (!%p139_p2), %v1555_v4  ;;  %v1564_v13 = vpack.c.bf16 (!%p139_p2), %v256_v12, %v255_v11  ;;  %v258_v15 = vld [vmem:[%s2210_s1 + $0x48] sm:$0xff] (!%p139_p2) }
   0x9   : > { %1557 = vmatprep.subr.bf16.mxu0 (!%p139_p2), %v1598_v3  ;;  %1570 = vmatprep.subr.bf16.mxu1 (!%p139_p2), %v1598_v3  ;;  %v1567_v16 = vpack.c.bf16 (!%p139_p2), %v258_v15, %v257_v14 }
   0xc   : > { %1559 = vmatpush3.bf16.msra.mxu0 (!%p139_p2), %v1558_v7  ;;  %1575 = vmatpush3.bf16.msra.mxu1 (!%p139_p2), %v1558_v7 }
   0xd   : > { %1560 = vmatprep.subr.bf16.mxu0 %v1598_v3  ;;  %1571 = vmatprep.subr.bf16.mxu1 %v1598_v3  ;;  %s2214_s22 = smov (!%p163_p3, %s162_s22), 224 }
   0xe   : > { %s1144_s8 = sshll.u32 %s2214_s22, 3 }
   0xf   : > { %s1671_s11 = scalar_lea.vmem %s2209_s0, %s1144_s8  ;;  %s1981_s17 = scalar_lea.vmem %s2212_s3, %s1144_s8 }
  0x10   : > { %1562 = vmatpush3.bf16.msra.mxu0 %v1561_v10  ;;  %1576 = vmatpush3.bf16.msra.mxu1 %v1561_v10  ;;  %v174_v17 = vld [vmem:[%s1671_s11] sm:$0xff]  ;;  %v212_v18 = vld [vmem:[%s1671_s11 + $0x130] sm:$0xff]  ;;  %v175_v19 = vld [vmem:[%s1671_s11 + $0x8] sm:$0xff] }
  0x11   : > { %1563 = vmatprep.subr.bf16.mxu0 %v1598_v3  ;;  %1572 = vmatprep.subr.bf16.mxu1 %v1598_v3  ;;  %v213_v20 = vld [vmem:[%s1671_s11 + $0x138] sm:$0xff]  ;;  %v176_v21 = vld [vmem:[%s1671_s11 + $0x10] sm:$0xff]  ;;  %v214_v22 = vld [vmem:[%s1671_s11 + $0x140] sm:$0xff] }
  0x12   : > { %v177_v23 = vld [vmem:[%s1671_s11 + $0x18] sm:$0xff]  ;;  %v215_v24 = vld [vmem:[%s1671_s11 + $0x148] sm:$0xff]  ;;  %v178_v25 = vld [vmem:[%s1671_s11 + $0x20] sm:$0xff] }
  0x13   : > { %v216_v26 = vld [vmem:[%s1671_s11 + $0x150] sm:$0xff]  ;;  %v179_v27 = vld [vmem:[%s1671_s11 + $0x28] sm:$0xff]  ;;  %v217_v28 = vld [vmem:[%s1671_s11 + $0x158] sm:$0xff] }
  0x14   : > { %1565 = vmatpush3.bf16.msra.mxu0 %v1564_v13  ;;  %1577 = vmatpush3.bf16.msra.mxu1 %v1564_v13  ;;  %v180_v29 = vld [vmem:[%s1671_s11 + $0x30] sm:$0xff]  ;;  %v218_v30 = vld [vmem:[%s1671_s11 + $0x160] sm:$0xff]  ;;  %v181_v31 = vld [vmem:[%s1671_s11 + $0x38] sm:$0xff] }
  0x15   : > { %1566 = vmatprep.subr.bf16.mxu0 %v1598_v3  ;;  %1573 = vmatprep.subr.bf16.mxu1 %v1598_v3  ;;  %v219_v32 = vld [vmem:[%s1671_s11 + $0x168] sm:$0xff]  ;;  %v182_v33 = vld [vmem:[%s1671_s11 + $0x40] sm:$0xff]  ;;  %v220_v34 = vld [vmem:[%s1671_s11 + $0x170] sm:$0xff] }
  0x16   : > { %v183_v35 = vld [vmem:[%s1671_s11 + $0x48] sm:$0xff]  ;;  %v221_v36 = vld [vmem:[%s1671_s11 + $0x178] sm:$0xff]  ;;  %v184_v37 = vld [vmem:[%s1671_s11 + $0x50] sm:$0xff] }
  0x17   : > { %v222_v38 = vld [vmem:[%s1671_s11 + $0x180] sm:$0xff]  ;;  %v185_v39 = vld [vmem:[%s1671_s11 + $0x58] sm:$0xff]  ;;  %v223_v40 = vld [vmem:[%s1671_s11 + $0x188] sm:$0xff] }
  0x18   : > { %1568 = vmatpush3.bf16.msra.mxu0 %v1567_v16  ;;  %1578 = vmatpush3.bf16.msra.mxu1 %v1567_v16  ;;  %v186_v41 = vld [vmem:[%s1671_s11 + $0x60] sm:$0xff]  ;;  %v224_v42 = vld [vmem:[%s1671_s11 + $0x190] sm:$0xff]  ;;  %v187_v43 = vld [vmem:[%s1671_s11 + $0x68] sm:$0xff] }
  0x19   : > { %v225_v44 = vld [vmem:[%s1671_s11 + $0x198] sm:$0xff]  ;;  %v188_v45 = vld [vmem:[%s1671_s11 + $0x70] sm:$0xff]  ;;  %v226_v46 = vld [vmem:[%s1671_s11 + $0x1a0] sm:$0xff] }
  0x1a   : > { %v189_v47 = vld [vmem:[%s1671_s11 + $0x78] sm:$0xff]  ;;  %v227_v48 = vld [vmem:[%s1671_s11 + $0x1a8] sm:$0xff]  ;;  %v190_v49 = vld [vmem:[%s1671_s11 + $0x80] sm:$0xff] }
  0x1b   : > { %1330 = vmatmul.mubr.msk.f32.vlgmr.msra.gmra.mrb[0].mxu0 %vm266_vm1, %v174_v17  ;;  %1444 = vmatmul.mubr.msk.f32.vlgmr.msra.gmra.mrb[0].mxu1 %vm266_vm1, %v212_v18  ;;  %v228_v50 = vld [vmem:[%s1671_s11 + $0x1b0] sm:$0xff]  ;;  %v191_v51 = vld [vmem:[%s1671_s11 + $0x88] sm:$0xff]  ;;  %v229_v52 = vld [vmem:[%s1671_s11 + $0x1b8] sm:$0xff] }
  0x1c   : > { %1332 = vmatprep.mubr.msk.f32.mxu0 %vm1599_vm0, %v1600_v6  ;;  %1446 = vmatprep.mubr.msk.f32.mxu1 %vm1599_vm0, %v1600_v6  ;;  %v192_v53 = vld [vmem:[%s1671_s11 + $0x90] sm:$0xff]  ;;  %v230_v54 = vld [vmem:[%s1671_s11 + $0x1c0] sm:$0xff]  ;;  %v193_v55 = vld [vmem:[%s1671_s11 + $0x98] sm:$0xff] }
  0x1d   : > { %v231_v56 = vld [vmem:[%s1671_s11 + $0x1c8] sm:$0xff]  ;;  %v194_v57 = vld [vmem:[%s1671_s11 + $0xa0] sm:$0xff]  ;;  %v232_v58 = vld [vmem:[%s1671_s11 + $0x1d0] sm:$0xff] }
  0x1e   : > { %v195_v59 = vld [vmem:[%s1671_s11 + $0xa8] sm:$0xff]  ;;  %v233_v60 = vld [vmem:[%s1671_s11 + $0x1d8] sm:$0xff]  ;;  %v196_v61 = vld [vmem:[%s1671_s11 + $0xb0] sm:$0xff] }
  0x1f   : > { %1333 = vmatmul.mubr.msk.f32.gmra.mrb[2].mxu0 %vm266_vm1, %v175_v19  ;;  %1447 = vmatmul.mubr.msk.f32.gmra.mrb[2].mxu1 %vm266_vm1, %v213_v20  ;;  %v234_v62 = vld [vmem:[%s1671_s11 + $0x1e0] sm:$0xff]  ;;  %v197_v63 = vld [vmem:[%s1671_s11 + $0xb8] sm:$0xff]  ;;  %v235_v0 = vld [vmem:[%s1671_s11 + $0x1e8] sm:$0xff] }
  0x20   : > { %1335 = vmatprep.mubr.msk.f32.mxu0 %vm1599_vm0, %v1600_v6  ;;  %1449 = vmatprep.mubr.msk.f32.mxu1 %vm1599_vm0, %v1600_v6  ;;  %v198_v1 = vld [vmem:[%s1671_s11 + $0xc0] sm:$0xff]  ;;  %v236_v2 = vld [vmem:[%s1671_s11 + $0x1f0] sm:$0xff]  ;;  %v199_v3 = vld [vmem:[%s1671_s11 + $0xc8] sm:$0xff] }
  0x21   : > { %v237_v4 = vld [vmem:[%s1671_s11 + $0x1f8] sm:$0xff]  ;;  %v200_v5 = vld [vmem:[%s1671_s11 + $0xd0] sm:$0xff]  ;;  %v238_v7 = vld [vmem:[%s1671_s11 + $0x200] sm:$0xff] }
  0x22   : > { %v201_v8 = vld [vmem:[%s1671_s11 + $0xd8] sm:$0xff]  ;;  %v239_v9 = vld [vmem:[%s1671_s11 + $0x208] sm:$0xff]  ;;  %v202_v10 = vld [vmem:[%s1671_s11 + $0xe0] sm:$0xff] }
  0x23   : > { %1336 = vmatmul.mubr.msk.f32.gmra.mrb[4].mxu0 %vm266_vm1, %v176_v21  ;;  %1450 = vmatmul.mubr.msk.f32.gmra.mrb[4].mxu1 %vm266_vm1, %v214_v22  ;;  %v240_v11 = vld [vmem:[%s1671_s11 + $0x210] sm:$0xff]  ;;  %v203_v12 = vld [vmem:[%s1671_s11 + $0xe8] sm:$0xff]  ;;  %v241_v13 = vld [vmem:[%s1671_s11 + $0x218] sm:$0xff] }
  0x24   : > { %1338 = vmatprep.mubr.msk.f32.mxu0 %vm1599_vm0, %v1600_v6  ;;  %1452 = vmatprep.mubr.msk.f32.mxu1 %vm1599_vm0, %v1600_v6  ;;  %v204_v14 = vld [vmem:[%s1671_s11 + $0xf0] sm:$0xff]  ;;  %v242_v15 = vld [vmem:[%s1671_s11 + $0x220] sm:$0xff]  ;;  %v205_v16 = vld [vmem:[%s1671_s11 + $0xf8] sm:$0xff] }
  0x25   : > { %v243_v17 = vld [vmem:[%s1671_s11 + $0x228] sm:$0xff]  ;;  %v206_v18 = vld [vmem:[%s1671_s11 + $0x100] sm:$0xff]  ;;  %v244_v19 = vld [vmem:[%s1671_s11 + $0x230] sm:$0xff] }
  0x26   : > { %v207_v20 = vld [vmem:[%s1671_s11 + $0x108] sm:$0xff]  ;;  %v245_v21 = vld [vmem:[%s1671_s11 + $0x238] sm:$0xff]  ;;  %v208_v22 = vld [vmem:[%s1671_s11 + $0x110] sm:$0xff] }
  0x27   : > { %1339 = vmatmul.mubr.msk.f32.gmra.mrb[6].mxu0 %vm266_vm1, %v177_v23  ;;  %1453 = vmatmul.mubr.msk.f32.gmra.mrb[6].mxu1 %vm266_vm1, %v215_v24  ;;  %v246_v23 = vld [vmem:[%s1671_s11 + $0x240] sm:$0xff]  ;;  %v209_v24 = vld [vmem:[%s1671_s11 + $0x118] sm:$0xff] }
  0x28   : > { %1341 = vmatprep.mubr.msk.f32.mxu0 %vm1599_vm0, %v1600_v6  ;;  %1455 = vmatprep.mubr.msk.f32.mxu1 %vm1599_vm0, %v1600_v6 }
  0x2b   : > { %1342 = vmatmul.mubr.msk.f32.gmra.mrb[8].mxu0 %vm266_vm1, %v178_v25  ;;  %1456 = vmatmul.mubr.msk.f32.gmra.mrb[8].mxu1 %vm266_vm1, %v216_v26  ;;  %v247_v25 = vld [vmem:[%s1671_s11 + $0x248] sm:$0xff]  ;;  %v210_v26 = vld [vmem:[%s1671_s11 + $0x120] sm:$0xff] }
  0x2c   : > { %1344 = vmatprep.mubr.msk.f32.mxu0 %vm1599_vm0, %v1600_v6  ;;  %1458 = vmatprep.mubr.msk.f32.mxu1 %vm1599_vm0, %v1600_v6 }
  0x2f   : > { %1345 = vmatmul.mubr.msk.f32.gmra.mrb[10].mxu0 %vm266_vm1, %v179_v27  ;;  %1459 = vmatmul.mubr.msk.f32.gmra.mrb[10].mxu1 %vm266_vm1, %v217_v28  ;;  %v248_v27 = vld [vmem:[%s1671_s11 + $0x250] sm:$0xff]  ;;  %v211_v28 = vld [vmem:[%s1671_s11 + $0x128] sm:$0xff] }
  0x30   : > { %1347 = vmatprep.mubr.msk.f32.mxu0 %vm1599_vm0, %v1600_v6  ;;  %1461 = vmatprep.mubr.msk.f32.mxu1 %vm1599_vm0, %v1600_v6 }
  0x33   : > { %1348 = vmatmul.mubr.msk.f32.gmra.mrb[12].mxu0 %vm266_vm1, %v180_v29  ;;  %1462 = vmatmul.mubr.msk.f32.gmra.mrb[12].mxu1 %vm266_vm1, %v218_v30  ;;  %v1972_v29 = vld [vmem:[%s2211_s2] ss:$0 sm:$0xff] }
  0x34   : > { %1350 = vmatprep.mubr.msk.f32.mxu0 %vm1599_vm0, %v1600_v6  ;;  %1464 = vmatprep.mubr.msk.f32.mxu1 %vm1599_vm0, %v1600_v6 }
  0x37   : > { %1351 = vmatmul.mubr.msk.f32.gmra.mrb[14].mxu0 %vm266_vm1, %v181_v31  ;;  %1465 = vmatmul.mubr.msk.f32.gmra.mrb[14].mxu1 %vm266_vm1, %v219_v32 }
  0x38   : > { %1353 = vmatprep.mubr.msk.f32.mxu0 %vm1599_vm0, %v1600_v6  ;;  %1467 = vmatprep.mubr.msk.f32.mxu1 %vm1599_vm0, %v1600_v6 }
  0x3b   : > { %1354 = vmatmul.mubr.msk.f32.gmra.mrb[16].mxu0 %vm266_vm1, %v182_v33  ;;  %1468 = vmatmul.mubr.msk.f32.gmra.mrb[16].mxu1 %vm266_vm1, %v220_v34 }
  0x3c   : > { %1356 = vmatprep.mubr.msk.f32.mxu0 %vm1599_vm0, %v1600_v6  ;;  %1470 = vmatprep.mubr.msk.f32.mxu1 %vm1599_vm0, %v1600_v6 }
  0x3f   : > { %1357 = vmatmul.mubr.msk.f32.gmra.mrb[18].mxu0 %vm266_vm1, %v183_v35  ;;  %1471 = vmatmul.mubr.msk.f32.gmra.mrb[18].mxu1 %vm266_vm1, %v221_v36 }
  0x40   : > { %1359 = vmatprep.mubr.msk.f32.mxu0 %vm1599_vm0, %v1600_v6  ;;  %1473 = vmatprep.mubr.msk.f32.mxu1 %vm1599_vm0, %v1600_v6 }
  0x43   : > { %1360 = vmatmul.mubr.msk.f32.gmra.mrb[20].mxu0 %vm266_vm1, %v184_v37  ;;  %1474 = vmatmul.mubr.msk.f32.gmra.mrb[20].mxu1 %vm266_vm1, %v222_v38 }
  0x44   : > { %1362 = vmatprep.mubr.msk.f32.mxu0 %vm1599_vm0, %v1600_v6  ;;  %1476 = vmatprep.mubr.msk.f32.mxu1 %vm1599_vm0, %v1600_v6 }
  0x47   : > { %1363 = vmatmul.mubr.msk.f32.gmra.mrb[22].mxu0 %vm266_vm1, %v185_v39  ;;  %1477 = vmatmul.mubr.msk.f32.gmra.mrb[22].mxu1 %vm266_vm1, %v223_v40 }
  0x48   : > { %1365 = vmatprep.mubr.msk.f32.mxu0 %vm1599_vm0, %v1600_v6  ;;  %1479 = vmatprep.mubr.msk.f32.mxu1 %vm1599_vm0, %v1600_v6 }
  0x4b   : > { %1366 = vmatmul.mubr.msk.f32.gmra.mrb[24].mxu0 %vm266_vm1, %v186_v41  ;;  %1480 = vmatmul.mubr.msk.f32.gmra.mrb[24].mxu1 %vm266_vm1, %v224_v42 }
  0x4c   : > { %1368 = vmatprep.mubr.msk.f32.mxu0 %vm1599_vm0, %v1600_v6  ;;  %1482 = vmatprep.mubr.msk.f32.mxu1 %vm1599_vm0, %v1600_v6 }
  0x4f   : > { %1369 = vmatmul.mubr.msk.f32.gmra.mrb[26].mxu0 %vm266_vm1, %v187_v43  ;;  %1483 = vmatmul.mubr.msk.f32.gmra.mrb[26].mxu1 %vm266_vm1, %v225_v44 }
  0x50   : > { %1371 = vmatprep.mubr.msk.f32.mxu0 %vm1599_vm0, %v1600_v6  ;;  %1485 = vmatprep.mubr.msk.f32.mxu1 %vm1599_vm0, %v1600_v6 }
  0x53   : > { %1372 = vmatmul.mubr.msk.f32.gmra.mrb[28].mxu0 %vm266_vm1, %v188_v45  ;;  %1486 = vmatmul.mubr.msk.f32.gmra.mrb[28].mxu1 %vm266_vm1, %v226_v46 }
  0x54   : > { %1374 = vmatprep.mubr.msk.f32.mxu0 %vm1599_vm0, %v1600_v6  ;;  %1488 = vmatprep.mubr.msk.f32.mxu1 %vm1599_vm0, %v1600_v6 }
  0x57   : > { %1375 = vmatmul.mubr.msk.f32.gmra.mrb[30].mxu0 %vm266_vm1, %v189_v47  ;;  %1489 = vmatmul.mubr.msk.f32.gmra.mrb[30].mxu1 %vm266_vm1, %v227_v48 }
  0x58   : > { %1377 = vmatprep.mubr.msk.f32.mxu0 %vm1599_vm0, %v1600_v6  ;;  %1491 = vmatprep.mubr.msk.f32.mxu1 %vm1599_vm0, %v1600_v6 }
  0x5b   : > { %1378 = vmatmul.mubr.msk.f32.gmra.mrb[32].mxu0 %vm266_vm1, %v190_v49  ;;  %1492 = vmatmul.mubr.msk.f32.gmra.mrb[32].mxu1 %vm266_vm1, %v228_v50 }
  0x5c   : > { %1380 = vmatprep.mubr.msk.f32.mxu0 %vm1599_vm0, %v1600_v6  ;;  %1494 = vmatprep.mubr.msk.f32.mxu1 %vm1599_vm0, %v1600_v6 }
  0x5f   : > { %1381 = vmatmul.mubr.msk.f32.gmra.mrb[34].mxu0 %vm266_vm1, %v191_v51  ;;  %1495 = vmatmul.mubr.msk.f32.gmra.mrb[34].mxu1 %vm266_vm1, %v229_v52 }
  0x60   : > { %1383 = vmatprep.mubr.msk.f32.mxu0 %vm1599_vm0, %v1600_v6  ;;  %1497 = vmatprep.mubr.msk.f32.mxu1 %vm1599_vm0, %v1600_v6 }
  0x63   : > { %1384 = vmatmul.mubr.msk.f32.gmra.mrb[36].mxu0 %vm266_vm1, %v192_v53  ;;  %1498 = vmatmul.mubr.msk.f32.gmra.mrb[36].mxu1 %vm266_vm1, %v230_v54 }
  0x64   : > { %1386 = vmatprep.mubr.msk.f32.mxu0 %vm1599_vm0, %v1600_v6  ;;  %1500 = vmatprep.mubr.msk.f32.mxu1 %vm1599_vm0, %v1600_v6 }
  0x67   : > { %1387 = vmatmul.mubr.msk.f32.gmra.mrb[38].mxu0 %vm266_vm1, %v193_v55  ;;  %1501 = vmatmul.mubr.msk.f32.gmra.mrb[38].mxu1 %vm266_vm1, %v231_v56 }
  0x68   : > { %1389 = vmatprep.mubr.msk.f32.mxu0 %vm1599_vm0, %v1600_v6  ;;  %1503 = vmatprep.mubr.msk.f32.mxu1 %vm1599_vm0, %v1600_v6 }
  0x6b   : > { %1390 = vmatmul.mubr.msk.f32.gmra.mrb[40].mxu0 %vm266_vm1, %v194_v57  ;;  %1504 = vmatmul.mubr.msk.f32.gmra.mrb[40].mxu1 %vm266_vm1, %v232_v58 }
  0x6c   : > { %1392 = vmatprep.mubr.msk.f32.mxu0 %vm1599_vm0, %v1600_v6  ;;  %1506 = vmatprep.mubr.msk.f32.mxu1 %vm1599_vm0, %v1600_v6 }
  0x6f   : > { %1393 = vmatmul.mubr.msk.f32.gmra.mrb[42].mxu0 %vm266_vm1, %v195_v59  ;;  %1507 = vmatmul.mubr.msk.f32.gmra.mrb[42].mxu1 %vm266_vm1, %v233_v60 }
  0x70   : > { %1395 = vmatprep.mubr.msk.f32.mxu0 %vm1599_vm0, %v1600_v6  ;;  %1509 = vmatprep.mubr.msk.f32.mxu1 %vm1599_vm0, %v1600_v6 }
  0x73   : > { %1396 = vmatmul.mubr.msk.f32.gmra.mrb[44].mxu0 %vm266_vm1, %v196_v61  ;;  %1510 = vmatmul.mubr.msk.f32.gmra.mrb[44].mxu1 %vm266_vm1, %v234_v62 }
  0x74   : > { %1398 = vmatprep.mubr.msk.f32.mxu0 %vm1599_vm0, %v1600_v6  ;;  %1512 = vmatprep.mubr.msk.f32.mxu1 %vm1599_vm0, %v1600_v6 }
  0x77   : > { %1399 = vmatmul.mubr.msk.f32.gmra.mrb[46].mxu0 %vm266_vm1, %v197_v63  ;;  %1513 = vmatmul.mubr.msk.f32.gmra.mrb[46].mxu1 %vm266_vm1, %v235_v0 }
  0x78   : > { %1401 = vmatprep.mubr.msk.f32.mxu0 %vm1599_vm0, %v1600_v6  ;;  %1515 = vmatprep.mubr.msk.f32.mxu1 %vm1599_vm0, %v1600_v6 }
  0x7b   : > { %1402 = vmatmul.mubr.msk.f32.gmra.mrb[48].mxu0 %vm266_vm1, %v198_v1  ;;  %1516 = vmatmul.mubr.msk.f32.gmra.mrb[48].mxu1 %vm266_vm1, %v236_v2 }
  0x7c   : > { %1404 = vmatprep.mubr.msk.f32.mxu0 %vm1599_vm0, %v1600_v6  ;;  %1518 = vmatprep.mubr.msk.f32.mxu1 %vm1599_vm0, %v1600_v6 }
  0x7f   : > { %1405 = vmatmul.mubr.msk.f32.gmra.mrb[50].mxu0 %vm266_vm1, %v199_v3  ;;  %1519 = vmatmul.mubr.msk.f32.gmra.mrb[50].mxu1 %vm266_vm1, %v237_v4 }
  0x80   : > { %1407 = vmatprep.mubr.msk.f32.mxu0 %vm1599_vm0, %v1600_v6  ;;  %1521 = vmatprep.mubr.msk.f32.mxu1 %vm1599_vm0, %v1600_v6 }
  0x83   : > { %1408 = vmatmul.mubr.msk.f32.gmra.mrb[52].mxu0 %vm266_vm1, %v200_v5  ;;  %1522 = vmatmul.mubr.msk.f32.gmra.mrb[52].mxu1 %vm266_vm1, %v238_v7 }
  0x84   : > { %1410 = vmatprep.mubr.msk.f32.mxu0 %vm1599_vm0, %v1600_v6  ;;  %1524 = vmatprep.mubr.msk.f32.mxu1 %vm1599_vm0, %v1600_v6 }
  0x87   : > { %1411 = vmatmul.mubr.msk.f32.gmra.mrb[54].mxu0 %vm266_vm1, %v201_v8  ;;  %1525 = vmatmul.mubr.msk.f32.gmra.mrb[54].mxu1 %vm266_vm1, %v239_v9 }
  0x88   : > { %1413 = vmatprep.mubr.msk.f32.mxu0 %vm1599_vm0, %v1600_v6  ;;  %1527 = vmatprep.mubr.msk.f32.mxu1 %vm1599_vm0, %v1600_v6 }
  0x8b   : > { %1414 = vmatmul.mubr.msk.f32.gmra.mrb[56].mxu0 %vm266_vm1, %v202_v10  ;;  %1528 = vmatmul.mubr.msk.f32.gmra.mrb[56].mxu1 %vm266_vm1, %v240_v11 }
  0x8c   : > { %1416 = vmatprep.mubr.msk.f32.mxu0 %vm1599_vm0, %v1600_v6  ;;  %1530 = vmatprep.mubr.msk.f32.mxu1 %vm1599_vm0, %v1600_v6 }
  0x8f   : > { %1417 = vmatmul.mubr.msk.f32.gmra.mrb[58].mxu0 %vm266_vm1, %v203_v12  ;;  %1531 = vmatmul.mubr.msk.f32.gmra.mrb[58].mxu1 %vm266_vm1, %v241_v13 }
  0x90   : > { %1419 = vmatprep.mubr.msk.f32.mxu0 %vm1599_vm0, %v1600_v6  ;;  %1533 = vmatprep.mubr.msk.f32.mxu1 %vm1599_vm0, %v1600_v6 }
  0x93   : > { %1420 = vmatmul.mubr.msk.f32.gmra.mrb[60].mxu0 %vm266_vm1, %v204_v14  ;;  %1534 = vmatmul.mubr.msk.f32.gmra.mrb[60].mxu1 %vm266_vm1, %v242_v15 }
  0x94   : > { %1422 = vmatprep.mubr.msk.f32.mxu0 %vm1599_vm0, %v1600_v6  ;;  %1536 = vmatprep.mubr.msk.f32.mxu1 %vm1599_vm0, %v1600_v6 }
  0x97   : > { %1423 = vmatmul.mubr.msk.f32.gmra.mrb[62].mxu0 %vm266_vm1, %v205_v16  ;;  %1537 = vmatmul.mubr.msk.f32.gmra.mrb[62].mxu1 %vm266_vm1, %v243_v17 }
  0x98   : > { %1425 = vmatprep.mubr.msk.f32.mxu0 %vm1599_vm0, %v1600_v6  ;;  %1539 = vmatprep.mubr.msk.f32.mxu1 %vm1599_vm0, %v1600_v6 }
  0x9b   : > { %1426 = vmatmul.mubr.msk.f32.gmra.mrb[64].mxu0 %vm266_vm1, %v206_v18  ;;  %1540 = vmatmul.mubr.msk.f32.gmra.mrb[64].mxu1 %vm266_vm1, %v244_v19 }
  0x9c   : > { %1428 = vmatprep.mubr.msk.f32.mxu0 %vm1599_vm0, %v1600_v6  ;;  %1542 = vmatprep.mubr.msk.f32.mxu1 %vm1599_vm0, %v1600_v6 }
  0x9f   : > { %1429 = vmatmul.mubr.msk.f32.gmra.mrb[66].mxu0 %vm266_vm1, %v207_v20  ;;  %1543 = vmatmul.mubr.msk.f32.gmra.mrb[66].mxu1 %vm266_vm1, %v245_v21 }
  0xa0   : > { %1431 = vmatprep.mubr.msk.f32.mxu0 %vm1599_vm0, %v1600_v6  ;;  %1545 = vmatprep.mubr.msk.f32.mxu1 %vm1599_vm0, %v1600_v6 }
  0xa3   : > { %1432 = vmatmul.mubr.msk.f32.gmra.mrb[68].mxu0 %vm266_vm1, %v208_v22  ;;  %1546 = vmatmul.mubr.msk.f32.gmra.mrb[68].mxu1 %vm266_vm1, %v246_v23 }
  0xa4   : > { %1434 = vmatprep.mubr.msk.f32.mxu0 %vm1599_vm0, %v1600_v6  ;;  %1548 = vmatprep.mubr.msk.f32.mxu1 %vm1599_vm0, %v1600_v6 }
  0xa7   : > { %1435 = vmatmul.mubr.msk.f32.gmra.mrb[70].mxu0 %vm266_vm1, %v209_v24  ;;  %1549 = vmatmul.mubr.msk.f32.gmra.mrb[70].mxu1 %vm266_vm1, %v247_v25 }
  0xa8   : > { %1437 = vmatprep.mubr.msk.f32.mxu0 %vm1599_vm0, %v1600_v6  ;;  %1551 = vmatprep.mubr.msk.f32.mxu1 %vm1599_vm0, %v1600_v6 }
  0xab   : > { %1438 = vmatmul.mubr.msk.f32.gmra.mrb[72].mxu0 %vm266_vm1, %v210_v26  ;;  %1552 = vmatmul.mubr.msk.f32.gmra.mrb[72].mxu1 %vm266_vm1, %v248_v27 }
  0xac   : > { %1440 = vmatprep.mubr.msk.f32.mxu0 %vm1599_vm0, %v1600_v6 }
  0xaf   : > { %1441 = vmatmul.mubr.msk.f32.gmra.mrb[74].mxu0 %vm266_vm1, %v211_v28 }
  0xee   : > { %v558_v30 = vpop.f32.mrb[0].mxu0  ;;  %v748_v31 = vpop.f32.mrb[0].mxu1 }
  0xef   : > { %v559_v32 = vadd.f32 %v1972_v29, %v558_v30  ;;  %v1331_v33 = vpop.f32.mrb[1].mxu0  ;;  %v749_v34 = vadd.f32 %v1972_v29, %v748_v31  ;;  %v1445_v35 = vpop.f32.mrb[1].mxu1 }
  0xf1   : > { %v932_v6 = vmax.f32 %v559_v32, 0.0  ;;  %v970_v36 = vmax.f32 %v749_v34, 0.0 }
  0xf2   : > { %v563_v37 = vpop.f32.mrb[2].mxu0  ;;  %v753_v38 = vpop.f32.mrb[2].mxu1 }
  0xf3   : > { %1008 = vst.msk [vmem:[%s1981_s17] sm:$0xff] %vm1007_vm2, %v932_v6  ;;  %1046 = vst.msk [vmem:[%s1981_s17 + $0x130] sm:$0xff] %vm1007_vm2, %v970_v36  ;;  %v564_v39 = vadd.f32 %v1972_v29, %v563_v37  ;;  %v1334_v40 = vpop.f32.mrb[3].mxu0  ;;  %v754_v41 = vadd.f32 %v1972_v29, %v753_v38  ;;  %v1448_v42 = vpop.f32.mrb[3].mxu1 }
  0xf5   : > { %v933_v43 = vmax.f32 %v564_v39, 0.0  ;;  %v971_v44 = vmax.f32 %v754_v41, 0.0 }
  0xf6   : > { %v568_v45 = vpop.f32.mrb[4].mxu0  ;;  %v758_v46 = vpop.f32.mrb[4].mxu1 }
  0xf7   : > { %1009 = vst.msk [vmem:[%s1981_s17 + $0x8] sm:$0xff] %vm1007_vm2, %v933_v43  ;;  %1047 = vst.msk [vmem:[%s1981_s17 + $0x138] sm:$0xff] %vm1007_vm2, %v971_v44  ;;  %v569_v47 = vadd.f32 %v1972_v29, %v568_v45  ;;  %v1337_v48 = vpop.f32.mrb[5].mxu0  ;;  %v759_v49 = vadd.f32 %v1972_v29, %v758_v46  ;;  %v1451_v50 = vpop.f32.mrb[5].mxu1 }
  0xf9   : > { %v934_v51 = vmax.f32 %v569_v47, 0.0  ;;  %v972_v52 = vmax.f32 %v759_v49, 0.0 }
  0xfa   : > { %v573_v53 = vpop.f32.mrb[6].mxu0  ;;  %v763_v54 = vpop.f32.mrb[6].mxu1 }
  0xfb   : > { %1010 = vst.msk [vmem:[%s1981_s17 + $0x10] sm:$0xff] %vm1007_vm2, %v934_v51  ;;  %1048 = vst.msk [vmem:[%s1981_s17 + $0x140] sm:$0xff] %vm1007_vm2, %v972_v52  ;;  %v574_v55 = vadd.f32 %v1972_v29, %v573_v53  ;;  %v1340_v56 = vpop.f32.mrb[7].mxu0  ;;  %v764_v57 = vadd.f32 %v1972_v29, %v763_v54  ;;  %v1454_v58 = vpop.f32.mrb[7].mxu1 }
  0xfd   : > { %v935_v59 = vmax.f32 %v574_v55, 0.0  ;;  %v973_v60 = vmax.f32 %v764_v57, 0.0 }
  0xfe   : > { %v578_v61 = vpop.f32.mrb[8].mxu0  ;;  %v768_v62 = vpop.f32.mrb[8].mxu1 }
  0xff   : > { %1011 = vst.msk [vmem:[%s1981_s17 + $0x18] sm:$0xff] %vm1007_vm2, %v935_v59  ;;  %1049 = vst.msk [vmem:[%s1981_s17 + $0x148] sm:$0xff] %vm1007_vm2, %v973_v60  ;;  %v579_v63 = vadd.f32 %v1972_v29, %v578_v61  ;;  %v1343_v0 = vpop.f32.mrb[9].mxu0  ;;  %v769_v1 = vadd.f32 %v1972_v29, %v768_v62  ;;  %v1457_v2 = vpop.f32.mrb[9].mxu1 }
 0x101   : > { %v936_v3 = vmax.f32 %v579_v63, 0.0  ;;  %v974_v4 = vmax.f32 %v769_v1, 0.0 }
 0x102   : > { %v583_v5 = vpop.f32.mrb[10].mxu0  ;;  %v773_v7 = vpop.f32.mrb[10].mxu1 }
 0x103   : > { %1012 = vst.msk [vmem:[%s1981_s17 + $0x20] sm:$0xff] %vm1007_vm2, %v936_v3  ;;  %1050 = vst.msk [vmem:[%s1981_s17 + $0x150] sm:$0xff] %vm1007_vm2, %v974_v4  ;;  %v584_v8 = vadd.f32 %v1972_v29, %v583_v5  ;;  %v1346_v9 = vpop.f32.mrb[11].mxu0  ;;  %v774_v10 = vadd.f32 %v1972_v29, %v773_v7  ;;  %v1460_v11 = vpop.f32.mrb[11].mxu1 }
 0x105   : > { %v937_v12 = vmax.f32 %v584_v8, 0.0  ;;  %v975_v13 = vmax.f32 %v774_v10, 0.0 }
 0x106   : > { %v588_v14 = vpop.f32.mrb[12].mxu0  ;;  %v778_v15 = vpop.f32.mrb[12].mxu1 }
 0x107   : > { %1013 = vst.msk [vmem:[%s1981_s17 + $0x28] sm:$0xff] %vm1007_vm2, %v937_v12  ;;  %1051 = vst.msk [vmem:[%s1981_s17 + $0x158] sm:$0xff] %vm1007_vm2, %v975_v13  ;;  %v589_v16 = vadd.f32 %v1972_v29, %v588_v14  ;;  %v1349_v17 = vpop.f32.mrb[13].mxu0  ;;  %v779_v18 = vadd.f32 %v1972_v29, %v778_v15  ;;  %v1463_v19 = vpop.f32.mrb[13].mxu1 }
 0x109   : > { %v938_v20 = vmax.f32 %v589_v16, 0.0  ;;  %v976_v21 = vmax.f32 %v779_v18, 0.0 }
 0x10a   : > { %v593_v22 = vpop.f32.mrb[14].mxu0  ;;  %v783_v23 = vpop.f32.mrb[14].mxu1 }
 0x10b   : > { %1014 = vst.msk [vmem:[%s1981_s17 + $0x30] sm:$0xff] %vm1007_vm2, %v938_v20  ;;  %1052 = vst.msk [vmem:[%s1981_s17 + $0x160] sm:$0xff] %vm1007_vm2, %v976_v21  ;;  %v594_v24 = vadd.f32 %v1972_v29, %v593_v22  ;;  %v1352_v25 = vpop.f32.mrb[15].mxu0  ;;  %v784_v26 = vadd.f32 %v1972_v29, %v783_v23  ;;  %v1466_v27 = vpop.f32.mrb[15].mxu1 }
 0x10d   : > { %v939_v28 = vmax.f32 %v594_v24, 0.0  ;;  %v977_v30 = vmax.f32 %v784_v26, 0.0 }
 0x10e   : > { %v598_v31 = vpop.f32.mrb[16].mxu0  ;;  %v788_v32 = vpop.f32.mrb[16].mxu1 }
 0x10f   : > { %1015 = vst.msk [vmem:[%s1981_s17 + $0x38] sm:$0xff] %vm1007_vm2, %v939_v28  ;;  %1053 = vst.msk [vmem:[%s1981_s17 + $0x168] sm:$0xff] %vm1007_vm2, %v977_v30  ;;  %v599_v33 = vadd.f32 %v1972_v29, %v598_v31  ;;  %v1355_v34 = vpop.f32.mrb[17].mxu0  ;;  %v789_v35 = vadd.f32 %v1972_v29, %v788_v32  ;;  %v1469_v6 = vpop.f32.mrb[17].mxu1 }
 0x111   : > { %v940_v36 = vmax.f32 %v599_v33, 0.0  ;;  %v978_v37 = vmax.f32 %v789_v35, 0.0 }
 0x112   : > { %v603_v38 = vpop.f32.mrb[18].mxu0  ;;  %v793_v39 = vpop.f32.mrb[18].mxu1 }
 0x113   : > { %1016 = vst.msk [vmem:[%s1981_s17 + $0x40] sm:$0xff] %vm1007_vm2, %v940_v36  ;;  %1054 = vst.msk [vmem:[%s1981_s17 + $0x170] sm:$0xff] %vm1007_vm2, %v978_v37  ;;  %v604_v40 = vadd.f32 %v1972_v29, %v603_v38  ;;  %v1358_v41 = vpop.f32.mrb[19].mxu0  ;;  %v794_v42 = vadd.f32 %v1972_v29, %v793_v39  ;;  %v1472_v43 = vpop.f32.mrb[19].mxu1 }
 0x115   : > { %v941_v44 = vmax.f32 %v604_v40, 0.0  ;;  %v979_v45 = vmax.f32 %v794_v42, 0.0 }
 0x116   : > { %v608_v46 = vpop.f32.mrb[20].mxu0  ;;  %v798_v47 = vpop.f32.mrb[20].mxu1 }
 0x117   : > { %1017 = vst.msk [vmem:[%s1981_s17 + $0x48] sm:$0xff] %vm1007_vm2, %v941_v44  ;;  %1055 = vst.msk [vmem:[%s1981_s17 + $0x178] sm:$0xff] %vm1007_vm2, %v979_v45  ;;  %v609_v48 = vadd.f32 %v1972_v29, %v608_v46  ;;  %v1361_v49 = vpop.f32.mrb[21].mxu0  ;;  %v799_v50 = vadd.f32 %v1972_v29, %v798_v47  ;;  %v1475_v51 = vpop.f32.mrb[21].mxu1 }
 0x119   : > { %v942_v52 = vmax.f32 %v609_v48, 0.0  ;;  %v980_v53 = vmax.f32 %v799_v50, 0.0 }
 0x11a   : > { %v613_v54 = vpop.f32.mrb[22].mxu0  ;;  %v803_v55 = vpop.f32.mrb[22].mxu1 }
 0x11b   : > { %1018 = vst.msk [vmem:[%s1981_s17 + $0x50] sm:$0xff] %vm1007_vm2, %v942_v52  ;;  %1056 = vst.msk [vmem:[%s1981_s17 + $0x180] sm:$0xff] %vm1007_vm2, %v980_v53  ;;  %v614_v56 = vadd.f32 %v1972_v29, %v613_v54  ;;  %v1364_v57 = vpop.f32.mrb[23].mxu0  ;;  %v804_v58 = vadd.f32 %v1972_v29, %v803_v55  ;;  %v1478_v59 = vpop.f32.mrb[23].mxu1 }
 0x11d   : > { %v943_v60 = vmax.f32 %v614_v56, 0.0  ;;  %v981_v61 = vmax.f32 %v804_v58, 0.0 }
 0x11e   : > { %v618_v62 = vpop.f32.mrb[24].mxu0  ;;  %v808_v63 = vpop.f32.mrb[24].mxu1 }
 0x11f   : > { %1019 = vst.msk [vmem:[%s1981_s17 + $0x58] sm:$0xff] %vm1007_vm2, %v943_v60  ;;  %1057 = vst.msk [vmem:[%s1981_s17 + $0x188] sm:$0xff] %vm1007_vm2, %v981_v61  ;;  %v619_v0 = vadd.f32 %v1972_v29, %v618_v62  ;;  %v1367_v1 = vpop.f32.mrb[25].mxu0  ;;  %v809_v2 = vadd.f32 %v1972_v29, %v808_v63  ;;  %v1481_v3 = vpop.f32.mrb[25].mxu1 }
 0x121   : > { %v944_v4 = vmax.f32 %v619_v0, 0.0  ;;  %v982_v5 = vmax.f32 %v809_v2, 0.0 }
 0x122   : > { %v623_v7 = vpop.f32.mrb[26].mxu0  ;;  %v813_v8 = vpop.f32.mrb[26].mxu1 }
 0x123   : > { %1020 = vst.msk [vmem:[%s1981_s17 + $0x60] sm:$0xff] %vm1007_vm2, %v944_v4  ;;  %1058 = vst.msk [vmem:[%s1981_s17 + $0x190] sm:$0xff] %vm1007_vm2, %v982_v5  ;;  %v624_v9 = vadd.f32 %v1972_v29, %v623_v7  ;;  %v1370_v10 = vpop.f32.mrb[27].mxu0  ;;  %v814_v11 = vadd.f32 %v1972_v29, %v813_v8  ;;  %v1484_v12 = vpop.f32.mrb[27].mxu1 }
 0x125   : > { %v945_v13 = vmax.f32 %v624_v9, 0.0  ;;  %v983_v14 = vmax.f32 %v814_v11, 0.0 }
 0x126   : > { %v628_v15 = vpop.f32.mrb[28].mxu0  ;;  %v818_v16 = vpop.f32.mrb[28].mxu1 }
 0x127   : > { %1021 = vst.msk [vmem:[%s1981_s17 + $0x68] sm:$0xff] %vm1007_vm2, %v945_v13  ;;  %1059 = vst.msk [vmem:[%s1981_s17 + $0x198] sm:$0xff] %vm1007_vm2, %v983_v14  ;;  %v629_v17 = vadd.f32 %v1972_v29, %v628_v15  ;;  %v1373_v18 = vpop.f32.mrb[29].mxu0  ;;  %v819_v19 = vadd.f32 %v1972_v29, %v818_v16  ;;  %v1487_v20 = vpop.f32.mrb[29].mxu1 }
 0x129   : > { %v946_v21 = vmax.f32 %v629_v17, 0.0  ;;  %v984_v22 = vmax.f32 %v819_v19, 0.0 }
 0x12a   : > { %v633_v23 = vpop.f32.mrb[30].mxu0  ;;  %v823_v24 = vpop.f32.mrb[30].mxu1 }
 0x12b   : > { %1022 = vst.msk [vmem:[%s1981_s17 + $0x70] sm:$0xff] %vm1007_vm2, %v946_v21  ;;  %1060 = vst.msk [vmem:[%s1981_s17 + $0x1a0] sm:$0xff] %vm1007_vm2, %v984_v22  ;;  %v634_v25 = vadd.f32 %v1972_v29, %v633_v23  ;;  %v1376_v26 = vpop.f32.mrb[31].mxu0  ;;  %v824_v27 = vadd.f32 %v1972_v29, %v823_v24  ;;  %v1490_v28 = vpop.f32.mrb[31].mxu1 }
 0x12d   : > { %v947_v30 = vmax.f32 %v634_v25, 0.0  ;;  %v985_v31 = vmax.f32 %v824_v27, 0.0 }
 0x12e   : > { %v638_v32 = vpop.f32.mrb[32].mxu0  ;;  %v828_v33 = vpop.f32.mrb[32].mxu1 }
 0x12f   : > { %1023 = vst.msk [vmem:[%s1981_s17 + $0x78] sm:$0xff] %vm1007_vm2, %v947_v30  ;;  %1061 = vst.msk [vmem:[%s1981_s17 + $0x1a8] sm:$0xff] %vm1007_vm2, %v985_v31  ;;  %v639_v34 = vadd.f32 %v1972_v29, %v638_v32  ;;  %v1379_v35 = vpop.f32.mrb[33].mxu0  ;;  %v829_v6 = vadd.f32 %v1972_v29, %v828_v33  ;;  %v1493_v36 = vpop.f32.mrb[33].mxu1 }
 0x131   : > { %v948_v37 = vmax.f32 %v639_v34, 0.0  ;;  %v986_v38 = vmax.f32 %v829_v6, 0.0 }
 0x132   : > { %v643_v39 = vpop.f32.mrb[34].mxu0  ;;  %v833_v40 = vpop.f32.mrb[34].mxu1 }
 0x133   : > { %1024 = vst.msk [vmem:[%s1981_s17 + $0x80] sm:$0xff] %vm1007_vm2, %v948_v37  ;;  %1062 = vst.msk [vmem:[%s1981_s17 + $0x1b0] sm:$0xff] %vm1007_vm2, %v986_v38  ;;  %v644_v41 = vadd.f32 %v1972_v29, %v643_v39  ;;  %v1382_v42 = vpop.f32.mrb[35].mxu0  ;;  %v834_v43 = vadd.f32 %v1972_v29, %v833_v40  ;;  %v1496_v44 = vpop.f32.mrb[35].mxu1 }
 0x135   : > { %v949_v45 = vmax.f32 %v644_v41, 0.0  ;;  %v987_v46 = vmax.f32 %v834_v43, 0.0 }
 0x136   : > { %v648_v47 = vpop.f32.mrb[36].mxu0  ;;  %v838_v48 = vpop.f32.mrb[36].mxu1 }
 0x137   : > { %1025 = vst.msk [vmem:[%s1981_s17 + $0x88] sm:$0xff] %vm1007_vm2, %v949_v45  ;;  %1063 = vst.msk [vmem:[%s1981_s17 + $0x1b8] sm:$0xff] %vm1007_vm2, %v987_v46  ;;  %v649_v49 = vadd.f32 %v1972_v29, %v648_v47  ;;  %v1385_v50 = vpop.f32.mrb[37].mxu0  ;;  %v839_v51 = vadd.f32 %v1972_v29, %v838_v48  ;;  %v1499_v52 = vpop.f32.mrb[37].mxu1 }
 0x139   : > { %v950_v53 = vmax.f32 %v649_v49, 0.0  ;;  %v988_v54 = vmax.f32 %v839_v51, 0.0 }
 0x13a   : > { %v653_v55 = vpop.f32.mrb[38].mxu0  ;;  %v843_v56 = vpop.f32.mrb[38].mxu1 }
 0x13b   : > { %1026 = vst.msk [vmem:[%s1981_s17 + $0x90] sm:$0xff] %vm1007_vm2, %v950_v53  ;;  %1064 = vst.msk [vmem:[%s1981_s17 + $0x1c0] sm:$0xff] %vm1007_vm2, %v988_v54  ;;  %v654_v57 = vadd.f32 %v1972_v29, %v653_v55  ;;  %v1388_v58 = vpop.f32.mrb[39].mxu0  ;;  %v844_v59 = vadd.f32 %v1972_v29, %v843_v56  ;;  %v1502_v60 = vpop.f32.mrb[39].mxu1 }
 0x13d   : > { %v951_v61 = vmax.f32 %v654_v57, 0.0  ;;  %v989_v62 = vmax.f32 %v844_v59, 0.0 }
 0x13e   : > { %v658_v63 = vpop.f32.mrb[40].mxu0  ;;  %v848_v0 = vpop.f32.mrb[40].mxu1 }
 0x13f   : > { %1027 = vst.msk [vmem:[%s1981_s17 + $0x98] sm:$0xff] %vm1007_vm2, %v951_v61  ;;  %1065 = vst.msk [vmem:[%s1981_s17 + $0x1c8] sm:$0xff] %vm1007_vm2, %v989_v62  ;;  %v659_v1 = vadd.f32 %v1972_v29, %v658_v63  ;;  %v1391_v2 = vpop.f32.mrb[41].mxu0  ;;  %v849_v3 = vadd.f32 %v1972_v29, %v848_v0  ;;  %v1505_v4 = vpop.f32.mrb[41].mxu1 }
 0x141   : > { %v952_v5 = vmax.f32 %v659_v1, 0.0  ;;  %v990_v7 = vmax.f32 %v849_v3, 0.0 }
 0x142   : > { %v663_v8 = vpop.f32.mrb[42].mxu0  ;;  %v853_v9 = vpop.f32.mrb[42].mxu1 }
 0x143   : > { %1028 = vst.msk [vmem:[%s1981_s17 + $0xa0] sm:$0xff] %vm1007_vm2, %v952_v5  ;;  %1066 = vst.msk [vmem:[%s1981_s17 + $0x1d0] sm:$0xff] %vm1007_vm2, %v990_v7  ;;  %v664_v10 = vadd.f32 %v1972_v29, %v663_v8  ;;  %v1394_v11 = vpop.f32.mrb[43].mxu0  ;;  %v854_v12 = vadd.f32 %v1972_v29, %v853_v9  ;;  %v1508_v13 = vpop.f32.mrb[43].mxu1 }
 0x145   : > { %v953_v14 = vmax.f32 %v664_v10, 0.0  ;;  %v991_v15 = vmax.f32 %v854_v12, 0.0 }
 0x146   : > { %v668_v16 = vpop.f32.mrb[44].mxu0  ;;  %v858_v17 = vpop.f32.mrb[44].mxu1 }
 0x147   : > { %1029 = vst.msk [vmem:[%s1981_s17 + $0xa8] sm:$0xff] %vm1007_vm2, %v953_v14  ;;  %1067 = vst.msk [vmem:[%s1981_s17 + $0x1d8] sm:$0xff] %vm1007_vm2, %v991_v15  ;;  %v669_v18 = vadd.f32 %v1972_v29, %v668_v16  ;;  %v1397_v19 = vpop.f32.mrb[45].mxu0  ;;  %v859_v20 = vadd.f32 %v1972_v29, %v858_v17  ;;  %v1511_v21 = vpop.f32.mrb[45].mxu1 }
 0x149   : > { %v954_v22 = vmax.f32 %v669_v18, 0.0  ;;  %v992_v23 = vmax.f32 %v859_v20, 0.0 }
 0x14a   : > { %v673_v24 = vpop.f32.mrb[46].mxu0  ;;  %v863_v25 = vpop.f32.mrb[46].mxu1 }
 0x14b   : > { %1030 = vst.msk [vmem:[%s1981_s17 + $0xb0] sm:$0xff] %vm1007_vm2, %v954_v22  ;;  %1068 = vst.msk [vmem:[%s1981_s17 + $0x1e0] sm:$0xff] %vm1007_vm2, %v992_v23  ;;  %v674_v26 = vadd.f32 %v1972_v29, %v673_v24  ;;  %v1400_v27 = vpop.f32.mrb[47].mxu0  ;;  %v864_v28 = vadd.f32 %v1972_v29, %v863_v25  ;;  %v1514_v30 = vpop.f32.mrb[47].mxu1 }
 0x14d   : > { %v955_v31 = vmax.f32 %v674_v26, 0.0  ;;  %v993_v32 = vmax.f32 %v864_v28, 0.0 }
 0x14e   : > { %v678_v33 = vpop.f32.mrb[48].mxu0  ;;  %v868_v34 = vpop.f32.mrb[48].mxu1 }
 0x14f   : > { %1031 = vst.msk [vmem:[%s1981_s17 + $0xb8] sm:$0xff] %vm1007_vm2, %v955_v31  ;;  %1069 = vst.msk [vmem:[%s1981_s17 + $0x1e8] sm:$0xff] %vm1007_vm2, %v993_v32  ;;  %v679_v35 = vadd.f32 %v1972_v29, %v678_v33  ;;  %v1403_v6 = vpop.f32.mrb[49].mxu0  ;;  %v869_v36 = vadd.f32 %v1972_v29, %v868_v34  ;;  %v1517_v37 = vpop.f32.mrb[49].mxu1 }
 0x151   : > { %v956_v38 = vmax.f32 %v679_v35, 0.0  ;;  %v994_v39 = vmax.f32 %v869_v36, 0.0 }
 0x152   : > { %v683_v40 = vpop.f32.mrb[50].mxu0  ;;  %v873_v41 = vpop.f32.mrb[50].mxu1 }
 0x153   : > { %1032 = vst.msk [vmem:[%s1981_s17 + $0xc0] sm:$0xff] %vm1007_vm2, %v956_v38  ;;  %1070 = vst.msk [vmem:[%s1981_s17 + $0x1f0] sm:$0xff] %vm1007_vm2, %v994_v39  ;;  %v684_v42 = vadd.f32 %v1972_v29, %v683_v40  ;;  %v1406_v43 = vpop.f32.mrb[51].mxu0  ;;  %v874_v44 = vadd.f32 %v1972_v29, %v873_v41  ;;  %v1520_v45 = vpop.f32.mrb[51].mxu1 }
 0x155   : > { %v957_v46 = vmax.f32 %v684_v42, 0.0  ;;  %v995_v47 = vmax.f32 %v874_v44, 0.0 }
 0x156   : > { %v688_v48 = vpop.f32.mrb[52].mxu0  ;;  %v878_v49 = vpop.f32.mrb[52].mxu1 }
 0x157   : > { %1033 = vst.msk [vmem:[%s1981_s17 + $0xc8] sm:$0xff] %vm1007_vm2, %v957_v46  ;;  %1071 = vst.msk [vmem:[%s1981_s17 + $0x1f8] sm:$0xff] %vm1007_vm2, %v995_v47  ;;  %v689_v50 = vadd.f32 %v1972_v29, %v688_v48  ;;  %v1409_v51 = vpop.f32.mrb[53].mxu0  ;;  %v879_v52 = vadd.f32 %v1972_v29, %v878_v49  ;;  %v1523_v53 = vpop.f32.mrb[53].mxu1 }
 0x159   : > { %v958_v54 = vmax.f32 %v689_v50, 0.0  ;;  %v996_v55 = vmax.f32 %v879_v52, 0.0 }
 0x15a   : > { %v693_v56 = vpop.f32.mrb[54].mxu0  ;;  %v883_v57 = vpop.f32.mrb[54].mxu1 }
 0x15b   : > { %1034 = vst.msk [vmem:[%s1981_s17 + $0xd0] sm:$0xff] %vm1007_vm2, %v958_v54  ;;  %1072 = vst.msk [vmem:[%s1981_s17 + $0x200] sm:$0xff] %vm1007_vm2, %v996_v55  ;;  %v694_v58 = vadd.f32 %v1972_v29, %v693_v56  ;;  %v1412_v59 = vpop.f32.mrb[55].mxu0  ;;  %v884_v60 = vadd.f32 %v1972_v29, %v883_v57  ;;  %v1526_v61 = vpop.f32.mrb[55].mxu1 }
 0x15d   : > { %v959_v62 = vmax.f32 %v694_v58, 0.0  ;;  %v997_v63 = vmax.f32 %v884_v60, 0.0 }
 0x15e   : > { %v698_v0 = vpop.f32.mrb[56].mxu0  ;;  %v888_v1 = vpop.f32.mrb[56].mxu1 }
 0x15f   : > { %1035 = vst.msk [vmem:[%s1981_s17 + $0xd8] sm:$0xff] %vm1007_vm2, %v959_v62  ;;  %1073 = vst.msk [vmem:[%s1981_s17 + $0x208] sm:$0xff] %vm1007_vm2, %v997_v63  ;;  %v699_v2 = vadd.f32 %v1972_v29, %v698_v0  ;;  %v1415_v3 = vpop.f32.mrb[57].mxu0  ;;  %v889_v4 = vadd.f32 %v1972_v29, %v888_v1  ;;  %v1529_v5 = vpop.f32.mrb[57].mxu1 }
 0x161   : > { %v960_v7 = vmax.f32 %v699_v2, 0.0  ;;  %v998_v8 = vmax.f32 %v889_v4, 0.0 }
 0x162   : > { %v703_v9 = vpop.f32.mrb[58].mxu0  ;;  %v893_v10 = vpop.f32.mrb[58].mxu1 }
 0x163   : > { %1036 = vst.msk [vmem:[%s1981_s17 + $0xe0] sm:$0xff] %vm1007_vm2, %v960_v7  ;;  %1074 = vst.msk [vmem:[%s1981_s17 + $0x210] sm:$0xff] %vm1007_vm2, %v998_v8  ;;  %v704_v11 = vadd.f32 %v1972_v29, %v703_v9  ;;  %v1418_v12 = vpop.f32.mrb[59].mxu0  ;;  %v894_v13 = vadd.f32 %v1972_v29, %v893_v10  ;;  %v1532_v14 = vpop.f32.mrb[59].mxu1 }
 0x165   : > { %v961_v15 = vmax.f32 %v704_v11, 0.0  ;;  %v999_v16 = vmax.f32 %v894_v13, 0.0 }
 0x166   : > { %v708_v17 = vpop.f32.mrb[60].mxu0  ;;  %v898_v18 = vpop.f32.mrb[60].mxu1 }
 0x167   : > { %1037 = vst.msk [vmem:[%s1981_s17 + $0xe8] sm:$0xff] %vm1007_vm2, %v961_v15  ;;  %1075 = vst.msk [vmem:[%s1981_s17 + $0x218] sm:$0xff] %vm1007_vm2, %v999_v16  ;;  %v709_v19 = vadd.f32 %v1972_v29, %v708_v17  ;;  %v1421_v20 = vpop.f32.mrb[61].mxu0  ;;  %v899_v21 = vadd.f32 %v1972_v29, %v898_v18  ;;  %v1535_v22 = vpop.f32.mrb[61].mxu1 }
 0x169   : > { %v962_v23 = vmax.f32 %v709_v19, 0.0  ;;  %v1000_v24 = vmax.f32 %v899_v21, 0.0 }
 0x16a   : > { %v713_v25 = vpop.f32.mrb[62].mxu0  ;;  %v903_v26 = vpop.f32.mrb[62].mxu1 }
 0x16b   : > { %1038 = vst.msk [vmem:[%s1981_s17 + $0xf0] sm:$0xff] %vm1007_vm2, %v962_v23  ;;  %1076 = vst.msk [vmem:[%s1981_s17 + $0x220] sm:$0xff] %vm1007_vm2, %v1000_v24  ;;  %v714_v27 = vadd.f32 %v1972_v29, %v713_v25  ;;  %v1424_v28 = vpop.f32.mrb[63].mxu0  ;;  %v904_v30 = vadd.f32 %v1972_v29, %v903_v26  ;;  %v1538_v31 = vpop.f32.mrb[63].mxu1 }
 0x16d   : > { %v963_v32 = vmax.f32 %v714_v27, 0.0  ;;  %v1001_v33 = vmax.f32 %v904_v30, 0.0 }
 0x16e   : > { %v718_v34 = vpop.f32.mrb[64].mxu0  ;;  %v908_v35 = vpop.f32.mrb[64].mxu1 }
 0x16f   : > { %1039 = vst.msk [vmem:[%s1981_s17 + $0xf8] sm:$0xff] %vm1007_vm2, %v963_v32  ;;  %1077 = vst.msk [vmem:[%s1981_s17 + $0x228] sm:$0xff] %vm1007_vm2, %v1001_v33  ;;  %v719_v6 = vadd.f32 %v1972_v29, %v718_v34  ;;  %v1427_v36 = vpop.f32.mrb[65].mxu0  ;;  %v909_v37 = vadd.f32 %v1972_v29, %v908_v35  ;;  %v1541_v38 = vpop.f32.mrb[65].mxu1 }
 0x171   : > { %v964_v39 = vmax.f32 %v719_v6, 0.0  ;;  %v1002_v40 = vmax.f32 %v909_v37, 0.0 }
 0x172   : > { %v723_v41 = vpop.f32.mrb[66].mxu0  ;;  %v913_v42 = vpop.f32.mrb[66].mxu1 }
 0x173   : > { %1040 = vst.msk [vmem:[%s1981_s17 + $0x100] sm:$0xff] %vm1007_vm2, %v964_v39  ;;  %1078 = vst.msk [vmem:[%s1981_s17 + $0x230] sm:$0xff] %vm1007_vm2, %v1002_v40  ;;  %v724_v43 = vadd.f32 %v1972_v29, %v723_v41  ;;  %v1430_v44 = vpop.f32.mrb[67].mxu0  ;;  %v914_v45 = vadd.f32 %v1972_v29, %v913_v42  ;;  %v1544_v46 = vpop.f32.mrb[67].mxu1 }
 0x175   : > { %v965_v47 = vmax.f32 %v724_v43, 0.0  ;;  %v1003_v48 = vmax.f32 %v914_v45, 0.0 }
 0x176   : > { %v728_v49 = vpop.f32.mrb[68].mxu0  ;;  %v918_v50 = vpop.f32.mrb[68].mxu1 }
 0x177   : > { %1041 = vst.msk [vmem:[%s1981_s17 + $0x108] sm:$0xff] %vm1007_vm2, %v965_v47  ;;  %1079 = vst.msk [vmem:[%s1981_s17 + $0x238] sm:$0xff] %vm1007_vm2, %v1003_v48  ;;  %v729_v51 = vadd.f32 %v1972_v29, %v728_v49  ;;  %v1433_v52 = vpop.f32.mrb[69].mxu0  ;;  %v919_v53 = vadd.f32 %v1972_v29, %v918_v50  ;;  %v1547_v54 = vpop.f32.mrb[69].mxu1 }
 0x179   : > { %v966_v55 = vmax.f32 %v729_v51, 0.0  ;;  %v1004_v56 = vmax.f32 %v919_v53, 0.0 }
 0x17a   : > { %v733_v57 = vpop.f32.mrb[70].mxu0  ;;  %v923_v58 = vpop.f32.mrb[70].mxu1 }
 0x17b   : > { %1042 = vst.msk [vmem:[%s1981_s17 + $0x110] sm:$0xff] %vm1007_vm2, %v966_v55  ;;  %1080 = vst.msk [vmem:[%s1981_s17 + $0x240] sm:$0xff] %vm1007_vm2, %v1004_v56  ;;  %v734_v59 = vadd.f32 %v1972_v29, %v733_v57  ;;  %v1436_v60 = vpop.f32.mrb[71].mxu0  ;;  %v924_v61 = vadd.f32 %v1972_v29, %v923_v58  ;;  %v1550_v62 = vpop.f32.mrb[71].mxu1 }
 0x17d   : > { %v967_v63 = vmax.f32 %v734_v59, 0.0  ;;  %v1005_v0 = vmax.f32 %v924_v61, 0.0 }
 0x17e   : > { %v738_v1 = vpop.f32.mrb[72].mxu0  ;;  %v928_v2 = vpop.f32.mrb[72].mxu1 }
 0x17f   : > { %1043 = vst.msk [vmem:[%s1981_s17 + $0x118] sm:$0xff] %vm1007_vm2, %v967_v63  ;;  %1081 = vst.msk [vmem:[%s1981_s17 + $0x248] sm:$0xff] %vm1007_vm2, %v1005_v0  ;;  %v739_v3 = vadd.f32 %v1972_v29, %v738_v1  ;;  %v1439_v4 = vpop.f32.mrb[73].mxu0  ;;  %v929_v5 = vadd.f32 %v1972_v29, %v928_v2  ;;  %v1553_v7 = vpop.f32.mrb[73].mxu1 }
 0x181   : > { %v968_v8 = vmax.f32 %v739_v3, 0.0  ;;  %v1006_v9 = vmax.f32 %v929_v5, 0.0 }
 0x182   : > { %v743_v10 = vpop.f32.mrb[74].mxu0 }
 0x183   : > { %1044 = vst.msk [vmem:[%s1981_s17 + $0x120] sm:$0xff] %vm1007_vm2, %v968_v8  ;;  %1082 = vst.msk [vmem:[%s1981_s17 + $0x250] sm:$0xff] %vm1007_vm2, %v1006_v9  ;;  %v744_v11 = vadd.f32 %v1972_v29, %v743_v10  ;;  %v1442_v12 = vpop.f32.mrb[75].mxu0 }
 0x185   : > { %v969_v13 = vmax.f32 %v744_v11, 0.0 }
 0x187   : > { %1045 = vst.msk [vmem:[%s1981_s17 + $0x128] sm:$0xff] %vm1007_vm2, %v969_v13 }
 0x188 PF: > { %s13_s12 = sadd.s32 1, %s1596_s12  }
 0x189   : > { %p10_p4 = scmp.ge.s32.totalorder %s13_s12, 5  }
 0x18b   :  { %12 = sbr.rel (!%p10_p4) target bundleno = 1 (0x1), region = 62 }

// kernel: herdr_forward.6
= control target key start
LH: loop header
LB: loop body
LE: loop exit
PB: predicated region body
PF: predicated region fallthrough
CT: control target
= control target key end

     0   :  { %s1311_s0 = inlined_call_operand.vmem [shape: f32[16,98,128], index: 0, kind: input, shape index: {}]   ;;  %s1312_s1 = inlined_call_operand.vmem [shape: f32[98,128], index: 1, kind: output, shape index: {}]  }
   0x1   :  { %v8_v0 = vld [vmem:[%s1311_s0] sm:$0xff]  ;;  %v443_v1 = vld [vmem:[%s1311_s0 + $0x68] sm:$0xff]  ;;  %v456_v2 = vld [vmem:[%s1311_s0 + $0xd0] sm:$0xff] }
   0x2   :  { %v35_v3 = vmax.f32 %v8_v0, %v443_v1  ;;  %v469_v4 = vld [vmem:[%s1311_s0 + $0x138] sm:$0xff]  ;;  %v482_v6 = vld [vmem:[%s1311_s0 + $0x1a0] sm:$0xff]  ;;  %v9_v8 = vld [vmem:[%s1311_s0 + $0x8] sm:$0xff] }
   0x3   :  { %v444_v9 = vld [vmem:[%s1311_s0 + $0x70] sm:$0xff]  ;;  %v495_v10 = vld [vmem:[%s1311_s0 + $0x208] sm:$0xff]  ;;  %v457_v12 = vld [vmem:[%s1311_s0 + $0xd8] sm:$0xff] }
   0x4   :  { %v62_v5 = vmax.f32 %v35_v3, %v456_v2  ;;  %v36_v11 = vmax.f32 %v9_v8, %v444_v9  ;;  %v470_v14 = vld [vmem:[%s1311_s0 + $0x140] sm:$0xff]  ;;  %v508_v15 = vld [vmem:[%s1311_s0 + $0x270] sm:$0xff]  ;;  %v483_v18 = vld [vmem:[%s1311_s0 + $0x1a8] sm:$0xff] }
   0x5   :  { %v521_v19 = vld [vmem:[%s1311_s0 + $0x2d8] sm:$0xff]  ;;  %v10_v21 = vld [vmem:[%s1311_s0 + $0x10] sm:$0xff]  ;;  %v458_v25 = vld [vmem:[%s1311_s0 + $0xe0] sm:$0xff] }
   0x6   :  { %v89_v7 = vmax.f32 %v62_v5, %v469_v4  ;;  %v63_v16 = vmax.f32 %v36_v11, %v457_v12  ;;  %v496_v23 = vld [vmem:[%s1311_s0 + $0x210] sm:$0xff]  ;;  %v445_v24 = vld [vmem:[%s1311_s0 + $0x78] sm:$0xff]  ;;  %v534_v26 = vld [vmem:[%s1311_s0 + $0x340] sm:$0xff] }
   0x7   :  { %v37_v28 = vmax.f32 %v10_v21, %v445_v24  ;;  %v509_v30 = vld [vmem:[%s1311_s0 + $0x278] sm:$0xff]  ;;  %v471_v31 = vld [vmem:[%s1311_s0 + $0x148] sm:$0xff]  ;;  %v560_v36 = vld [vmem:[%s1311_s0 + $0x410] sm:$0xff] }
   0x8   :  { %v116_v13 = vmax.f32 %v89_v7, %v482_v6  ;;  %v90_v20 = vmax.f32 %v63_v16, %v470_v14  ;;  %v547_v32 = vld [vmem:[%s1311_s0 + $0x3a8] sm:$0xff]  ;;  %v522_v37 = vld [vmem:[%s1311_s0 + $0x2e0] sm:$0xff]  ;;  %v484_v38 = vld [vmem:[%s1311_s0 + $0x1b0] sm:$0xff] }
   0x9   :  { %v64_v34 = vmax.f32 %v37_v28, %v458_v25  ;;  %v11_v41 = vld [vmem:[%s1311_s0 + $0x18] sm:$0xff]  ;;  %v446_v42 = vld [vmem:[%s1311_s0 + $0x80] sm:$0xff]  ;;  %v459_v43 = vld [vmem:[%s1311_s0 + $0xe8] sm:$0xff] }
   0xa   :  { %v143_v17 = vmax.f32 %v116_v13, %v495_v10  ;;  %v117_v27 = vmax.f32 %v90_v20, %v483_v18  ;;  %v535_v45 = vld [vmem:[%s1311_s0 + $0x348] sm:$0xff]  ;;  %v497_v46 = vld [vmem:[%s1311_s0 + $0x218] sm:$0xff]  ;;  %v38_v47 = vmax.f32 %v11_v41, %v446_v42  ;;  %v472_v51 = vld [vmem:[%s1311_s0 + $0x150] sm:$0xff] }
   0xb   :  { %v91_v40 = vmax.f32 %v64_v34, %v471_v31  ;;  %v573_v48 = vld [vmem:[%s1311_s0 + $0x478] sm:$0xff]  ;;  %v586_v53 = vld [vmem:[%s1311_s0 + $0x4e0] sm:$0xff]  ;;  %v548_v54 = vld [vmem:[%s1311_s0 + $0x3b0] sm:$0xff] }
   0xc   :  { %v170_v22 = vmax.f32 %v143_v17, %v508_v15  ;;  %v144_v33 = vmax.f32 %v117_v27, %v496_v23  ;;  %v510_v55 = vld [vmem:[%s1311_s0 + $0x280] sm:$0xff]  ;;  %v65_v56 = vmax.f32 %v38_v47, %v459_v43  ;;  %v599_v57 = vld [vmem:[%s1311_s0 + $0x548] sm:$0xff]  ;;  %v561_v59 = vld [vmem:[%s1311_s0 + $0x418] sm:$0xff] }
   0xd   :  { %v118_v50 = vmax.f32 %v91_v40, %v484_v38  ;;  %v485_v61 = vld [vmem:[%s1311_s0 + $0x1b8] sm:$0xff]  ;;  %v523_v63 = vld [vmem:[%s1311_s0 + $0x2e8] sm:$0xff]  ;;  %v12_v1 = vld [vmem:[%s1311_s0 + $0x20] sm:$0xff] }
   0xe   :  { %v197_v29 = vmax.f32 %v170_v22, %v521_v19  ;;  %v171_v39 = vmax.f32 %v144_v33, %v509_v30  ;;  %v92_v0 = vmax.f32 %v65_v56, %v472_v51  ;;  %v447_v2 = vld [vmem:[%s1311_s0 + $0x88] sm:$0xff]  ;;  %v612_v3 = vld [vmem:[%s1311_s0 + $0x5b0] sm:$0xff]  ;;  %v498_v6 = vld [vmem:[%s1311_s0 + $0x220] sm:$0xff] }
   0xf   :  { %v145_v60 = vmax.f32 %v118_v50, %v497_v46  ;;  %v39_v7 = vmax.f32 %v12_v1, %v447_v2  ;;  %v460_v8 = vld [vmem:[%s1311_s0 + $0xf0] sm:$0xff]  ;;  %v574_v10 = vld [vmem:[%s1311_s0 + $0x480] sm:$0xff]  ;;  %v473_v13 = vld [vmem:[%s1311_s0 + $0x158] sm:$0xff] }
  0x10   :  { %v224_v35 = vmax.f32 %v197_v29, %v534_v26  ;;  %v198_v49 = vmax.f32 %v171_v39, %v522_v37  ;;  %v536_v11 = vld [vmem:[%s1311_s0 + $0x350] sm:$0xff]  ;;  %v119_v12 = vmax.f32 %v92_v0, %v485_v61  ;;  %v625_v14 = vld [vmem:[%s1311_s0 + $0x618] sm:$0xff]  ;;  %v587_v16 = vld [vmem:[%s1311_s0 + $0x4e8] sm:$0xff] }
  0x11   :  { %v172_v5 = vmax.f32 %v145_v60, %v510_v55  ;;  %v511_v18 = vld [vmem:[%s1311_s0 + $0x288] sm:$0xff]  ;;  %v66_v19 = vmax.f32 %v39_v7, %v460_v8  ;;  %v600_v21 = vld [vmem:[%s1311_s0 + $0x550] sm:$0xff]  ;;  %v549_v22 = vld [vmem:[%s1311_s0 + $0x3b8] sm:$0xff] }
  0x12   :  { %v251_v44 = vmax.f32 %v224_v35, %v547_v32  ;;  %v225_v58 = vmax.f32 %v198_v49, %v535_v45  ;;  %v146_v23 = vmax.f32 %v119_v12, %v498_v6  ;;  %v486_v24 = vld [vmem:[%s1311_s0 + $0x1c0] sm:$0xff]  ;;  %v524_v28 = vld [vmem:[%s1311_s0 + $0x2f0] sm:$0xff]  ;;  %v13_v30 = vld [vmem:[%s1311_s0 + $0x28] sm:$0xff] }
  0x13   :  { %v199_v17 = vmax.f32 %v172_v5, %v523_v63  ;;  %v562_v27 = vld [vmem:[%s1311_s0 + $0x420] sm:$0xff]  ;;  %v93_v29 = vmax.f32 %v66_v19, %v473_v13  ;;  %v499_v33 = vld [vmem:[%s1311_s0 + $0x228] sm:$0xff]  ;;  %v448_v34 = vld [vmem:[%s1311_s0 + $0x90] sm:$0xff] }
  0x14   :  { %v278_v52 = vmax.f32 %v251_v44, %v560_v36  ;;  %v252_v4 = vmax.f32 %v225_v58, %v548_v54  ;;  %v173_v32 = vmax.f32 %v146_v23, %v511_v18  ;;  %v461_v35 = vld [vmem:[%s1311_s0 + $0xf8] sm:$0xff]  ;;  %v40_v41 = vmax.f32 %v13_v30, %v448_v34  ;;  %v575_v43 = vld [vmem:[%s1311_s0 + $0x488] sm:$0xff]  ;;  %v512_v45 = vld [vmem:[%s1311_s0 + $0x290] sm:$0xff] }
  0x15   :  { %v226_v26 = vmax.f32 %v199_v17, %v536_v11  ;;  %v613_v37 = vld [vmem:[%s1311_s0 + $0x5b8] sm:$0xff]  ;;  %v120_v40 = vmax.f32 %v93_v29, %v486_v24  ;;  %v474_v46 = vld [vmem:[%s1311_s0 + $0x160] sm:$0xff]  ;;  %v588_v50 = vld [vmem:[%s1311_s0 + $0x4f0] sm:$0xff] }
  0x16   :  { %v305_v62 = vmax.f32 %v278_v52, %v573_v48  ;;  %v279_v15 = vmax.f32 %v252_v4, %v561_v59  ;;  %v537_v39 = vld [vmem:[%s1311_s0 + $0x358] sm:$0xff]  ;;  %v200_v44 = vmax.f32 %v173_v32, %v524_v28  ;;  %v626_v48 = vld [vmem:[%s1311_s0 + $0x620] sm:$0xff]  ;;  %v563_v55 = vld [vmem:[%s1311_s0 + $0x428] sm:$0xff] }
  0x17   :  { %v253_v38 = vmax.f32 %v226_v26, %v549_v22  ;;  %v550_v51 = vld [vmem:[%s1311_s0 + $0x3c0] sm:$0xff]  ;;  %v147_v52 = vmax.f32 %v120_v40, %v499_v33  ;;  %v525_v56 = vld [vmem:[%s1311_s0 + $0x2f8] sm:$0xff]  ;;  %v500_v4 = vld [vmem:[%s1311_s0 + $0x230] sm:$0xff] }
  0x18   :  { %v332_v9 = vmax.f32 %v305_v62, %v586_v53  ;;  %v306_v25 = vmax.f32 %v279_v15, %v574_v10  ;;  %v67_v53 = vmax.f32 %v40_v41, %v461_v35  ;;  %v227_v54 = vmax.f32 %v200_v44, %v537_v39  ;;  %v14_v62 = vld [vmem:[%s1311_s0 + $0x30] sm:$0xff]  ;;  %v449_v63 = vld [vmem:[%s1311_s0 + $0x98] sm:$0xff]  ;;  %v462_v0 = vld [vmem:[%s1311_s0 + $0x100] sm:$0xff] }
  0x19   :  { %v280_v49 = vmax.f32 %v253_v38, %v562_v27  ;;  %v174_v60 = vmax.f32 %v147_v52, %v512_v45  ;;  %v601_v1 = vld [vmem:[%s1311_s0 + $0x558] sm:$0xff]  ;;  %v41_v5 = vmax.f32 %v14_v62, %v449_v63  ;;  %v614_v8 = vld [vmem:[%s1311_s0 + $0x5c0] sm:$0xff]  ;;  %v475_v12 = vld [vmem:[%s1311_s0 + $0x168] sm:$0xff] }
  0x1a   :  { %v359_v20 = vmax.f32 %v332_v9, %v599_v57  ;;  %v333_v36 = vmax.f32 %v306_v25, %v587_v16  ;;  %v487_v57 = vld [vmem:[%s1311_s0 + $0x1c8] sm:$0xff]  ;;  %v94_v61 = vmax.f32 %v67_v53, %v474_v46  ;;  %v254_v2 = vmax.f32 %v227_v54, %v550_v51  ;;  %v576_v9 = vld [vmem:[%s1311_s0 + $0x490] sm:$0xff]  ;;  %v589_v15 = vld [vmem:[%s1311_s0 + $0x4f8] sm:$0xff] }
  0x1b   :  { %v307_v59 = vmax.f32 %v280_v49, %v575_v43  ;;  %v201_v10 = vmax.f32 %v174_v60, %v525_v56  ;;  %v627_v13 = vld [vmem:[%s1311_s0 + $0x628] sm:$0xff]  ;;  %v513_v17 = vld [vmem:[%s1311_s0 + $0x298] sm:$0xff]  ;;  %v68_v18 = vmax.f32 %v41_v5, %v462_v0  ;;  %v564_v22 = vld [vmem:[%s1311_s0 + $0x430] sm:$0xff] }
  0x1c   :  { %v386_v31 = vmax.f32 %v359_v20, %v612_v3  ;;  %v360_v47 = vmax.f32 %v333_v36, %v600_v21  ;;  %v538_v3 = vld [vmem:[%s1311_s0 + $0x360] sm:$0xff]  ;;  %v121_v11 = vmax.f32 %v94_v61, %v487_v57  ;;  %v551_v16 = vld [vmem:[%s1311_s0 + $0x3c8] sm:$0xff]  ;;  %v488_v24 = vld [vmem:[%s1311_s0 + $0x1d0] sm:$0xff] }
  0x1d   :  { %v334_v7 = vmax.f32 %v307_v59, %v588_v50  ;;  %v602_v20 = vld [vmem:[%s1311_s0 + $0x560] sm:$0xff]  ;;  %v228_v21 = vmax.f32 %v201_v10, %v538_v3  ;;  %v95_v27 = vmax.f32 %v68_v18, %v475_v12  ;;  %v15_v28 = vld [vmem:[%s1311_s0 + $0x38] sm:$0xff]  ;;  %v463_v36 = vld [vmem:[%s1311_s0 + $0x108] sm:$0xff] }
  0x1e   :  { %v413_v42 = vmax.f32 %v386_v31, %v625_v14  ;;  %v387_v58 = vmax.f32 %v360_v47, %v613_v37  ;;  %v281_v14 = vmax.f32 %v254_v2, %v563_v55  ;;  %v148_v23 = vmax.f32 %v121_v11, %v500_v4  ;;  %v526_v26 = vld [vmem:[%s1311_s0 + $0x300] sm:$0xff]  ;;  %v615_v31 = vld [vmem:[%s1311_s0 + $0x5c8] sm:$0xff]  ;;  %v501_v34 = vld [vmem:[%s1311_s0 + $0x238] sm:$0xff] }
  0x1f   :  { %v361_v19 = vmax.f32 %v334_v7, %v601_v1  ;;  %v450_v29 = vld [vmem:[%s1311_s0 + $0xa0] sm:$0xff]  ;;  %v255_v32 = vmax.f32 %v228_v21, %v551_v16  ;;  %v577_v38 = vld [vmem:[%s1311_s0 + $0x498] sm:$0xff]  ;;  %v539_v39 = vld [vmem:[%s1311_s0 + $0x368] sm:$0xff]  ;;  %v122_v40 = vmax.f32 %v95_v27, %v488_v24 }
  0x20   :  { %426 = vst [vmem:[%s1312_s1] sm:$0xff] %v413_v42  ;;  %v414_v6 = vmax.f32 %v387_v58, %v626_v48  ;;  %v308_v25 = vmax.f32 %v281_v14, %v576_v9  ;;  %v175_v33 = vmax.f32 %v148_v23, %v513_v17  ;;  %v42_v35 = vmax.f32 %v15_v28, %v450_v29  ;;  %v476_v41 = vld [vmem:[%s1311_s0 + $0x170] sm:$0xff]  ;;  %v590_v45 = vld [vmem:[%s1311_s0 + $0x500] sm:$0xff]  ;;  %v603_v50 = vld [vmem:[%s1311_s0 + $0x568] sm:$0xff] }
  0x21   :  { %v388_v30 = vmax.f32 %v361_v19, %v614_v8  ;;  %v628_v43 = vld [vmem:[%s1311_s0 + $0x630] sm:$0xff]  ;;  %v282_v44 = vmax.f32 %v255_v32, %v564_v22  ;;  %v514_v47 = vld [vmem:[%s1311_s0 + $0x2a0] sm:$0xff]  ;;  %v149_v52 = vmax.f32 %v122_v40, %v501_v34  ;;  %v489_v53 = vld [vmem:[%s1311_s0 + $0x1d8] sm:$0xff] }
  0x22   :  { %427 = vst [vmem:[%s1312_s1 + $0x8] sm:$0xff] %v414_v6  ;;  %v335_v37 = vmax.f32 %v308_v25, %v589_v15  ;;  %v202_v46 = vmax.f32 %v175_v33, %v526_v26  ;;  %v69_v48 = vmax.f32 %v42_v35, %v463_v36  ;;  %v552_v51 = vld [vmem:[%s1311_s0 + $0x3d0] sm:$0xff]  ;;  %v565_v56 = vld [vmem:[%s1311_s0 + $0x438] sm:$0xff]  ;;  %v527_v57 = vld [vmem:[%s1311_s0 + $0x308] sm:$0xff] }
  0x23   :  { %v415_v42 = vmax.f32 %v388_v30, %v627_v13  ;;  %v309_v54 = vmax.f32 %v282_v44, %v577_v38  ;;  %v16_v59 = vld [vmem:[%s1311_s0 + $0x40] sm:$0xff]  ;;  %v176_v61 = vmax.f32 %v149_v52, %v514_v47  ;;  %v451_v63 = vld [vmem:[%s1311_s0 + $0xa8] sm:$0xff]  ;;  %v464_v0 = vld [vmem:[%s1311_s0 + $0x110] sm:$0xff] }
  0x24   :  { %v362_v49 = vmax.f32 %v335_v37, %v602_v20  ;;  %v229_v55 = vmax.f32 %v202_v46, %v539_v39  ;;  %v96_v58 = vmax.f32 %v69_v48, %v476_v41  ;;  %v502_v62 = vld [vmem:[%s1311_s0 + $0x240] sm:$0xff]  ;;  %v616_v2 = vld [vmem:[%s1311_s0 + $0x5d0] sm:$0xff]  ;;  %v43_v6 = vmax.f32 %v16_v59, %v451_v63  ;;  %v515_v10 = vld [vmem:[%s1311_s0 + $0x2a8] sm:$0xff] }
  0x25   :  { %428 = vst [vmem:[%s1312_s1 + $0x10] sm:$0xff] %v415_v42  ;;  %v336_v1 = vmax.f32 %v309_v54, %v590_v45  ;;  %v540_v4 = vld [vmem:[%s1311_s0 + $0x370] sm:$0xff]  ;;  %v578_v8 = vld [vmem:[%s1311_s0 + $0x4a0] sm:$0xff]  ;;  %v203_v9 = vmax.f32 %v176_v61, %v527_v57  ;;  %v477_v11 = vld [vmem:[%s1311_s0 + $0x178] sm:$0xff] }
  0x26   :  { %v389_v60 = vmax.f32 %v362_v49, %v615_v31  ;;  %v256_v3 = vmax.f32 %v229_v55, %v552_v51  ;;  %v123_v5 = vmax.f32 %v96_v58, %v489_v53  ;;  %v629_v13 = vld [vmem:[%s1311_s0 + $0x638] sm:$0xff]  ;;  %v591_v15 = vld [vmem:[%s1311_s0 + $0x508] sm:$0xff]  ;;  %v70_v18 = vmax.f32 %v43_v6, %v464_v0  ;;  %v566_v20 = vld [vmem:[%s1311_s0 + $0x440] sm:$0xff] }
  0x27   :  { %v363_v12 = vmax.f32 %v336_v1, %v603_v50  ;;  %v553_v16 = vld [vmem:[%s1311_s0 + $0x3d8] sm:$0xff]  ;;  %v230_v19 = vmax.f32 %v203_v9, %v540_v4  ;;  %v528_v21 = vld [vmem:[%s1311_s0 + $0x310] sm:$0xff]  ;;  %v490_v22 = vld [vmem:[%s1311_s0 + $0x1e0] sm:$0xff] }
  0x28   :  { %v416_v7 = vmax.f32 %v389_v60, %v628_v43  ;;  %v283_v14 = vmax.f32 %v256_v3, %v565_v56  ;;  %v150_v17 = vmax.f32 %v123_v5, %v502_v62  ;;  %v97_v26 = vmax.f32 %v70_v18, %v477_v11  ;;  %v17_v27 = vld [vmem:[%s1311_s0 + $0x48] sm:$0xff]  ;;  %v452_v28 = vld [vmem:[%s1311_s0 + $0xb0] sm:$0xff]  ;;  %v465_v29 = vld [vmem:[%s1311_s0 + $0x118] sm:$0xff] }
  0x29   :  { %v390_v23 = vmax.f32 %v363_v12, %v616_v2  ;;  %v604_v30 = vld [vmem:[%s1311_s0 + $0x570] sm:$0xff]  ;;  %v257_v31 = vmax.f32 %v230_v19, %v553_v16  ;;  %v541_v32 = vld [vmem:[%s1311_s0 + $0x378] sm:$0xff]  ;;  %v503_v33 = vld [vmem:[%s1311_s0 + $0x248] sm:$0xff]  ;;  %v44_v34 = vmax.f32 %v17_v27, %v452_v28 }
  0x2a   :  { %429 = vst [vmem:[%s1312_s1 + $0x18] sm:$0xff] %v416_v7  ;;  %v310_v24 = vmax.f32 %v283_v14, %v578_v8  ;;  %v177_v25 = vmax.f32 %v150_v17, %v515_v10  ;;  %v617_v37 = vld [vmem:[%s1311_s0 + $0x5d8] sm:$0xff]  ;;  %v579_v38 = vld [vmem:[%s1311_s0 + $0x4a8] sm:$0xff]  ;;  %v124_v40 = vmax.f32 %v97_v26, %v490_v22  ;;  %v478_v41 = vld [vmem:[%s1311_s0 + $0x180] sm:$0xff] }
  0x2b   :  { %v417_v35 = vmax.f32 %v390_v23, %v629_v13  ;;  %v630_v42 = vld [vmem:[%s1311_s0 + $0x640] sm:$0xff]  ;;  %v284_v43 = vmax.f32 %v257_v31, %v566_v20  ;;  %v592_v44 = vld [vmem:[%s1311_s0 + $0x510] sm:$0xff]  ;;  %v71_v47 = vmax.f32 %v44_v34, %v465_v29  ;;  %v605_v49 = vld [vmem:[%s1311_s0 + $0x578] sm:$0xff] }
  0x2c   :  { %v337_v36 = vmax.f32 %v310_v24, %v591_v15  ;;  %v204_v39 = vmax.f32 %v177_v25, %v528_v21  ;;  %v554_v45 = vld [vmem:[%s1311_s0 + $0x3e0] sm:$0xff]  ;;  %v516_v46 = vld [vmem:[%s1311_s0 + $0x2b0] sm:$0xff]  ;;  %v567_v51 = vld [vmem:[%s1311_s0 + $0x448] sm:$0xff]  ;;  %v151_v52 = vmax.f32 %v124_v40, %v503_v33 }
  0x2d   :  { %430 = vst [vmem:[%s1312_s1 + $0x20] sm:$0xff] %v417_v35  ;;  %v491_v53 = vld [vmem:[%s1311_s0 + $0x1e8] sm:$0xff]  ;;  %v311_v54 = vmax.f32 %v284_v43, %v579_v38  ;;  %v529_v55 = vld [vmem:[%s1311_s0 + $0x318] sm:$0xff]  ;;  %v98_v56 = vmax.f32 %v71_v47, %v478_v41  ;;  %v18_v57 = vld [vmem:[%s1311_s0 + $0x50] sm:$0xff] }
  0x2e   :  { %v364_v48 = vmax.f32 %v337_v36, %v604_v30  ;;  %v231_v50 = vmax.f32 %v204_v39, %v541_v32  ;;  %v453_v58 = vld [vmem:[%s1311_s0 + $0xb8] sm:$0xff]  ;;  %v618_v60 = vld [vmem:[%s1311_s0 + $0x5e0] sm:$0xff]  ;;  %v178_v62 = vmax.f32 %v151_v52, %v516_v46  ;;  %v504_v63 = vld [vmem:[%s1311_s0 + $0x250] sm:$0xff] }
  0x2f   :  { %v45_v0 = vmax.f32 %v18_v57, %v453_v58  ;;  %v466_v1 = vld [vmem:[%s1311_s0 + $0x120] sm:$0xff]  ;;  %v338_v2 = vmax.f32 %v311_v54, %v592_v44  ;;  %v580_v3 = vld [vmem:[%s1311_s0 + $0x4b0] sm:$0xff]  ;;  %v125_v5 = vmax.f32 %v98_v56, %v491_v53  ;;  %v479_v6 = vld [vmem:[%s1311_s0 + $0x188] sm:$0xff] }
  0x30   :  { %v391_v59 = vmax.f32 %v364_v48, %v617_v37  ;;  %v258_v61 = vmax.f32 %v231_v50, %v554_v45  ;;  %v542_v4 = vld [vmem:[%s1311_s0 + $0x380] sm:$0xff]  ;;  %v631_v8 = vld [vmem:[%s1311_s0 + $0x648] sm:$0xff]  ;;  %v593_v10 = vld [vmem:[%s1311_s0 + $0x518] sm:$0xff]  ;;  %v205_v11 = vmax.f32 %v178_v62, %v529_v55 }
  0x31   :  { %v517_v12 = vld [vmem:[%s1311_s0 + $0x2b8] sm:$0xff]  ;;  %v72_v13 = vmax.f32 %v45_v0, %v466_v1  ;;  %v365_v14 = vmax.f32 %v338_v2, %v605_v49  ;;  %v606_v15 = vld [vmem:[%s1311_s0 + $0x580] sm:$0xff]  ;;  %v555_v16 = vld [vmem:[%s1311_s0 + $0x3e8] sm:$0xff]  ;;  %v152_v17 = vmax.f32 %v125_v5, %v504_v63 }
  0x32   :  { %v418_v7 = vmax.f32 %v391_v59, %v630_v42  ;;  %v285_v9 = vmax.f32 %v258_v61, %v567_v51  ;;  %v492_v18 = vld [vmem:[%s1311_s0 + $0x1f0] sm:$0xff]  ;;  %v232_v20 = vmax.f32 %v205_v11, %v542_v4  ;;  %v530_v22 = vld [vmem:[%s1311_s0 + $0x320] sm:$0xff]  ;;  %v19_v24 = vld [vmem:[%s1311_s0 + $0x58] sm:$0xff] }
  0x33   :  { %v568_v21 = vld [vmem:[%s1311_s0 + $0x450] sm:$0xff]  ;;  %v99_v23 = vmax.f32 %v72_v13, %v479_v6  ;;  %v392_v25 = vmax.f32 %v365_v14, %v618_v60  ;;  %v179_v26 = vmax.f32 %v152_v17, %v517_v12  ;;  %v505_v27 = vld [vmem:[%s1311_s0 + $0x258] sm:$0xff]  ;;  %v454_v28 = vld [vmem:[%s1311_s0 + $0xc0] sm:$0xff] }
  0x34   :  { %431 = vst [vmem:[%s1312_s1 + $0x28] sm:$0xff] %v418_v7  ;;  %v312_v19 = vmax.f32 %v285_v9, %v580_v3  ;;  %v467_v29 = vld [vmem:[%s1311_s0 + $0x128] sm:$0xff]  ;;  %v259_v32 = vmax.f32 %v232_v20, %v555_v16  ;;  %v46_v35 = vmax.f32 %v19_v24, %v454_v28  ;;  %v581_v37 = vld [vmem:[%s1311_s0 + $0x4b8] sm:$0xff]  ;;  %v518_v39 = vld [vmem:[%s1311_s0 + $0x2c0] sm:$0xff] }
  0x35   :  { %v619_v31 = vld [vmem:[%s1311_s0 + $0x5e8] sm:$0xff]  ;;  %v126_v34 = vmax.f32 %v99_v23, %v492_v18  ;;  %v419_v36 = vmax.f32 %v392_v25, %v631_v8  ;;  %v206_v38 = vmax.f32 %v179_v26, %v530_v22  ;;  %v480_v40 = vld [vmem:[%s1311_s0 + $0x190] sm:$0xff]  ;;  %v594_v44 = vld [vmem:[%s1311_s0 + $0x520] sm:$0xff] }
  0x36   :  { %v339_v30 = vmax.f32 %v312_v19, %v593_v10  ;;  %v543_v33 = vld [vmem:[%s1311_s0 + $0x388] sm:$0xff]  ;;  %v632_v42 = vld [vmem:[%s1311_s0 + $0x650] sm:$0xff]  ;;  %v286_v43 = vmax.f32 %v259_v32, %v568_v21  ;;  %v73_v47 = vmax.f32 %v46_v35, %v467_v29  ;;  %v569_v49 = vld [vmem:[%s1311_s0 + $0x458] sm:$0xff] }
  0x37   :  { %v556_v45 = vld [vmem:[%s1311_s0 + $0x3f0] sm:$0xff]  ;;  %v153_v46 = vmax.f32 %v126_v34, %v505_v27  ;;  %432 = vst [vmem:[%s1312_s1 + $0x30] sm:$0xff] %v419_v36  ;;  %v233_v48 = vmax.f32 %v206_v38, %v543_v33  ;;  %v531_v50 = vld [vmem:[%s1311_s0 + $0x328] sm:$0xff]  ;;  %v493_v51 = vld [vmem:[%s1311_s0 + $0x1f8] sm:$0xff] }
  0x38   :  { %v366_v41 = vmax.f32 %v339_v30, %v606_v15  ;;  %v313_v53 = vmax.f32 %v286_v43, %v581_v37  ;;  %v100_v55 = vmax.f32 %v73_v47, %v480_v40  ;;  %v20_v56 = vld [vmem:[%s1311_s0 + $0x60] sm:$0x3]  ;;  %v455_v57 = vld [vmem:[%s1311_s0 + $0xc8] sm:$0x3]  ;;  %v468_v58 = vld [vmem:[%s1311_s0 + $0x130] sm:$0x3] }
  0x39   :  { %v180_v54 = vmax.f32 %v153_v46, %v518_v39  ;;  %v607_v59 = vld [vmem:[%s1311_s0 + $0x588] sm:$0xff]  ;;  %v260_v60 = vmax.f32 %v233_v48, %v556_v45  ;;  %v544_v61 = vld [vmem:[%s1311_s0 + $0x390] sm:$0xff]  ;;  %v506_v62 = vld [vmem:[%s1311_s0 + $0x260] sm:$0xff]  ;;  %v47_v63 = vmax.f32 %v20_v56, %v455_v57 }
  0x3a   :  { %v393_v52 = vmax.f32 %v366_v41, %v619_v31  ;;  %v340_v1 = vmax.f32 %v313_v53, %v594_v44  ;;  %v582_v2 = vld [vmem:[%s1311_s0 + $0x4c0] sm:$0xff]  ;;  %v127_v4 = vmax.f32 %v100_v55, %v493_v51  ;;  %v481_v5 = vld [vmem:[%s1311_s0 + $0x198] sm:$0x3]  ;;  %v620_v6 = vld [vmem:[%s1311_s0 + $0x5f0] sm:$0xff] }
  0x3b   :  { %v207_v3 = vmax.f32 %v180_v54, %v531_v50  ;;  %v287_v7 = vmax.f32 %v260_v60, %v569_v49  ;;  %v557_v8 = vld [vmem:[%s1311_s0 + $0x3f8] sm:$0xff]  ;;  %v519_v9 = vld [vmem:[%s1311_s0 + $0x2c8] sm:$0xff]  ;;  %v74_v10 = vmax.f32 %v47_v63, %v468_v58  ;;  %v494_v15 = vld [vmem:[%s1311_s0 + $0x200] sm:$0x3] }
  0x3c   :  { %v420_v0 = vmax.f32 %v393_v52, %v632_v42  ;;  %v367_v11 = vmax.f32 %v340_v1, %v607_v59  ;;  %v595_v12 = vld [vmem:[%s1311_s0 + $0x528] sm:$0xff]  ;;  %v154_v14 = vmax.f32 %v127_v4, %v506_v62  ;;  %v633_v16 = vld [vmem:[%s1311_s0 + $0x658] sm:$0xff]  ;;  %v570_v18 = vld [vmem:[%s1311_s0 + $0x460] sm:$0xff] }
  0x3d   :  { %v234_v13 = vmax.f32 %v207_v3, %v544_v61  ;;  %v314_v17 = vmax.f32 %v287_v7, %v582_v2  ;;  %v532_v19 = vld [vmem:[%s1311_s0 + $0x330] sm:$0xff]  ;;  %v101_v20 = vmax.f32 %v74_v10, %v481_v5  ;;  %v507_v25 = vld [vmem:[%s1311_s0 + $0x268] sm:$0x3]  ;;  %v545_v28 = vld [vmem:[%s1311_s0 + $0x398] sm:$0xff] }
  0x3e   :  { %433 = vst [vmem:[%s1312_s1 + $0x38] sm:$0xff] %v420_v0  ;;  %v394_v21 = vmax.f32 %v367_v11, %v620_v6  ;;  %v608_v22 = vld [vmem:[%s1311_s0 + $0x590] sm:$0xff]  ;;  %v181_v24 = vmax.f32 %v154_v14, %v519_v9  ;;  %v583_v27 = vld [vmem:[%s1311_s0 + $0x4c8] sm:$0xff]  ;;  %v621_v31 = vld [vmem:[%s1311_s0 + $0x5f8] sm:$0xff] }
  0x3f   :  { %v261_v23 = vmax.f32 %v234_v13, %v557_v8  ;;  %v341_v26 = vmax.f32 %v314_v17, %v595_v12  ;;  %v128_v29 = vmax.f32 %v101_v20, %v494_v15  ;;  %v520_v34 = vld [vmem:[%s1311_s0 + $0x2d0] sm:$0x3]  ;;  %v558_v37 = vld [vmem:[%s1311_s0 + $0x400] sm:$0xff]  ;;  %v533_v42 = vld [vmem:[%s1311_s0 + $0x338] sm:$0x3] }
  0x40   :  { %v421_v30 = vmax.f32 %v394_v21, %v633_v16  ;;  %v208_v33 = vmax.f32 %v181_v24, %v532_v19  ;;  %v596_v36 = vld [vmem:[%s1311_s0 + $0x530] sm:$0xff]  ;;  %v634_v39 = vld [vmem:[%s1311_s0 + $0x660] sm:$0xff]  ;;  %v609_v44 = vld [vmem:[%s1311_s0 + $0x598] sm:$0xff] }
  0x41   :  { %v288_v32 = vmax.f32 %v261_v23, %v570_v18  ;;  %v368_v35 = vmax.f32 %v341_v26, %v608_v22  ;;  %v155_v38 = vmax.f32 %v128_v29, %v507_v25  ;;  %v571_v45 = vld [vmem:[%s1311_s0 + $0x468] sm:$0xff]  ;;  %v546_v49 = vld [vmem:[%s1311_s0 + $0x3a0] sm:$0x3]  ;;  %v584_v52 = vld [vmem:[%s1311_s0 + $0x4d0] sm:$0xff] }
  0x42   :  { %434 = vst [vmem:[%s1312_s1 + $0x40] sm:$0xff] %v421_v30  ;;  %v235_v41 = vmax.f32 %v208_v33, %v545_v28  ;;  %v622_v51 = vld [vmem:[%s1311_s0 + $0x600] sm:$0xff]  ;;  %v559_v56 = vld [vmem:[%s1311_s0 + $0x408] sm:$0x3]  ;;  %v597_v58 = vld [vmem:[%s1311_s0 + $0x538] sm:$0xff] }
  0x43   :  { %v315_v40 = vmax.f32 %v288_v32, %v583_v27  ;;  %v395_v43 = vmax.f32 %v368_v35, %v621_v31  ;;  %v182_v46 = vmax.f32 %v155_v38, %v520_v34  ;;  %v635_v57 = vld [vmem:[%s1311_s0 + $0x668] sm:$0xff]  ;;  %v572_v62 = vld [vmem:[%s1311_s0 + $0x470] sm:$0x3]  ;;  %v610_v63 = vld [vmem:[%s1311_s0 + $0x5a0] sm:$0xff] }
  0x44   :  { %v262_v48 = vmax.f32 %v235_v41, %v558_v37  ;;  %v585_v3 = vld [vmem:[%s1311_s0 + $0x4d8] sm:$0x3]  ;;  %v623_v4 = vld [vmem:[%s1311_s0 + $0x608] sm:$0xff]  ;;  %v598_v7 = vld [vmem:[%s1311_s0 + $0x540] sm:$0x3] }
  0x45   :  { %v342_v47 = vmax.f32 %v315_v40, %v596_v36  ;;  %v422_v50 = vmax.f32 %v395_v43, %v634_v39  ;;  %v209_v53 = vmax.f32 %v182_v46, %v533_v42  ;;  %v636_v8 = vld [vmem:[%s1311_s0 + $0x670] sm:$0xff]  ;;  %v611_v11 = vld [vmem:[%s1311_s0 + $0x5a8] sm:$0x3]  ;;  %v637_v16 = vld [vmem:[%s1311_s0 + $0x678] sm:$0x3] }
  0x46   :  { %v289_v55 = vmax.f32 %v262_v48, %v571_v45  ;;  %v624_v14 = vld [vmem:[%s1311_s0 + $0x610] sm:$0x3] }
  0x47   :  { %v369_v54 = vmax.f32 %v342_v47, %v609_v44  ;;  %435 = vst [vmem:[%s1312_s1 + $0x48] sm:$0xff] %v422_v50  ;;  %v236_v59 = vmax.f32 %v209_v53, %v546_v49 }
  0x48   :  { %v316_v61 = vmax.f32 %v289_v55, %v584_v52 }
  0x49   :  { %v396_v60 = vmax.f32 %v369_v54, %v622_v51  ;;  %v263_v0 = vmax.f32 %v236_v59, %v559_v56 }
  0x4a   :  { %v343_v2 = vmax.f32 %v316_v61, %v597_v58 }
  0x4b   :  { %v423_v1 = vmax.f32 %v396_v60, %v635_v57  ;;  %v290_v5 = vmax.f32 %v263_v0, %v572_v62 }
  0x4c   :  { %v370_v6 = vmax.f32 %v343_v2, %v610_v63 }
  0x4d   :  { %436 = vst [vmem:[%s1312_s1 + $0x50] sm:$0xff] %v423_v1  ;;  %v317_v9 = vmax.f32 %v290_v5, %v585_v3 }
  0x4e   :  { %v397_v10 = vmax.f32 %v370_v6, %v623_v4 }
  0x4f   :  { %v344_v12 = vmax.f32 %v317_v9, %v598_v7 }
  0x50   :  { %v424_v13 = vmax.f32 %v397_v10, %v636_v8 }
  0x51   :  { %v371_v15 = vmax.f32 %v344_v12, %v611_v11 }
  0x52   :  { %437 = vst [vmem:[%s1312_s1 + $0x58] sm:$0xff] %v424_v13 }
  0x53   :  { %v398_v17 = vmax.f32 %v371_v15, %v624_v14 }
  0x55   :  { %v425_v18 = vmax.f32 %v398_v17, %v637_v16 }
  0x57   :  { %438 = vst [vmem:[%s1312_s1 + $0x60] sm:$0x3] %v425_v18 }

// kernel: herdr_forward.7
= control target key start
LH: loop header
LB: loop body
LE: loop exit
PB: predicated region body
PF: predicated region fallthrough
CT: control target
= control target key end

     0   :  { %v513_v3 = vmov 0.0|0.0   ;;  %vm514_vm0 = vmmov 0   ;;  %v515_v4 = vmov 0.0   ;;  %vm84_vm1 = vcmask 261120   ;;  %s802_s1 = inlined_call_operand.vmem [shape: f32[288,64], index: 1, kind: input, shape index: {}]   ;;  %s803_s0 = inlined_call_operand.vmem [shape: f32[72,288], index: 0, kind: input, shape index: {}]   ;;  %s804_s2 = inlined_call_operand.vmem [shape: f32[1,64], index: 2, kind: input, shape index: {}]   ;;  %s805_s3 = inlined_call_operand.vmem [shape: f32[72,64], index: 3, kind: output, shape index: {}]  }
   0x1   :  { %v57_v0 = vld [vmem:[%s802_s1 + $0x80] sm:$0xff]  ;;  %v58_v1 = vld [vmem:[%s802_s1 + $0x88] sm:$0xff]  ;;  %504 = vmatprep.subr.bf16.mxu1 %v513_v3  ;;  %445 = vmatprep.mubr.msk.f32.mxu1 %vm514_vm0, %v515_v4  ;;  %v59_v7 = vld [vmem:[%s802_s1 + $0x90] sm:$0xff]  ;;  %vm341_vm2 = vcmask 523264  }
   0x2   :  { %v41_v2 = vld [vmem:[%s802_s1] sm:$0xff]  ;;  %v472_v5 = vpack.c.bf16 %v58_v1, %v57_v0  ;;  %v42_v6 = vld [vmem:[%s802_s1 + $0x8] sm:$0xff]  ;;  %v60_v8 = vld [vmem:[%s802_s1 + $0x98] sm:$0xff] }
   0x3   :  { %v474_v9 = vpack.c.bf16 %v42_v6, %v41_v2  ;;  %v476_v10 = vpack.c.bf16 %v60_v8, %v59_v7  ;;  %v43_v11 = vld [vmem:[%s802_s1 + $0x10] sm:$0xff]  ;;  %v44_v12 = vld [vmem:[%s802_s1 + $0x18] sm:$0xff]  ;;  %v61_v13 = vld [vmem:[%s802_s1 + $0xa0] sm:$0xff] }
   0x4   :  { %473 = vmatprep.subr.bf16.mxu0 %v472_v5  ;;  %v62_v14 = vld [vmem:[%s802_s1 + $0xa8] sm:$0xff]  ;;  %v478_v15 = vpack.c.bf16 %v44_v12, %v43_v11  ;;  %v45_v17 = vld [vmem:[%s802_s1 + $0x20] sm:$0xff]  ;;  %v63_v19 = vld [vmem:[%s802_s1 + $0xb0] sm:$0xff] }
   0x5   :  { %475 = vmatpush3.bf16.msra.mxu0 %v474_v9  ;;  %v480_v16 = vpack.c.bf16 %v62_v14, %v61_v13  ;;  %v46_v18 = vld [vmem:[%s802_s1 + $0x28] sm:$0xff]  ;;  %v64_v20 = vld [vmem:[%s802_s1 + $0xb8] sm:$0xff]  ;;  %v47_v23 = vld [vmem:[%s802_s1 + $0x30] sm:$0xff] }
   0x6   :  { %477 = vmatprep.subr.bf16.mxu0 %v476_v10  ;;  %v482_v21 = vpack.c.bf16 %v46_v18, %v45_v17  ;;  %v484_v22 = vpack.c.bf16 %v64_v20, %v63_v19  ;;  %v48_v24 = vld [vmem:[%s802_s1 + $0x38] sm:$0xff]  ;;  %v65_v25 = vld [vmem:[%s802_s1 + $0xc0] sm:$0xff]  ;;  %v66_v26 = vld [vmem:[%s802_s1 + $0xc8] sm:$0xff] }
   0x7   :  { %v73_v27 = vld [vmem:[%s802_s1 + $0x100] sm:$0xff]  ;;  %v74_v28 = vld [vmem:[%s802_s1 + $0x108] sm:$0xff]  ;;  %v486_v30 = vpack.c.bf16 %v48_v24, %v47_v23  ;;  %v75_v32 = vld [vmem:[%s802_s1 + $0x110] sm:$0xff]  ;;  %v488_v34 = vpack.c.bf16 %v66_v26, %v65_v25 }
   0x8   :  { %v15_v29 = vld [vmem:[%s803_s0 + $0x8] sm:$0xff]  ;;  %v505_v31 = vpack.c.bf16 %v74_v28, %v73_v27  ;;  %v76_v33 = vld [vmem:[%s802_s1 + $0x118] sm:$0xff]  ;;  %v49_v35 = vld [vmem:[%s802_s1 + $0x40] sm:$0xff] }
   0x9   :  { %479 = vmatpush3.bf16.msra.mxu0 %v478_v15  ;;  %176 = vmatprep.mubr.f32.mxu0 %v15_v29  ;;  %v50_v36 = vld [vmem:[%s802_s1 + $0x48] sm:$0xff]  ;;  %v67_v37 = vld [vmem:[%s802_s1 + $0xd0] sm:$0xff]  ;;  %v68_v38 = vld [vmem:[%s802_s1 + $0xd8] sm:$0xff]  ;;  %v508_v39 = vpack.c.bf16 %v76_v33, %v75_v32 }
   0xa   :  { %481 = vmatprep.subr.bf16.mxu0 %v480_v16  ;;  %506 = vmatpush3.bf16.msra.mxu1 %v505_v31  ;;  %v490_v40 = vpack.c.bf16 %v50_v36, %v49_v35  ;;  %v492_v41 = vpack.c.bf16 %v68_v38, %v67_v37  ;;  %v51_v42 = vld [vmem:[%s802_s1 + $0x50] sm:$0xff]  ;;  %v52_v43 = vld [vmem:[%s802_s1 + $0x58] sm:$0xff]  ;;  %v69_v44 = vld [vmem:[%s802_s1 + $0xe0] sm:$0xff] }
   0xb   :  { %507 = vmatprep.subr.bf16.mxu1 %v513_v3  ;;  %v70_v45 = vld [vmem:[%s802_s1 + $0xe8] sm:$0xff]  ;;  %v16_v46 = vld [vmem:[%s803_s0 + $0x10] sm:$0xff]  ;;  %v494_v47 = vpack.c.bf16 %v52_v43, %v51_v42  ;;  %v53_v49 = vld [vmem:[%s802_s1 + $0x60] sm:$0xff] }
   0xc   :  { %v496_v48 = vpack.c.bf16 %v70_v45, %v69_v44  ;;  %v54_v50 = vld [vmem:[%s802_s1 + $0x68] sm:$0xff]  ;;  %v71_v51 = vld [vmem:[%s802_s1 + $0xf0] sm:$0xff]  ;;  %v72_v52 = vld [vmem:[%s802_s1 + $0xf8] sm:$0xff] }
   0xd   :  { %483 = vmatpush3.bf16.msra.mxu0 %v482_v21  ;;  %v19_v53 = vld [vmem:[%s803_s0 + $0x28] sm:$0xff]  ;;  %v498_v54 = vpack.c.bf16 %v54_v50, %v53_v49  ;;  %v500_v55 = vpack.c.bf16 %v72_v52, %v71_v51  ;;  %v55_v56 = vld [vmem:[%s802_s1 + $0x70] sm:$0xff]  ;;  %v56_v57 = vld [vmem:[%s802_s1 + $0x78] sm:$0xff] }
   0xe   :  { %485 = vmatprep.subr.bf16.mxu0 %v484_v22  ;;  %509 = vmatpush3.bf16.msra.mxu1 %v508_v39  ;;  %v22_v58 = vld [vmem:[%s803_s0 + $0x40] sm:$0xff]  ;;  %v502_v59 = vpack.c.bf16 %v56_v57, %v55_v56  ;;  %v25_v60 = vld [vmem:[%s803_s0 + $0x58] sm:$0xff]  ;;  %v28_v63 = vld [vmem:[%s803_s0 + $0x70] sm:$0xff] }
   0xf   :  { %v14_v61 = vld [vmem:[%s803_s0] sm:$0xff]  ;;  %v17_v0 = vld [vmem:[%s803_s0 + $0x18] sm:$0xff]  ;;  %v31_v2 = vld [vmem:[%s803_s0 + $0x88] sm:$0xff] }
  0x10   :  { %v18_v62 = vld [vmem:[%s803_s0 + $0x20] sm:$0xff]  ;;  %v21_v1 = vld [vmem:[%s803_s0 + $0x38] sm:$0xff]  ;;  %v20_v3 = vld [vmem:[%s803_s0 + $0x30] sm:$0xff] }
  0x11   :  { %487 = vmatpush3.bf16.msra.mxu0 %v486_v30  ;;  %446 = vmatmul.mubr.msk.f32.vlgmr.msra.gmra.mrb[0].mxu1 %vm84_vm1, %v16_v46  ;;  %v24_v5 = vld [vmem:[%s803_s0 + $0x50] sm:$0xff]  ;;  %v34_v6 = vld [vmem:[%s803_s0 + $0xa0] sm:$0xff]  ;;  %v23_v7 = vld [vmem:[%s803_s0 + $0x48] sm:$0xff] }
  0x12   :  { %489 = vmatprep.subr.bf16.mxu0 %v488_v34  ;;  %448 = vmatprep.mubr.msk.f32.mxu1 %vm514_vm0, %v515_v4  ;;  %v27_v8 = vld [vmem:[%s803_s0 + $0x68] sm:$0xff]  ;;  %v37_v9 = vld [vmem:[%s803_s0 + $0xb8] sm:$0xff]  ;;  %v26_v10 = vld [vmem:[%s803_s0 + $0x60] sm:$0xff] }
  0x13   :  { %v30_v11 = vld [vmem:[%s803_s0 + $0x80] sm:$0xff]  ;;  %v40_v12 = vld [vmem:[%s803_s0 + $0xd0] sm:$0xff]  ;;  %v29_v13 = vld [vmem:[%s803_s0 + $0x78] sm:$0xff] }
  0x14   :  { %v33_v14 = vld [vmem:[%s803_s0 + $0x98] sm:$0xff]  ;;  %v36_v15 = vld [vmem:[%s803_s0 + $0xb0] sm:$0xff]  ;;  %v35_v16 = vld [vmem:[%s803_s0 + $0xa8] sm:$0xff] }
  0x15   :  { %491 = vmatpush3.bf16.msra.mxu0 %v490_v40  ;;  %449 = vmatmul.mubr.msk.f32.gmra.mrb[2].mxu1 %vm84_vm1, %v19_v53  ;;  %v39_v17 = vld [vmem:[%s803_s0 + $0xc8] sm:$0xff]  ;;  %v38_v18 = vld [vmem:[%s803_s0 + $0xc0] sm:$0xff] }
  0x16   :  { %493 = vmatprep.subr.bf16.mxu0 %v492_v41  ;;  %451 = vmatprep.mubr.msk.f32.mxu1 %vm514_vm0, %v515_v4  ;;  %v755_v29 = vld [vmem:[%s804_s2] ss:$0 sm:$0xff] }
  0x19   :  { %495 = vmatpush3.bf16.msra.mxu0 %v494_v47  ;;  %452 = vmatmul.mubr.msk.f32.gmra.mrb[4].mxu1 %vm84_vm1, %v22_v58 }
  0x1a   :  { %497 = vmatprep.subr.bf16.mxu0 %v496_v48  ;;  %454 = vmatprep.mubr.msk.f32.mxu1 %vm514_vm0, %v515_v4 }
  0x1d   :  { %499 = vmatpush3.bf16.msra.mxu0 %v498_v54  ;;  %455 = vmatmul.mubr.msk.f32.gmra.mrb[6].mxu1 %vm84_vm1, %v25_v60 }
  0x1e   :  { %501 = vmatprep.subr.bf16.mxu0 %v500_v55  ;;  %457 = vmatprep.mubr.msk.f32.mxu1 %vm514_vm0, %v515_v4 }
  0x21   :  { %503 = vmatpush3.bf16.msra.mxu0 %v502_v59  ;;  %458 = vmatmul.mubr.msk.f32.gmra.mrb[8].mxu1 %vm84_vm1, %v28_v63 }
  0x22   :  { %460 = vmatprep.mubr.msk.f32.mxu1 %vm514_vm0, %v515_v4 }
  0x24   :  { %177 = vmatmul.mubr.f32.vlgmr.msra.gmra.mrb[0].mxu0 %v14_v61 }
  0x25   :  { %181 = vmatprep.mubr.f32.mxu0 %v18_v62  ;;  %461 = vmatmul.mubr.msk.f32.gmra.mrb[10].mxu1 %vm84_vm1, %v31_v2 }
  0x26   :  { %463 = vmatprep.mubr.msk.f32.mxu1 %vm514_vm0, %v515_v4 }
  0x28   :  { %182 = vmatmul.mubr.f32.gmra.mrb[2].mxu0 %v17_v0 }
  0x29   :  { %186 = vmatprep.mubr.f32.mxu0 %v21_v1  ;;  %464 = vmatmul.mubr.msk.f32.gmra.mrb[12].mxu1 %vm84_vm1, %v34_v6 }
  0x2a   :  { %466 = vmatprep.mubr.msk.f32.mxu1 %vm514_vm0, %v515_v4 }
  0x2c   :  { %187 = vmatmul.mubr.f32.gmra.mrb[4].mxu0 %v20_v3 }
  0x2d   :  { %191 = vmatprep.mubr.f32.mxu0 %v24_v5  ;;  %467 = vmatmul.mubr.msk.f32.gmra.mrb[14].mxu1 %vm84_vm1, %v37_v9 }
  0x2e   :  { %469 = vmatprep.mubr.msk.f32.mxu1 %vm514_vm0, %v515_v4  ;;  %v32_v4 = vld [vmem:[%s803_s0 + $0x90] sm:$0xff] }
  0x30   :  { %192 = vmatmul.mubr.f32.gmra.mrb[6].mxu0 %v23_v7 }
  0x31   :  { %196 = vmatprep.mubr.f32.mxu0 %v27_v8  ;;  %470 = vmatmul.mubr.msk.f32.gmra.mrb[16].mxu1 %vm84_vm1, %v40_v12 }
  0x34   :  { %197 = vmatmul.mubr.f32.gmra.mrb[8].mxu0 %v26_v10 }
  0x35   :  { %201 = vmatprep.mubr.f32.mxu0 %v30_v11 }
  0x38   :  { %202 = vmatmul.mubr.f32.gmra.mrb[10].mxu0 %v29_v13 }
  0x39   :  { %206 = vmatprep.mubr.f32.mxu0 %v33_v14 }
  0x3c   :  { %207 = vmatmul.mubr.f32.gmra.mrb[12].mxu0 %v32_v4 }
  0x3d   :  { %211 = vmatprep.mubr.f32.mxu0 %v36_v15 }
  0x40   :  { %212 = vmatmul.mubr.f32.gmra.mrb[14].mxu0 %v35_v16 }
  0x41   :  { %216 = vmatprep.mubr.f32.mxu0 %v39_v17 }
  0x44   :  { %217 = vmatmul.mubr.f32.gmra.mrb[16].mxu0 %v38_v18 }
  0xe4   :  { %v288_v19 = vpop.f32.mrb[0].mxu1 }
  0xe5   :  { %v447_v20 = vpop.f32.mrb[1].mxu1 }
  0xe8   :  { %v293_v21 = vpop.f32.mrb[2].mxu1 }
  0xe9   :  { %v450_v22 = vpop.f32.mrb[3].mxu1 }
  0xec   :  { %v298_v23 = vpop.f32.mrb[4].mxu1 }
  0xed   :  { %v453_v24 = vpop.f32.mrb[5].mxu1 }
  0xf0   :  { %v303_v25 = vpop.f32.mrb[6].mxu1 }
  0xf1   :  { %v456_v26 = vpop.f32.mrb[7].mxu1 }
  0xf4   :  { %v308_v31 = vpop.f32.mrb[8].mxu1 }
  0xf5   :  { %v459_v32 = vpop.f32.mrb[9].mxu1 }
  0xf7   :  { %v397_v27 = vpop.f32.mrb[0].mxu0 }
  0xf8   :  { %v398_v28 = vpop.f32.mrb[1].mxu0  ;;  %v313_v38 = vpop.f32.mrb[10].mxu1 }
  0xf9   :  { %v399_v30 = vadd.f32 %v398_v28, %v397_v27  ;;  %v462_v39 = vpop.f32.mrb[11].mxu1 }
  0xfb   :  { %v400_v33 = vpop.f32.mrb[2].mxu0  ;;  %v179_v34 = vadd.f32 %v399_v30, %v755_v29 }
  0xfc   :  { %v401_v35 = vpop.f32.mrb[3].mxu0  ;;  %v318_v46 = vpop.f32.mrb[12].mxu1 }
  0xfd   :  { %v289_v36 = vadd.f32 %v288_v19, %v179_v34  ;;  %v402_v37 = vadd.f32 %v401_v35, %v400_v33  ;;  %v465_v47 = vpop.f32.mrb[13].mxu1 }
  0xff   :  { %v332_v40 = vmax.f32 %v289_v36, 0.0  ;;  %v403_v41 = vpop.f32.mrb[4].mxu0  ;;  %v184_v42 = vadd.f32 %v402_v37, %v755_v29 }
 0x100   :  { %v404_v43 = vpop.f32.mrb[5].mxu0  ;;  %v323_v54 = vpop.f32.mrb[14].mxu1 }
 0x101   :  { %342 = vst.msk [vmem:[%s805_s3] sm:$0xff] %vm341_vm2, %v332_v40  ;;  %v294_v44 = vadd.f32 %v293_v21, %v184_v42  ;;  %v405_v45 = vadd.f32 %v404_v43, %v403_v41  ;;  %v468_v55 = vpop.f32.mrb[15].mxu1 }
 0x103   :  { %v333_v48 = vmax.f32 %v294_v44, 0.0  ;;  %v406_v49 = vpop.f32.mrb[6].mxu0  ;;  %v189_v50 = vadd.f32 %v405_v45, %v755_v29 }
 0x104   :  { %v407_v51 = vpop.f32.mrb[7].mxu0  ;;  %v328_v62 = vpop.f32.mrb[16].mxu1 }
 0x105   :  { %343 = vst.msk [vmem:[%s805_s3 + $0x8] sm:$0xff] %vm341_vm2, %v333_v48  ;;  %v299_v52 = vadd.f32 %v298_v23, %v189_v50  ;;  %v408_v53 = vadd.f32 %v407_v51, %v406_v49  ;;  %v471_v63 = vpop.f32.mrb[17].mxu1 }
 0x107   :  { %v334_v56 = vmax.f32 %v299_v52, 0.0  ;;  %v409_v57 = vpop.f32.mrb[8].mxu0  ;;  %v194_v58 = vadd.f32 %v408_v53, %v755_v29 }
 0x108   :  { %v410_v59 = vpop.f32.mrb[9].mxu0 }
 0x109   :  { %344 = vst.msk [vmem:[%s805_s3 + $0x10] sm:$0xff] %vm341_vm2, %v334_v56  ;;  %v304_v60 = vadd.f32 %v303_v25, %v194_v58  ;;  %v411_v61 = vadd.f32 %v410_v59, %v409_v57 }
 0x10b   :  { %v335_v0 = vmax.f32 %v304_v60, 0.0  ;;  %v412_v1 = vpop.f32.mrb[10].mxu0  ;;  %v199_v2 = vadd.f32 %v411_v61, %v755_v29 }
 0x10c   :  { %v413_v3 = vpop.f32.mrb[11].mxu0 }
 0x10d   :  { %345 = vst.msk [vmem:[%s805_s3 + $0x18] sm:$0xff] %vm341_vm2, %v335_v0  ;;  %v309_v5 = vadd.f32 %v308_v31, %v199_v2  ;;  %v414_v6 = vadd.f32 %v413_v3, %v412_v1 }
 0x10f   :  { %v336_v7 = vmax.f32 %v309_v5, 0.0  ;;  %v415_v8 = vpop.f32.mrb[12].mxu0  ;;  %v204_v9 = vadd.f32 %v414_v6, %v755_v29 }
 0x110   :  { %v416_v10 = vpop.f32.mrb[13].mxu0 }
 0x111   :  { %346 = vst.msk [vmem:[%s805_s3 + $0x20] sm:$0xff] %vm341_vm2, %v336_v7  ;;  %v314_v11 = vadd.f32 %v313_v38, %v204_v9  ;;  %v417_v12 = vadd.f32 %v416_v10, %v415_v8 }
 0x113   :  { %v337_v13 = vmax.f32 %v314_v11, 0.0  ;;  %v418_v14 = vpop.f32.mrb[14].mxu0  ;;  %v209_v4 = vadd.f32 %v417_v12, %v755_v29 }
 0x114   :  { %v419_v15 = vpop.f32.mrb[15].mxu0 }
 0x115   :  { %347 = vst.msk [vmem:[%s805_s3 + $0x28] sm:$0xff] %vm341_vm2, %v337_v13  ;;  %v319_v16 = vadd.f32 %v318_v46, %v209_v4  ;;  %v420_v17 = vadd.f32 %v419_v15, %v418_v14 }
 0x117   :  { %v338_v18 = vmax.f32 %v319_v16, 0.0  ;;  %v421_v19 = vpop.f32.mrb[16].mxu0  ;;  %v214_v20 = vadd.f32 %v420_v17, %v755_v29 }
 0x118   :  { %v422_v21 = vpop.f32.mrb[17].mxu0 }
 0x119   :  { %348 = vst.msk [vmem:[%s805_s3 + $0x30] sm:$0xff] %vm341_vm2, %v338_v18  ;;  %v324_v22 = vadd.f32 %v323_v54, %v214_v20  ;;  %v423_v23 = vadd.f32 %v422_v21, %v421_v19 }
 0x11b   :  { %v339_v24 = vmax.f32 %v324_v22, 0.0  ;;  %v219_v25 = vadd.f32 %v423_v23, %v755_v29 }
 0x11d   :  { %349 = vst.msk [vmem:[%s805_s3 + $0x38] sm:$0xff] %vm341_vm2, %v339_v24  ;;  %v329_v26 = vadd.f32 %v328_v62, %v219_v25 }
 0x11f   :  { %v340_v27 = vmax.f32 %v329_v26, 0.0 }
 0x121   :  { %350 = vst.msk [vmem:[%s805_s3 + $0x40] sm:$0xff] %vm341_vm2, %v340_v27 }

// kernel: herdr_forward.8
= control target key start
LH: loop header
LB: loop body
LE: loop exit
PB: predicated region body
PF: predicated region fallthrough
CT: control target
= control target key end

     0   :  { %s77_s0 = inlined_call_operand.vmem [shape: f32[4,9,128], index: 0, kind: input, shape index: {}]   ;;  %s78_s1 = inlined_call_operand.vmem [shape: f32[9,128], index: 1, kind: output, shape index: {}]  }
   0x1   :  { %v8_v0 = vld [vmem:[%s77_s0] sm:$0xff]  ;;  %v31_v1 = vld [vmem:[%s77_s0 + $0x10] sm:$0xff]  ;;  %v9_v4 = vld [vmem:[%s77_s0 + $0x8] sm:$0x1] }
   0x2   :  { %v33_v2 = vld [vmem:[%s77_s0 + $0x20] sm:$0xff]  ;;  %v13_v3 = vmax.f32 %v8_v0, %v31_v1  ;;  %v32_v5 = vld [vmem:[%s77_s0 + $0x18] sm:$0x1]  ;;  %v35_v6 = vld [vmem:[%s77_s0 + $0x30] sm:$0xff] }
   0x3   :  { %v14_v7 = vmax.f32 %v9_v4, %v32_v5  ;;  %v34_v8 = vld [vmem:[%s77_s0 + $0x28] sm:$0x1]  ;;  %v36_v10 = vld [vmem:[%s77_s0 + $0x38] sm:$0x1] }
   0x4   :  { %v18_v9 = vmax.f32 %v13_v3, %v33_v2 }
   0x5   :  { %v19_v11 = vmax.f32 %v14_v7, %v34_v8 }
   0x6   :  { %v23_v12 = vmax.f32 %v18_v9, %v35_v6 }
   0x7   :  { %v24_v13 = vmax.f32 %v19_v11, %v36_v10 }
   0x8   :  { %25 = vst [vmem:[%s78_s1] sm:$0xff] %v23_v12 }
   0x9   :  { %26 = vst [vmem:[%s78_s1 + $0x8] sm:$0x1] %v24_v13 }

// kernel: herdr_forward.9
= control target key start
LH: loop header
LB: loop body
LE: loop exit
PB: predicated region body
PF: predicated region fallthrough
CT: control target
= control target key end

     0   :  { %vm187_vm0 = vcmask 523264   ;;  %v3343_v7 = vmov 0.0   ;;  %v3344_v44 = vmov 1983009808   ;;  %v163_v46 = vlaneseq  ;;  %s4426_s2 = inlined_call_operand.vmem [shape: f32[576,64], index: 2, kind: input, shape index: {}]   ;;  %s4427_s0 = inlined_call_operand.vmem [shape: f32[2,576], index: 0, kind: input, shape index: {}]   ;;  %s4428_s4 = inlined_call_operand.vmem [shape: f32[64,256], index: 4, kind: input, shape index: {}]   ;;  %s4429_s6 = inlined_call_operand.vmem [shape: f32[256,128], index: 6, kind: input, shape index: {}]   ;;  %s4430_s3 = inlined_call_operand.vmem [shape: f32[1,64], index: 3, kind: input, shape index: {}]   ;;  %s4431_s8 = inlined_call_operand.vmem [shape: f32[128,128], index: 8, kind: input, shape index: {}]   ;;  %s4432_s5 = inlined_call_operand.vmem [shape: f32[1,256], index: 5, kind: input, shape index: {}]   ;;  %s4433_s12 = inlined_call_operand.vmem [shape: f32[2,16], index: 12, kind: input, shape index: {}]   ;;  %s4434_s10 = inlined_call_operand.vmem [shape: f32[128,128], index: 10, kind: input, shape index: {}]   ;;  %s4435_s7 = inlined_call_operand.vmem [shape: f32[1,128], index: 7, kind: input, shape index: {}]   ;;  %s4436_s14 = inlined_call_operand.vmem [shape: f32[16,16], index: 14, kind: input, shape index: {}]   ;;  %s4437_s1 = inlined_call_operand.vmem [shape: f32[64,2], index: 1, kind: input, shape index: {}]   ;;  %s4438_s18 = inlined_call_operand.vmem [shape: f32[64,256], index: 18, kind: input, shape index: {}]   ;;  %s4439_s9 = inlined_call_operand.vmem [shape: f32[1,128], index: 9, kind: input, shape index: {}]   ;;  %s4440_s13 = inlined_call_operand.vmem [shape: f32[1,16], index: 13, kind: input, shape index: {}]   ;;  %s4441_s16 = inlined_call_operand.vmem [shape: f32[16,256], index: 16, kind: input, shape index: {}]   ;;  %s4442_s11 = inlined_call_operand.vmem [shape: f32[1,128], index: 11, kind: input, shape index: {}]   ;;  %s4443_s15 = inlined_call_operand.vmem [shape: f32[1,16], index: 15, kind: input, shape index: {}]   ;;  %s4444_s17 = inlined_call_operand.vmem [shape: f32[1,256], index: 17, kind: input, shape index: {}]   ;;  %s4445_s19 = inlined_call_operand.vmem [shape: f32[64,32], index: 19, kind: input, shape index: {}]   ;;  %s4446_s21 = inlined_call_operand.vmem [shape: f32[32,1], index: 21, kind: input, shape index: {}]   ;;  %s4447_s20 = inlined_call_operand.vmem [shape: f32[1,32], index: 20, kind: input, shape index: {}]   ;;  %s4448_s22 = inlined_call_operand.<no memory space> [shape: f32[1,1], index: 22, kind: input, shape index: {}]   ;;  %s4449_s23 = inlined_call_operand.vmem [shape: f32[64,1], index: 23, kind: output, shape index: {}]  }
   0x1   :  { %4455 = sst [smem:[#allocation5_spill]] %s4426_s2  ;;  %1267 = vst.msk [vmem:[#allocation3] sm:$0xff] %vm187_vm0, %v3343_v7  ;;  %1268 = vst.msk [vmem:[#allocation3 + $0x8] sm:$0xff] %vm187_vm0, %v3343_v7  ;;  %v161_v45 = vunpack.c.l.s4 %v3344_v44  ;;  %vm3346_vm1 = vmmov 0   ;;  %vm842_vm2 = vcmask 1041408   ;;  %vm817_vm3 = vcmask 15360  }
   0x2   :  { %4456 = sst [smem:[#allocation6_spill]] %s4427_s0  ;;  %s4463_s24 = sld [smem:[#allocation5_spill]]  ;;  %1269 = vst.msk [vmem:[#allocation3 + $0x10] sm:$0xff] %vm187_vm0, %v3343_v7  ;;  %1270 = vst.msk [vmem:[#allocation3 + $0x18] sm:$0xff] %vm187_vm0, %v3343_v7  ;;  %v3601_v61 = vshrl.u32 %v163_v46, 7  ;;  %vm968_vm4 = vcmask 130048  }
   0x3   :  { %4457 = sst [smem:[#allocation7_spill]] %s4428_s4  ;;  %1271 = vst.msk [vmem:[#allocation3 + $0x20] sm:$0xff] %vm187_vm0, %v3343_v7  ;;  %1272 = vst.msk [vmem:[#allocation3 + $0x28] sm:$0xff] %vm187_vm0, %v3343_v7  ;;  %v162_v60 = vunpack.c.0.s8 %v161_v45  ;;  %s4464_s27 = sld [smem:[#allocation6_spill]]  ;;  %vm1391_vm5 = vcmask 517120   ;;  %vm2376_vm6 = vcmask 261120  }
   0x4   :  { %4458 = sst [smem:[#allocation8_spill]] %s4429_s6  ;;  %1273 = vst.msk [vmem:[#allocation3 + $0x30] sm:$0xff] %vm187_vm0, %v3343_v7  ;;  %1274 = vst.msk [vmem:[#allocation3 + $0x38] sm:$0xff] %vm187_vm0, %v3343_v7  ;;  %vm2506_vm7 = vcmask 7168  }
   0x5   :  { %4459 = sst [smem:[#allocation9_spill]] %s4430_s3  ;;  %s4465_s3 = sld [smem:[#allocation7_spill]] }
   0x6   :  { %4460 = sst [smem:[#allocation10_spill]] %s4431_s8  ;;  %s4466_s0 = sld [smem:[#allocation8_spill]] }
   0x7   :  { %4461 = sst [smem:[#allocation11_spill]] %s4432_s5  ;;  %s4467_s30 = sld [smem:[#allocation9_spill]] }
   0x8   :  { %4462 = sst [smem:[#allocation12_spill]] %s4433_s12  ;;  %v94_v0 = vld [vmem:[%s4463_s24 + $0x80] sm:$0xff]  ;;  %v95_v1 = vld [vmem:[%s4463_s24 + $0x88] sm:$0xff]  ;;  %v96_v12 = vld [vmem:[%s4463_s24 + $0x90] sm:$0xff]  ;;  %s4468_s25 = sld [smem:[#allocation10_spill]] }
   0x9   :  { %v78_v2 = vld [vmem:[%s4463_s24] sm:$0xff]  ;;  %v2941_v3 = vpack.c.bf16 %v95_v1, %v94_v0  ;;  %v79_v4 = vld [vmem:[%s4463_s24 + $0x8] sm:$0xff]  ;;  %v97_v14 = vld [vmem:[%s4463_s24 + $0x98] sm:$0xff]  ;;  %s4470_s12 = sld [smem:[#allocation12_spill]] }
   0xa   :  { %v126_v5 = vld [vmem:[%s4463_s24 + $0x180] sm:$0xff]  ;;  %v127_v6 = vld [vmem:[%s4463_s24 + $0x188] sm:$0xff]  ;;  %v2943_v8 = vpack.c.bf16 %v79_v4, %v78_v2  ;;  %v80_v15 = vld [vmem:[%s4463_s24 + $0x10] sm:$0xff]  ;;  %v2945_v17 = vpack.c.bf16 %v97_v14, %v96_v12  ;;  %v165_v12 = vsub.s32 %v162_v60, %v3601_v61 }
   0xb   :  { %v2973_v9 = vpack.c.bf16 %v127_v6, %v126_v5  ;;  %v110_v10 = vld [vmem:[%s4463_s24 + $0x100] sm:$0xff]  ;;  %v111_v11 = vld [vmem:[%s4463_s24 + $0x108] sm:$0xff]  ;;  %2942 = vmatprep.subr.bf16.mxu0 %v2941_v3  ;;  %v81_v16 = vld [vmem:[%s4463_s24 + $0x18] sm:$0xff] }
   0xc   :  { %v2975_v13 = vpack.c.bf16 %v111_v11, %v110_v10  ;;  %2944 = vmatpush3.bf16.msra.mxu0 %v2943_v8  ;;  %v2947_v18 = vpack.c.bf16 %v81_v16, %v80_v15  ;;  %v128_v19 = vld [vmem:[%s4463_s24 + $0x190] sm:$0xff]  ;;  %v129_v20 = vld [vmem:[%s4463_s24 + $0x198] sm:$0xff]  ;;  %v98_v24 = vld [vmem:[%s4463_s24 + $0xa0] sm:$0xff] }
   0xd   :  { %2974 = vmatprep.subr.bf16.mxu1 %v2973_v9  ;;  %v112_v21 = vld [vmem:[%s4463_s24 + $0x110] sm:$0xff]  ;;  %v2977_v22 = vpack.c.bf16 %v129_v20, %v128_v19  ;;  %v113_v23 = vld [vmem:[%s4463_s24 + $0x118] sm:$0xff]  ;;  %v99_v25 = vld [vmem:[%s4463_s24 + $0xa8] sm:$0xff]  ;;  %2946 = vmatprep.subr.bf16.mxu0 %v2945_v17 }
   0xe   :  { %2976 = vmatpush3.bf16.msra.mxu1 %v2975_v13  ;;  %v2979_v26 = vpack.c.bf16 %v113_v23, %v112_v21  ;;  %v2949_v27 = vpack.c.bf16 %v99_v25, %v98_v24  ;;  %v82_v28 = vld [vmem:[%s4463_s24 + $0x20] sm:$0xff]  ;;  %v83_v29 = vld [vmem:[%s4463_s24 + $0x28] sm:$0xff]  ;;  %v100_v36 = vld [vmem:[%s4463_s24 + $0xb0] sm:$0xff] }
   0xf   :  { %v130_v30 = vld [vmem:[%s4463_s24 + $0x1a0] sm:$0xff]  ;;  %2978 = vmatprep.subr.bf16.mxu1 %v2977_v22  ;;  %v131_v31 = vld [vmem:[%s4463_s24 + $0x1a8] sm:$0xff]  ;;  %v2951_v34 = vpack.c.bf16 %v83_v29, %v82_v28  ;;  %v101_v37 = vld [vmem:[%s4463_s24 + $0xb8] sm:$0xff] }
  0x10   :  { %v114_v32 = vld [vmem:[%s4463_s24 + $0x120] sm:$0xff]  ;;  %v115_v33 = vld [vmem:[%s4463_s24 + $0x128] sm:$0xff]  ;;  %2948 = vmatpush3.bf16.msra.mxu0 %v2947_v18  ;;  %v2981_v35 = vpack.c.bf16 %v131_v31, %v130_v30  ;;  %v84_v38 = vld [vmem:[%s4463_s24 + $0x30] sm:$0xff]  ;;  %v2953_v40 = vpack.c.bf16 %v101_v37, %v100_v36 }
  0x11   :  { %2950 = vmatprep.subr.bf16.mxu0 %v2949_v27  ;;  %v2983_v39 = vpack.c.bf16 %v115_v33, %v114_v32  ;;  %v85_v41 = vld [vmem:[%s4463_s24 + $0x38] sm:$0xff]  ;;  %v132_v42 = vld [vmem:[%s4463_s24 + $0x1b0] sm:$0xff]  ;;  %v102_v50 = vld [vmem:[%s4463_s24 + $0xc0] sm:$0xff] }
  0x12   :  { %2980 = vmatpush3.bf16.msra.mxu1 %v2979_v26  ;;  %v133_v43 = vld [vmem:[%s4463_s24 + $0x1b8] sm:$0xff]  ;;  %v116_v48 = vld [vmem:[%s4463_s24 + $0x130] sm:$0xff]  ;;  %v103_v51 = vld [vmem:[%s4463_s24 + $0xc8] sm:$0xff]  ;;  %v2955_v52 = vpack.c.bf16 %v85_v41, %v84_v38 }
  0x13   :  { %2982 = vmatprep.subr.bf16.mxu1 %v2981_v35  ;;  %v2985_v47 = vpack.c.bf16 %v133_v43, %v132_v42  ;;  %v117_v49 = vld [vmem:[%s4463_s24 + $0x138] sm:$0xff]  ;;  %v134_v53 = vld [vmem:[%s4463_s24 + $0x1c0] sm:$0xff]  ;;  %v135_v54 = vld [vmem:[%s4463_s24 + $0x1c8] sm:$0xff]  ;;  %v2957_v56 = vpack.c.bf16 %v103_v51, %v102_v50 }
  0x14   :  { %2952 = vmatpush3.bf16.msra.mxu0 %v2951_v34  ;;  %v2987_v55 = vpack.c.bf16 %v117_v49, %v116_v48  ;;  %v86_v57 = vld [vmem:[%s4463_s24 + $0x40] sm:$0xff]  ;;  %v87_v58 = vld [vmem:[%s4463_s24 + $0x48] sm:$0xff]  ;;  %v2989_v62 = vpack.c.bf16 %v135_v54, %v134_v53  ;;  %v104_v0 = vld [vmem:[%s4463_s24 + $0xd0] sm:$0xff]  ;;  %v3345_v49 = vmov 0.0|0.0  }
  0x15   :  { %2954 = vmatprep.subr.bf16.mxu0 %v2953_v40  ;;  %v118_v59 = vld [vmem:[%s4463_s24 + $0x140] sm:$0xff]  ;;  %v119_v63 = vld [vmem:[%s4463_s24 + $0x148] sm:$0xff]  ;;  %v105_v1 = vld [vmem:[%s4463_s24 + $0xd8] sm:$0xff]  ;;  %v2959_v4 = vpack.c.bf16 %v87_v58, %v86_v57 }
  0x16   :  { %2984 = vmatpush3.bf16.msra.mxu1 %v2983_v39  ;;  %v136_v2 = vld [vmem:[%s4463_s24 + $0x1d0] sm:$0xff]  ;;  %v137_v3 = vld [vmem:[%s4463_s24 + $0x1d8] sm:$0xff]  ;;  %v2991_v6 = vpack.c.bf16 %v119_v63, %v118_v59  ;;  %v2961_v8 = vpack.c.bf16 %v105_v1, %v104_v0  ;;  %v106_v14 = vld [vmem:[%s4463_s24 + $0xe0] sm:$0xff] }
  0x17   :  { %2986 = vmatprep.subr.bf16.mxu1 %v2985_v47  ;;  %v88_v5 = vld [vmem:[%s4463_s24 + $0x50] sm:$0xff]  ;;  %v89_v9 = vld [vmem:[%s4463_s24 + $0x58] sm:$0xff]  ;;  %v2993_v13 = vpack.c.bf16 %v137_v3, %v136_v2  ;;  %v107_v15 = vld [vmem:[%s4463_s24 + $0xe8] sm:$0xff] }
  0x18   :  { %2956 = vmatpush3.bf16.msra.mxu0 %v2955_v52  ;;  %v120_v10 = vld [vmem:[%s4463_s24 + $0x150] sm:$0xff]  ;;  %v121_v11 = vld [vmem:[%s4463_s24 + $0x158] sm:$0xff]  ;;  %v138_v16 = vld [vmem:[%s4463_s24 + $0x1e0] sm:$0xff]  ;;  %v2963_v18 = vpack.c.bf16 %v89_v9, %v88_v5  ;;  %v2965_v21 = vpack.c.bf16 %v107_v15, %v106_v14 }
  0x19   :  { %2958 = vmatprep.subr.bf16.mxu0 %v2957_v56  ;;  %v139_v17 = vld [vmem:[%s4463_s24 + $0x1e8] sm:$0xff]  ;;  %v2995_v19 = vpack.c.bf16 %v121_v11, %v120_v10  ;;  %v76_v20 = vld [vmem:[%s4464_s27] sm:$0xff]  ;;  %v108_v29 = vld [vmem:[%s4463_s24 + $0xf0] sm:$0xff] }
  0x1a   :  { %2988 = vmatpush3.bf16.msra.mxu1 %v2987_v55  ;;  %v90_v22 = vld [vmem:[%s4463_s24 + $0x60] sm:$0xff]  ;;  %v91_v23 = vld [vmem:[%s4463_s24 + $0x68] sm:$0xff]  ;;  %v166_v25 = vrot.slane %v76_v20, %v165_v12  ;;  %v159_v26 = vcombine.high %v76_v20, %v76_v20  ;;  %v2997_v27 = vpack.c.bf16 %v139_v17, %v138_v16  ;;  %v109_v30 = vld [vmem:[%s4463_s24 + $0xf8] sm:$0xff] }
  0x1b   :  { %2990 = vmatprep.subr.bf16.mxu1 %v2989_v62  ;;  %v122_v24 = vld [vmem:[%s4463_s24 + $0x160] sm:$0xff]  ;;  %v123_v28 = vld [vmem:[%s4463_s24 + $0x168] sm:$0xff]  ;;  %v140_v31 = vld [vmem:[%s4463_s24 + $0x1f0] sm:$0xff]  ;;  %v2967_v35 = vpack.c.bf16 %v91_v23, %v90_v22  ;;  %v2969_v37 = vpack.c.bf16 %v109_v30, %v108_v29 }
  0x1c   :  { %2960 = vmatpush3.bf16.msra.mxu0 %v2959_v4  ;;  %v141_v32 = vld [vmem:[%s4463_s24 + $0x1f8] sm:$0xff]  ;;  %v174_v33 = vcombine.high %v166_v25, %v166_v25  ;;  %v173_v34 = vrot.slane %v159_v26, %v165_v12  ;;  %v2999_v36 = vpack.c.bf16 %v123_v28, %v122_v24  ;;  %v92_v38 = vld [vmem:[%s4463_s24 + $0x70] sm:$0xff]  ;;  %v142_v46 = vld [vmem:[%s4463_s24 + $0x200] sm:$0xff] }
  0x1d   :  { %2962 = vmatprep.subr.bf16.mxu0 %v2961_v8  ;;  %v93_v39 = vld [vmem:[%s4463_s24 + $0x78] sm:$0xff]  ;;  %v3001_v41 = vpack.c.bf16 %v141_v32, %v140_v31  ;;  %v124_v42 = vld [vmem:[%s4463_s24 + $0x170] sm:$0xff]  ;;  %v143_v47 = vld [vmem:[%s4463_s24 + $0x208] sm:$0xff] }
  0x1e   :  { %2992 = vmatpush3.bf16.msra.mxu1 %v2991_v6  ;;  %v175_v40 = vcombine.high %v173_v34, %v173_v34  ;;  %254 = vmatprep.mubr.f32.mxu0 %v174_v33  ;;  %v125_v43 = vld [vmem:[%s4463_s24 + $0x178] sm:$0xff]  ;;  %v2971_v44 = vpack.c.bf16 %v93_v39, %v92_v38  ;;  %v3006_v48 = vpack.c.bf16 %v143_v47, %v142_v46  ;;  %v144_v50 = vld [vmem:[%s4463_s24 + $0x210] sm:$0xff]  ;;  %v146_v53 = vld [vmem:[%s4463_s24 + $0x220] sm:$0xff] }
  0x1f   :  { %2994 = vmatprep.subr.bf16.mxu1 %v2993_v13  ;;  %v3003_v45 = vpack.c.bf16 %v125_v43, %v124_v42  ;;  %v145_v51 = vld [vmem:[%s4463_s24 + $0x218] sm:$0xff]  ;;  %v147_v54 = vld [vmem:[%s4463_s24 + $0x228] sm:$0xff]  ;;  %v148_v56 = vld [vmem:[%s4463_s24 + $0x230] sm:$0xff] }
  0x20   :  { %2964 = vmatpush3.bf16.msra.mxu0 %v2963_v18  ;;  %324 = vmatprep.mubr.f32.mxu1 %v175_v40  ;;  %v3009_v52 = vpack.c.bf16 %v145_v51, %v144_v50  ;;  %v3012_v55 = vpack.c.bf16 %v147_v54, %v146_v53  ;;  %v149_v57 = vld [vmem:[%s4463_s24 + $0x238] sm:$0xff]  ;;  %v2520_v59 = vld.sshfl [vmem:[%s4464_s27 + $0x8] sm:$0x3 pattern:$0x76325410]  ;;  %v401_v0 = vld [vmem:[%s4465_s3] sm:$0xff] }
  0x21   :  { %2966 = vmatprep.subr.bf16.mxu0 %v2965_v21  ;;  %v3015_v58 = vpack.c.bf16 %v149_v57, %v148_v56  ;;  %v402_v60 = vld [vmem:[%s4465_s3 + $0x8] sm:$0xff]  ;;  %v404_v62 = vld [vmem:[%s4465_s3 + $0x18] sm:$0xff]  ;;  %v403_v1 = vld [vmem:[%s4465_s3 + $0x10] sm:$0xff]  ;;  %s4469_s24 = sld [smem:[#allocation11_spill]] }
  0x22   :  { %2996 = vmatpush3.bf16.msra.mxu1 %v2995_v19  ;;  %v3017_v63 = vpack.c.bf16 %v404_v62, %v402_v60  ;;  %v3019_v2 = vpack.c.bf16 %v403_v1, %v401_v0  ;;  %v406_v3 = vld [vmem:[%s4465_s3 + $0x28] sm:$0xff]  ;;  %v408_v4 = vld [vmem:[%s4465_s3 + $0x38] sm:$0xff]  ;;  %v405_v5 = vld [vmem:[%s4465_s3 + $0x20] sm:$0xff] }
  0x23   :  { %2998 = vmatprep.subr.bf16.mxu1 %v2997_v27  ;;  %v3021_v6 = vpack.c.bf16 %v408_v4, %v406_v3  ;;  %v407_v8 = vld [vmem:[%s4465_s3 + $0x30] sm:$0xff]  ;;  %v410_v9 = vld [vmem:[%s4465_s3 + $0x48] sm:$0xff]  ;;  %v412_v10 = vld [vmem:[%s4465_s3 + $0x58] sm:$0xff] }
  0x24   :  { %2968 = vmatpush3.bf16.msra.mxu0 %v2967_v35  ;;  %v3023_v11 = vpack.c.bf16 %v407_v8, %v405_v5  ;;  %v3025_v12 = vpack.c.bf16 %v412_v10, %v410_v9  ;;  %v409_v13 = vld [vmem:[%s4465_s3 + $0x40] sm:$0xff]  ;;  %v411_v14 = vld [vmem:[%s4465_s3 + $0x50] sm:$0xff]  ;;  %v414_v16 = vld [vmem:[%s4465_s3 + $0x68] sm:$0xff] }
  0x25   :  { %2970 = vmatprep.subr.bf16.mxu0 %v2969_v37  ;;  %v3027_v15 = vpack.c.bf16 %v411_v14, %v409_v13  ;;  %v416_v17 = vld [vmem:[%s4465_s3 + $0x78] sm:$0xff]  ;;  %v413_v19 = vld [vmem:[%s4465_s3 + $0x60] sm:$0xff]  ;;  %v415_v20 = vld [vmem:[%s4465_s3 + $0x70] sm:$0xff] }
  0x26   :  { %3000 = vmatpush3.bf16.msra.mxu1 %v2999_v36  ;;  %v3029_v18 = vpack.c.bf16 %v416_v17, %v414_v16  ;;  %v3031_v21 = vpack.c.bf16 %v415_v20, %v413_v19  ;;  %v521_v22 = vld [vmem:[%s4466_s0 + $0x80] sm:$0xff]  ;;  %v522_v23 = vld [vmem:[%s4466_s0 + $0x88] sm:$0xff]  ;;  %v523_v27 = vld [vmem:[%s4466_s0 + $0x90] sm:$0xff] }
  0x27   :  { %3002 = vmatprep.subr.bf16.mxu1 %v3001_v41  ;;  %v505_v24 = vld [vmem:[%s4466_s0] sm:$0xff]  ;;  %v506_v26 = vld [vmem:[%s4466_s0 + $0x8] sm:$0xff]  ;;  %v524_v28 = vld [vmem:[%s4466_s0 + $0x98] sm:$0xff] }
  0x28   :  { %2972 = vmatpush3.bf16.msra.mxu0 %v2971_v44  ;;  %v3035_v29 = vpack.c.bf16 %v506_v26, %v505_v24  ;;  %v3037_v30 = vpack.c.bf16 %v524_v28, %v523_v27  ;;  %v507_v31 = vld [vmem:[%s4466_s0 + $0x10] sm:$0xff]  ;;  %v508_v32 = vld [vmem:[%s4466_s0 + $0x18] sm:$0xff]  ;;  %v525_v33 = vld [vmem:[%s4466_s0 + $0xa0] sm:$0xff] }
  0x29   :  { %3005 = vmatprep.subr.bf16.mxu0 %v3345_v49  ;;  %v3039_v35 = vpack.c.bf16 %v508_v32, %v507_v31  ;;  %v509_v37 = vld [vmem:[%s4466_s0 + $0x20] sm:$0xff]  ;;  %v510_v38 = vld [vmem:[%s4466_s0 + $0x28] sm:$0xff]  ;;  %v527_v39 = vld [vmem:[%s4466_s0 + $0xb0] sm:$0xff] }
  0x2a   :  { %3004 = vmatpush3.bf16.msra.mxu1 %v3003_v45  ;;  %v528_v40 = vld [vmem:[%s4466_s0 + $0xb8] sm:$0xff]  ;;  %v3043_v41 = vpack.c.bf16 %v510_v38, %v509_v37  ;;  %v511_v43 = vld [vmem:[%s4466_s0 + $0x30] sm:$0xff]  ;;  %v529_v45 = vld [vmem:[%s4466_s0 + $0xc0] sm:$0xff] }
  0x2b   :  { %255 = vmatmul.mubr.f32.vlgmr.msra.gmra.mrb[0].mxu0 %v166_v25  ;;  %3018 = vmatprep.subr.bf16.mxu1 %v3017_v63  ;;  %v3033_v25 = vpack.c.bf16 %v522_v23, %v521_v22  ;;  %v3045_v42 = vpack.c.bf16 %v528_v40, %v527_v39  ;;  %v512_v44 = vld [vmem:[%s4466_s0 + $0x38] sm:$0xff]  ;;  %v530_v46 = vld [vmem:[%s4466_s0 + $0xc8] sm:$0xff]  ;;  %v513_v50 = vld [vmem:[%s4466_s0 + $0x40] sm:$0xff] }
  0x2c   :  { %3007 = vmatpush3.bf16.msra.mxu0 %v3006_v48  ;;  %2790 = vmatprep.mubr.msk.f32.mxu0 %vm3346_vm1, %v3343_v7  ;;  %v3047_v47 = vpack.c.bf16 %v512_v44, %v511_v43  ;;  %v3049_v48 = vpack.c.bf16 %v530_v46, %v529_v45  ;;  %v514_v51 = vld [vmem:[%s4466_s0 + $0x48] sm:$0xff]  ;;  %v532_v53 = vld [vmem:[%s4466_s0 + $0xd8] sm:$0xff]  ;;  %v515_v56 = vld [vmem:[%s4466_s0 + $0x50] sm:$0xff]  ;;  %v421_v43 = vsub.s32 0, %v3601_v61  ;;  %v425_v45 = vsub.s32 1, %v3601_v61 }
  0x2d   :  { %325 = vmatmul.mubr.f32.vlgmr.msra.gmra.mrb[0].mxu1 %v173_v34  ;;  %3008 = vmatprep.subr.bf16.mxu0 %v3345_v49  ;;  %v526_v34 = vld [vmem:[%s4466_s0 + $0xa8] sm:$0xff]  ;;  %v3051_v54 = vpack.c.bf16 %v514_v51, %v513_v50  ;;  %v516_v57 = vld [vmem:[%s4466_s0 + $0x58] sm:$0xff]  ;;  %v2519_v0 = vld [vmem:[%s4467_s30] ss:$0 sm:$0xff] }
  0x2e   :  { %496 = vmatprep.mubr.f32.mxu1 %v3343_v7  ;;  %3020 = vmatpush1.bf16.msra.mxu1 %v3019_v2  ;;  %v3041_v36 = vpack.c.bf16 %v526_v34, %v525_v33  ;;  %v3055_v60 = vpack.c.bf16 %v516_v57, %v515_v56  ;;  %v517_v13 = vld [vmem:[%s4466_s0 + $0x60] sm:$0xff]  ;;  %v518_v14 = vld [vmem:[%s4466_s0 + $0x68] sm:$0xff]  ;;  %v535_v16 = vld [vmem:[%s4466_s0 + $0xf0] sm:$0xff] }
  0x2f   :  { %3022 = vmatprep.subr.bf16.mxu1 %v3021_v6  ;;  %v536_v17 = vld [vmem:[%s4466_s0 + $0xf8] sm:$0xff]  ;;  %v519_v19 = vld [vmem:[%s4466_s0 + $0x70] sm:$0xff]  ;;  %v614_v22 = vld [vmem:[%s4468_s25] sm:$0xff] }
  0x30   :  { %3010 = vmatpush3.bf16.msra.mxu0 %v3009_v52  ;;  %v531_v52 = vld [vmem:[%s4466_s0 + $0xd0] sm:$0xff]  ;;  %v520_v20 = vld [vmem:[%s4466_s0 + $0x78] sm:$0xff]  ;;  %v615_v23 = vld [vmem:[%s4468_s25 + $0x8] sm:$0xff] }
  0x31   :  { %3011 = vmatprep.subr.bf16.mxu0 %v3345_v49  ;;  %v616_v24 = vld [vmem:[%s4468_s25 + $0x10] sm:$0xff]  ;;  %v617_v26 = vld [vmem:[%s4468_s25 + $0x18] sm:$0xff]  ;;  %v618_v28 = vld [vmem:[%s4468_s25 + $0x20] sm:$0xff] }
  0x32   :  { %3024 = vmatpush1.bf16.msra.mxu1 %v3023_v11  ;;  %v3069_v27 = vpack.c.bf16 %v617_v26, %v616_v24  ;;  %v620_v31 = vld [vmem:[%s4468_s25 + $0x30] sm:$0xff]  ;;  %v621_v32 = vld [vmem:[%s4468_s25 + $0x38] sm:$0xff]  ;;  %v622_v34 = vld [vmem:[%s4468_s25 + $0x40] sm:$0xff] }
  0x33   :  { %3026 = vmatprep.subr.bf16.mxu1 %v3025_v12  ;;  %v3075_v33 = vpack.c.bf16 %v621_v32, %v620_v31  ;;  %v624_v37 = vld [vmem:[%s4468_s25 + $0x50] sm:$0xff]  ;;  %v625_v38 = vld [vmem:[%s4468_s25 + $0x58] sm:$0xff]  ;;  %v626_v40 = vld [vmem:[%s4468_s25 + $0x60] sm:$0xff] }
  0x34   :  { %3013 = vmatpush3.bf16.msra.mxu0 %v3012_v55  ;;  %v3053_v55 = vpack.c.bf16 %v532_v53, %v531_v52  ;;  %v3081_v39 = vpack.c.bf16 %v625_v38, %v624_v37  ;;  %v417_v44 = vld [vmem:[%s4469_s24] sm:$0x3]  ;;  %v629_v56 = vld [vmem:[%s4468_s25 + $0x78] sm:$0xff]  ;;  %v802_v26 = vld [vmem:[%s4437_s1 + $0x8] sm:$0xff] }
  0x35   :  { %3014 = vmatprep.subr.bf16.mxu0 %v3345_v49  ;;  %v422_v46 = vrot.slane %v417_v44, %v421_v43  ;;  %v807_v31 = vld [vmem:[%s4437_s1 + $0x30] sm:$0xff]  ;;  %v808_v32 = vld [vmem:[%s4437_s1 + $0x38] sm:$0xff] }
  0x36   :  { %3028 = vmatpush1.bf16.msra.mxu1 %v3027_v15  ;;  %v3059_v15 = vpack.c.bf16 %v518_v14, %v517_v13  ;;  %v719_v13 = vld [vmem:[%s4434_s10 + $0x58] sm:$0xff] }
  0x37   :  { %3030 = vmatprep.subr.bf16.mxu1 %v3029_v18  ;;  %v3061_v18 = vpack.c.bf16 %v536_v17, %v535_v16  ;;  %v721_v16 = vld [vmem:[%s4434_s10 + $0x68] sm:$0xff]  ;;  %v1280_v37 = vld [vmem:[%s4438_s18 + $0x18] sm:$0xff] }
  0x38   :  { %3016 = vmatpush3.bf16.msra.mxu0 %v3015_v58  ;;  %v533_v58 = vld [vmem:[%s4466_s0 + $0xe0] sm:$0xff] }
  0x39   :  { %3034 = vmatprep.subr.bf16.mxu0 %v3033_v25  ;;  %v3066_v25 = vpack.c.bf16 %v615_v23, %v614_v22  ;;  %v960_v22 = vld [vmem:[%s4436_s14 + $0x8] sm:$0xff] }
  0x3a   :  { %3032 = vmatpush1.bf16.msra.mxu1 %v3031_v21  ;;  %v3063_v21 = vpack.c.bf16 %v520_v20, %v519_v19  ;;  %v2523_v19 = vld [vmem:[%s4435_s7] ss:$0 sm:$0xff] }
  0x3b   :  { %2791 = vmatmul.mubr.msk.f32.vlgmr.msra.gmra.mrb[2].mxu0 %vm187_vm0, %v2520_v59  ;;  %3065 = vmatprep.subr.bf16.mxu1 %v3345_v49  ;;  %v534_v59 = vld [vmem:[%s4466_s0 + $0xe8] sm:$0xff] }
  0x3c   :  { %3036 = vmatpush3.bf16.msra.mxu0 %v3035_v29  ;;  %v3057_v62 = vpack.c.bf16 %v534_v59, %v533_v58  ;;  %v619_v29 = vld [vmem:[%s4468_s25 + $0x28] sm:$0xff]  ;;  %v809_v58 = vld [vmem:[%s4470_s12] sm:$0x3] }
  0x3d   :  { %3038 = vmatprep.subr.bf16.mxu0 %v3037_v30  ;;  %v3072_v30 = vpack.c.bf16 %v619_v29, %v618_v28  ;;  %v708_v59 = vld [vmem:[%s4434_s10] sm:$0xff]  ;;  %v804_v28 = vld [vmem:[%s4437_s1 + $0x18] sm:$0xff] }
  0x3e   :  { %v805_v29 = vld [vmem:[%s4437_s1 + $0x20] sm:$0xff] }
  0x40   :  { %3040 = vmatpush3.bf16.msra.mxu0 %v3039_v35  ;;  %v623_v35 = vld [vmem:[%s4468_s25 + $0x48] sm:$0xff] }
  0x41   :  { %3042 = vmatprep.subr.bf16.mxu0 %v3041_v36  ;;  %v3078_v36 = vpack.c.bf16 %v623_v35, %v622_v34  ;;  %v723_v34 = vld [vmem:[%s4434_s10 + $0x78] sm:$0xff] }
  0x44   :  { %3044 = vmatpush3.bf16.msra.mxu0 %v3043_v41  ;;  %v627_v41 = vld [vmem:[%s4468_s25 + $0x68] sm:$0xff] }
  0x45   :  { %3046 = vmatprep.subr.bf16.mxu0 %v3045_v42  ;;  %v3084_v42 = vpack.c.bf16 %v627_v41, %v626_v40 }
  0x48   :  { %3048 = vmatpush3.bf16.msra.mxu0 %v3047_v47  ;;  %v426_v47 = vrot.slane %v417_v44, %v425_v45  ;;  %v2526_v44 = vld [vmem:[%s4440_s13] ss:$0 sm:$0xff] }
  0x49   :  { %3050 = vmatprep.subr.bf16.mxu0 %v3049_v48 }
  0x4c   :  { %3052 = vmatpush3.bf16.msra.mxu0 %v3051_v54 }
  0x4d   :  { %3054 = vmatprep.subr.bf16.mxu0 %v3053_v55  ;;  %v628_v55 = vld [vmem:[%s4468_s25 + $0x70] sm:$0xff] }
  0x4e   :  { %v3087_v57 = vpack.c.bf16 %v629_v56, %v628_v55  ;;  %v1284_v55 = vld [vmem:[%s4438_s18 + $0x38] sm:$0xff] }
  0x50   :  { %3056 = vmatpush3.bf16.msra.mxu0 %v3055_v60  ;;  %v709_v60 = vld [vmem:[%s4434_s10 + $0x8] sm:$0xff] }
  0x51   :  { %3058 = vmatprep.subr.bf16.mxu0 %v3057_v62  ;;  %v710_v62 = vld [vmem:[%s4434_s10 + $0x10] sm:$0xff] }
  0x54   :  { %3060 = vmatpush3.bf16.msra.mxu0 %v3059_v15  ;;  %v720_v15 = vld [vmem:[%s4434_s10 + $0x60] sm:$0xff] }
  0x55   :  { %3062 = vmatprep.subr.bf16.mxu0 %v3061_v18  ;;  %v3108_v17 = vpack.c.bf16 %v721_v16, %v720_v15  ;;  %v1290_v16 = vld [vmem:[%s4438_s18 + $0x68] sm:$0xff] }
  0x58   :  { %3064 = vmatpush3.bf16.msra.mxu0 %v3063_v21  ;;  %v959_v21 = vld [vmem:[%s4436_s14] sm:$0xff] }
  0x59   :  { %3089 = vmatprep.subr.bf16.mxu0 %v3345_v49 }
  0xfe   :  { %v2611_v63 = vpop.f32.mrb[0].mxu0 }
  0xff   :  { %v2612_v1 = vpop.f32.mrb[1].mxu0 }
 0x100   :  { %v2646_v2 = vpop.f32.mrb[0].mxu1  ;;  %v2613_v3 = vadd.f32 %v2612_v1, %v2611_v63  ;;  %v3090_v63 = vpack.c.bf16 %v709_v60, %v708_v59 }
 0x101   :  { %v2647_v4 = vpop.f32.mrb[1].mxu1 }
 0x102   :  { %v2648_v5 = vadd.f32 %v2647_v4, %v2646_v2  ;;  %v257_v6 = vadd.f32 %v2613_v3, %v2519_v0  ;;  %v711_v0 = vld [vmem:[%s4434_s10 + $0x18] sm:$0xff]  ;;  %v712_v2 = vld [vmem:[%s4434_s10 + $0x20] sm:$0xff]  ;;  %v713_v3 = vld [vmem:[%s4434_s10 + $0x28] sm:$0xff] }
 0x103   :  { %v3093_v1 = vpack.c.bf16 %v711_v0, %v710_v62  ;;  %v3096_v4 = vpack.c.bf16 %v713_v3, %v712_v2  ;;  %v1281_v0 = vld [vmem:[%s4438_s18 + $0x20] sm:$0xff]  ;;  %v1286_v3 = vld [vmem:[%s4438_s18 + $0x48] sm:$0xff] }
 0x104   :  { %v327_v8 = vadd.f32 %v2648_v5, %v257_v6  ;;  %v714_v5 = vld [vmem:[%s4434_s10 + $0x30] sm:$0xff]  ;;  %v715_v6 = vld [vmem:[%s4434_s10 + $0x38] sm:$0xff] }
 0x10e   :  { %v396_v9 = vpop.f32.mrb[2].mxu0 }
 0x10f   :  { %v397_v10 = vadd.f32 %v396_v9, %v327_v8  ;;  %v2792_v11 = vpop.f32.mrb[3].mxu0  ;;  %v3099_v8 = vpack.c.bf16 %v715_v6, %v714_v5  ;;  %v716_v9 = vld [vmem:[%s4434_s10 + $0x40] sm:$0xff] }
 0x111   :  { %v400_v12 = vmax.f32 %v397_v10, 0.0  ;;  %v717_v10 = vld [vmem:[%s4434_s10 + $0x48] sm:$0xff] }
 0x112   :  { %v3102_v11 = vpack.c.bf16 %v717_v10, %v716_v9 }
 0x113   :  { %2522 = vmatmul.mubr.msk.f32.vlgmr.msra.gmra.mrb[2].mxu1 %vm187_vm0, %v400_v12  ;;  %v718_v12 = vld [vmem:[%s4434_s10 + $0x50] sm:$0xff] }
 0x114   :  { %2825 = vmatprep.mubr.msk.f32.mxu1 %vm3346_vm1, %v3343_v7  ;;  %3067 = vmatpush3.bf16.msra.mxu1 %v3066_v25  ;;  %v3105_v14 = vpack.c.bf16 %v719_v13, %v718_v12  ;;  %v3113_v25 = vpack.c.bf16 %v960_v22, %v959_v21  ;;  %v1285_v13 = vld [vmem:[%s4438_s18 + $0x40] sm:$0xff] }
 0x115   :  { %3068 = vmatprep.subr.bf16.mxu1 %v3345_v49 }
 0x118   :  { %3070 = vmatpush3.bf16.msra.mxu1 %v3069_v27  ;;  %v803_v27 = vld [vmem:[%s4437_s1 + $0x10] sm:$0xff] }
 0x119   :  { %3071 = vmatprep.subr.bf16.mxu1 %v3345_v49 }
 0x11c   :  { %3073 = vmatpush3.bf16.msra.mxu1 %v3072_v30  ;;  %v806_v30 = vld [vmem:[%s4437_s1 + $0x28] sm:$0xff] }
 0x11d   :  { %3074 = vmatprep.subr.bf16.mxu1 %v3345_v49 }
 0x120   :  { %3076 = vmatpush3.bf16.msra.mxu1 %v3075_v33  ;;  %v722_v33 = vld [vmem:[%s4434_s10 + $0x70] sm:$0xff] }
 0x121   :  { %3077 = vmatprep.subr.bf16.mxu1 %v3345_v49  ;;  %v3111_v35 = vpack.c.bf16 %v723_v34, %v722_v33  ;;  %v1098_v33 = vld [vmem:[%s4441_s16] sm:$0xff]  ;;  %v1100_v34 = vld [vmem:[%s4441_s16 + $0x10] sm:$0xff] }
 0x124   :  { %3079 = vmatpush3.bf16.msra.mxu1 %v3078_v36  ;;  %v1278_v36 = vld [vmem:[%s4438_s18 + $0x8] sm:$0xff] }
 0x125   :  { %3080 = vmatprep.subr.bf16.mxu1 %v3345_v49  ;;  %v4042_v38 = vpack.c.bf16 %v1280_v37, %v1278_v36  ;;  %v2525_v36 = vld [vmem:[%s4442_s11] ss:$0 sm:$0xff] }
 0x128   :  { %3082 = vmatpush3.bf16.msra.mxu1 %v3081_v39  ;;  %v2524_v39 = vld [vmem:[%s4439_s9] ss:$0 sm:$0xff] }
 0x129   :  { %3083 = vmatprep.subr.bf16.mxu1 %v3345_v49 }
 0x12c   :  { %3085 = vmatpush3.bf16.msra.mxu1 %v3084_v42 }
 0x12d   :  { %3086 = vmatprep.subr.bf16.mxu1 %v3345_v49 }
 0x130   :  { %3088 = vmatpush3.bf16.msra.mxu1 %v3087_v57 }
 0x131   :  { %2863 = vmatprep.subr.msk.mxu1 %vm842_vm2, %v809_v58 }
 0x1e6   :  { %v498_v48 = vpop.f32.mrb[2].mxu1 }
 0x1e7   :  { %v499_v50 = vadd.f32 %v498_v48, %v422_v46  ;;  %v500_v51 = vpop.f32.mrb[3].mxu1 }
 0x1e8   :  { %v501_v52 = vadd.f32 %v500_v51, %v426_v47  ;;  %v1277_v51 = vld [vmem:[%s4438_s18] sm:$0xff] }
 0x1e9   :  { %v503_v54 = vmax.f32 %v499_v50, 0.0 }
 0x1ea   :  { %v504_v53 = vmax.f32 %v501_v52, 0.0  ;;  %v1279_v52 = vld [vmem:[%s4438_s18 + $0x10] sm:$0xff] }
 0x1ec   :  { %608 = vmatprep.mubr.f32.mxu0 %v504_v53 }
 0x1ed   :  { %609 = vmatmul.mubr.f32.vlgmr.msra.gmra.mrb[4].mxu0 %v503_v54  ;;  %v1282_v54 = vld [vmem:[%s4438_s18 + $0x28] sm:$0xff] }
 0x1ee   :  { %2860 = vmatprep.mubr.msk.f32.mxu0 %vm3346_vm1, %v3343_v7  ;;  %3091 = vmatpush3.bf16.msra.mxu0 %v3090_v63  ;;  %v4066_v63 = vpack.c.bf16 %v1284_v55, %v1282_v54 }
 0x1ef   :  { %3092 = vmatprep.subr.bf16.mxu0 %v3345_v49 }
 0x1f2   :  { %3094 = vmatpush3.bf16.msra.mxu0 %v3093_v1  ;;  %v1283_v1 = vld [vmem:[%s4438_s18 + $0x30] sm:$0xff] }
 0x1f3   :  { %3095 = vmatprep.subr.bf16.mxu0 %v3345_v49  ;;  %v4083_v9 = vpack.c.bf16 %v1283_v1, %v1281_v0  ;;  %v1102_v1 = vld [vmem:[%s4444_s17] sm:$0x3]  ;;  %s3347_s17 = smov 64  }
 0x1f6   :  { %3097 = vmatpush3.bf16.msra.mxu0 %v3096_v4  ;;  %v1288_v4 = vld [vmem:[%s4438_s18 + $0x58] sm:$0xff] }
 0x1f7   :  { %3098 = vmatprep.subr.bf16.mxu0 %v3345_v49  ;;  %v4086_v12 = vpack.c.bf16 %v1288_v4, %v1286_v3  ;;  %v1107_v3 = vrot.slane %v1102_v1, %v421_v43  ;;  %v1111_v4 = vrot.slane %v1102_v1, %v425_v45 }
 0x1fa   :  { %3100 = vmatpush3.bf16.msra.mxu0 %v3099_v8 }
 0x1fb   :  { %3101 = vmatprep.subr.bf16.mxu0 %v3345_v49 }
 0x1fe   :  { %3103 = vmatpush3.bf16.msra.mxu0 %v3102_v11 }
 0x1ff   :  { %3104 = vmatprep.subr.bf16.mxu0 %v3345_v49 }
 0x202   :  { %3106 = vmatpush3.bf16.msra.mxu0 %v3105_v14  ;;  %v1287_v14 = vld [vmem:[%s4438_s18 + $0x50] sm:$0xff] }
 0x203   :  { %3107 = vmatprep.subr.bf16.mxu0 %v3345_v49  ;;  %v4103_v21 = vpack.c.bf16 %v1287_v14, %v1285_v13 }
 0x206   :  { %3109 = vmatpush3.bf16.msra.mxu0 %v3108_v17  ;;  %v1292_v17 = vld [vmem:[%s4438_s18 + $0x78] sm:$0xff] }
 0x207   :  { %3110 = vmatprep.subr.bf16.mxu0 %v3345_v49  ;;  %v801_v49 = vld [vmem:[%s4437_s1] sm:$0xff] }
 0x20a   :  { %3112 = vmatpush3.bf16.msra.mxu0 %v3111_v35  ;;  %v3119_v35 = vpack.c.bf16 %v1100_v34, %v1098_v33 }
 0x2c0   :  { %v2690_v18 = vpop.f32.mrb[4].mxu0 }
 0x2c1   :  { %v2691_v20 = vpop.f32.mrb[5].mxu0 }
 0x2c2   :  { %v2692_v23 = vadd.f32 %v2691_v20, %v2690_v18 }
 0x2c4   :  { %v611_v24 = vadd.f32 %v2692_v23, %v2523_v19 }
 0x2c6   :  { %2826 = vmatmul.mubr.f32.vlgmr.msra.gmra.mrb[4].mxu1 %v611_v24  ;;  %v4106_v24 = vpack.c.bf16 %v1292_v17, %v1290_v16 }
 0x2c7   :  { %2864 = vmatpush3.msk.msra.mxu1 %vm842_vm2, %v809_v58  ;;  %2865 = vmatprep.mubr.msk.f32.mxu1 %vm817_vm3, %v801_v49  ;;  %v4064_v58 = vpack.c.bf16 %v1279_v52, %v1277_v51 }
 0x2c8   :  { %3114 = vmatprep.subr.bf16.mxu1 %v3113_v25 }
 0x2ca   :  { %2866 = vmatmul.mubr.msk.f32.vlgmr.msra.gmra.mrb[6].mxu1 %vm817_vm3, %v802_v26 }
 0x2cb   :  { %2868 = vmatprep.mubr.msk.f32.mxu1 %vm817_vm3, %v803_v27  ;;  %3116 = vmatpush3.bf16.msra.mxu1 %v3113_v25  ;;  %v1289_v27 = vld [vmem:[%s4438_s18 + $0x60] sm:$0xff] }
 0x2cc   :  { %3122 = vmatprep.subr.bf16.mxu1 %v4042_v38 }
 0x2ce   :  { %2869 = vmatmul.mubr.msk.f32.gmra.mrb[8].mxu1 %vm817_vm3, %v804_v28  ;;  %v1291_v28 = vld [vmem:[%s4438_s18 + $0x70] sm:$0xff] }
 0x2cf   :  { %2871 = vmatprep.mubr.msk.f32.mxu1 %vm817_vm3, %v805_v29  ;;  %v4121_v29 = vpack.c.bf16 %v1291_v28, %v1289_v27 }
 0x2d2   :  { %2872 = vmatmul.mubr.msk.f32.gmra.mrb[10].mxu1 %vm817_vm3, %v806_v30  ;;  %v1099_v30 = vld [vmem:[%s4441_s16 + $0x8] sm:$0xff] }
 0x2d3   :  { %2874 = vmatprep.mubr.msk.f32.mxu1 %vm817_vm3, %v807_v31  ;;  %v1101_v31 = vld [vmem:[%s4441_s16 + $0x18] sm:$0xff] }
 0x2d6   :  { %2875 = vmatmul.mubr.msk.f32.gmra.mrb[12].mxu1 %vm817_vm3, %v808_v32  ;;  %v3117_v32 = vpack.c.bf16 %v1101_v31, %v1099_v30 }
 0x2d8   :  { %3118 = vmatprep.subr.bf16.mxu0 %v3117_v32 }
 0x399   :  { %v703_v40 = vpop.f32.mrb[4].mxu1 }
 0x39a   :  { %v704_v41 = vadd.f32 %v2524_v39, %v703_v40  ;;  %v2827_v42 = vpop.f32.mrb[5].mxu1 }
 0x39c   :  { %v707_v46 = vmax.f32 %v704_v41, 0.0  ;;  %v2536_v41 = vld [vmem:[%s4443_s15] ss:$0 sm:$0xff] }
 0x39d   :  { %v2867_v47 = vpop.f32.mrb[6].mxu1 }
 0x39e   :  { %v918_v48 = vadd.f32 %v2867_v47, %v2526_v44  ;;  %2861 = vmatmul.mubr.f32.vlgmr.msra.gmra.mrb[6].mxu0 %v707_v46  ;;  %v912_v50 = vpop.f32.mrb[7].mxu1 }
 0x39f   :  { %v913_v53 = vadd.f32 %v2526_v44, %v912_v50  ;;  %1202 = vmatprep.mubr.f32.mxu0 %v3343_v7  ;;  %3120 = vmatpush1.bf16.msra.mxu0 %v3119_v35 }
 0x3a0   :  { %v952_v59 = vmax.f32 %v918_v48, 0.0  ;;  %3154 = vmatprep.subr.bf16.mxu0 %v4042_v38 }
 0x3a1   :  { %v951_v56 = vmax.f32 %v913_v53, 0.0  ;;  %v2870_v57 = vpop.f32.mrb[8].mxu1 }
 0x3a2   :  { %v928_v60 = vadd.f32 %v2870_v57, %v2526_v44  ;;  %v922_v62 = vpop.f32.mrb[9].mxu1 }
 0x3a3   :  { %2881 = vmatprep.mubr.msk.f32.mxu1 %vm968_vm4, %v951_v56  ;;  %v923_v2 = vadd.f32 %v2526_v44, %v922_v62 }
 0x3a4   :  { %2882 = vmatmul.mubr.msk.f32.vlgmr.msra.gmra.mrb[14].mxu1 %vm968_vm4, %v952_v59  ;;  %v954_v5 = vmax.f32 %v928_v60, 0.0 }
 0x3a5   :  { %v953_v6 = vmax.f32 %v923_v2, 0.0  ;;  %v2873_v8 = vpop.f32.mrb[10].mxu1  ;;  %3124 = vmatpush1.bf16.msra.mxu1 %v4064_v58 }
 0x3a6   :  { %v938_v10 = vadd.f32 %v2873_v8, %v2526_v44  ;;  %v932_v11 = vpop.f32.mrb[11].mxu1  ;;  %3126 = vmatprep.subr.bf16.mxu1 %v4066_v63 }
 0x3a7   :  { %2884 = vmatprep.mubr.msk.f32.mxu1 %vm968_vm4, %v953_v6  ;;  %v933_v15 = vadd.f32 %v2526_v44, %v932_v11 }
 0x3a8   :  { %2885 = vmatmul.mubr.msk.f32.gmra.mrb[16].mxu1 %vm968_vm4, %v954_v5  ;;  %v956_v18 = vmax.f32 %v938_v10, 0.0 }
 0x3a9   :  { %v955_v19 = vmax.f32 %v933_v15, 0.0  ;;  %v2876_v20 = vpop.f32.mrb[12].mxu1  ;;  %3128 = vmatpush1.bf16.msra.mxu1 %v4083_v9 }
 0x3aa   :  { %v948_v22 = vadd.f32 %v2876_v20, %v2526_v44  ;;  %v942_v23 = vpop.f32.mrb[13].mxu1  ;;  %3130 = vmatprep.subr.bf16.mxu1 %v4086_v12 }
 0x3ab   :  { %2887 = vmatprep.mubr.msk.f32.mxu1 %vm968_vm4, %v955_v19  ;;  %v943_v49 = vadd.f32 %v2526_v44, %v942_v23 }
 0x3ac   :  { %v958_v25 = vmax.f32 %v948_v22, 0.0  ;;  %2888 = vmatmul.mubr.msk.f32.gmra.mrb[18].mxu1 %vm968_vm4, %v956_v18 }
 0x3ad   :  { %v957_v26 = vmax.f32 %v943_v49, 0.0  ;;  %3132 = vmatpush1.bf16.msra.mxu1 %v4103_v21 }
 0x3ae   :  { %3134 = vmatprep.subr.bf16.mxu1 %v4106_v24 }
 0x3af   :  { %2890 = vmatprep.mubr.msk.f32.mxu1 %vm968_vm4, %v957_v26 }
 0x3b0   :  { %2891 = vmatmul.mubr.msk.f32.gmra.mrb[20].mxu1 %vm968_vm4, %v958_v25 }
 0x3b1   :  { %1360 = vmatprep.mubr.f32.mxu1 %v3343_v7  ;;  %3136 = vmatpush1.bf16.msra.mxu1 %v4121_v29 }
 0x3b2   :  { %3138 = vmatprep.subr.bf16.mxu1 %v4042_v38 }
 0x471   :  { %v797_v37 = vpop.f32.mrb[6].mxu0 }
 0x472   :  { %v4141_v39 = vadd.f32 %v2525_v36, %v797_v37  ;;  %v2862_v40 = vpop.f32.mrb[7].mxu0 }
 0x474   :  { %2553 = vmatmul.mubr.msk.f32.vlgmr.msra.gmra.mrb[22].mxu1 %vm187_vm0, %v4141_v39 }
 0x475   :  { %3140 = vmatpush1.bf16.msra.mxu1 %v4064_v58  ;;  %1477 = vmatprep.mubr.f32.mxu1 %v3343_v7 }
 0x476   :  { %3142 = vmatprep.subr.bf16.mxu1 %v4066_v63 }
 0x477   :  { %v2883_v42 = vpop.f32.mrb[14].mxu1 }
 0x478   :  { %v1059_v44 = vpop.f32.mrb[15].mxu1  ;;  %v1065_v50 = vadd.f32 %v2883_v42, %v2536_v41 }
 0x479   :  { %v1060_v46 = vadd.f32 %v2536_v41, %v1059_v44  ;;  %3144 = vmatpush1.bf16.msra.mxu1 %v4083_v9 }
 0x47a   :  { %3146 = vmatprep.subr.bf16.mxu1 %v4086_v12 }
 0x47b   :  { %2545 = vmatmul.mubr.msk.f32.vlgmr.msra.gmra.mrb[8].mxu0 %vm968_vm4, %v1060_v46  ;;  %v2886_v47 = vpop.f32.mrb[16].mxu1 }
 0x47c   :  { %1208 = vmatprep.mubr.f32.mxu0 %v3343_v7  ;;  %v1069_v48 = vpop.f32.mrb[17].mxu1  ;;  %3156 = vmatpush1.bf16.msra.mxu0 %v4064_v58  ;;  %v1075_v54 = vadd.f32 %v2886_v47, %v2536_v41 }
 0x47d   :  { %3148 = vmatpush1.bf16.msra.mxu1 %v4103_v21  ;;  %3158 = vmatprep.subr.bf16.mxu0 %v4066_v63  ;;  %v1070_v51 = vadd.f32 %v2536_v41, %v1069_v48 }
 0x47e   :  { %3150 = vmatprep.subr.bf16.mxu1 %v4106_v24 }
 0x47f   :  { %2546 = vmatmul.mubr.msk.f32.gmra.mrb[10].mxu0 %vm968_vm4, %v1065_v50  ;;  %v2889_v52 = vpop.f32.mrb[18].mxu1 }
 0x480   :  { %1214 = vmatprep.mubr.f32.mxu0 %v3343_v7  ;;  %v1079_v53 = vpop.f32.mrb[19].mxu1  ;;  %3160 = vmatpush1.bf16.msra.mxu0 %v4083_v9  ;;  %v1085_v59 = vadd.f32 %v2889_v52, %v2536_v41 }
 0x481   :  { %3152 = vmatpush1.bf16.msra.mxu1 %v4121_v29  ;;  %3162 = vmatprep.subr.bf16.mxu0 %v4086_v12  ;;  %v1080_v57 = vadd.f32 %v2536_v41, %v1079_v53 }
 0x482   :  { %3170 = vmatprep.subr.bf16.mxu1 %v4042_v38 }
 0x483   :  { %2547 = vmatmul.mubr.msk.f32.gmra.mrb[12].mxu0 %vm968_vm4, %v1070_v51  ;;  %v2892_v55 = vpop.f32.mrb[20].mxu1 }
 0x484   :  { %1220 = vmatprep.mubr.f32.mxu0 %v3343_v7  ;;  %v1089_v56 = vpop.f32.mrb[21].mxu1  ;;  %3164 = vmatpush1.bf16.msra.mxu0 %v4103_v21  ;;  %v1095_v62 = vadd.f32 %v2892_v55, %v2536_v41 }
 0x485   :  { %3166 = vmatprep.subr.bf16.mxu0 %v4106_v24  ;;  %v1090_v60 = vadd.f32 %v2536_v41, %v1089_v56 }
 0x487   :  { %2548 = vmatmul.mubr.msk.f32.gmra.mrb[14].mxu0 %vm968_vm4, %v1075_v54 }
 0x488   :  { %1226 = vmatprep.mubr.f32.mxu0 %v3343_v7  ;;  %3168 = vmatpush1.bf16.msra.mxu0 %v4121_v29 }
 0x489   :  { %3186 = vmatprep.subr.bf16.mxu0 %v4042_v38 }
 0x48b   :  { %2549 = vmatmul.mubr.msk.f32.gmra.mrb[16].mxu0 %vm968_vm4, %v1080_v57 }
 0x48c   :  { %1232 = vmatprep.mubr.f32.mxu0 %v3343_v7 }
 0x48f   :  { %2550 = vmatmul.mubr.msk.f32.gmra.mrb[18].mxu0 %vm968_vm4, %v1085_v59 }
 0x490   :  { %1238 = vmatprep.mubr.f32.mxu0 %v3343_v7 }
 0x493   :  { %2551 = vmatmul.mubr.msk.f32.gmra.mrb[20].mxu0 %vm968_vm4, %v1090_v60 }
 0x494   :  { %1244 = vmatprep.mubr.f32.mxu0 %v3343_v7 }
 0x497   :  { %2552 = vmatmul.mubr.msk.f32.gmra.mrb[22].mxu0 %vm968_vm4, %v1095_v62 }
 0x498   :  { %1593 = vmatprep.mubr.f32.mxu0 %v3343_v7 }
 0x547   :  { %v1362_v0 = vpop.f32.mrb[22].mxu1 }
 0x548   :  { %v1364_v2 = vpop.f32.mrb[23].mxu1 }
 0x54e   :  { %v1204_v5 = vpop.f32.mrb[8].mxu0 }
 0x54f   :  { %v1205_v6 = vadd.f32 %v1204_v5, %v1107_v3  ;;  %v1206_v8 = vpop.f32.mrb[9].mxu0 }
 0x550   :  { %v1207_v10 = vadd.f32 %v1206_v8, %v1111_v4 }
 0x551   :  { %1251 = vst [vmem:[#allocation2] sm:$0xff] %v1205_v6 }
 0x552   :  { %1252 = vst [vmem:[#allocation2 + $0x8] sm:$0xff] %v1207_v10  ;;  %v1210_v11 = vpop.f32.mrb[10].mxu0 }
 0x553   :  { %v1211_v13 = vadd.f32 %v1210_v11, %v1107_v3  ;;  %v1212_v14 = vpop.f32.mrb[11].mxu0 }
 0x554   :  { %v1213_v15 = vadd.f32 %v1212_v14, %v1111_v4 }
 0x555   :  { %1253 = vst [vmem:[#allocation2 + $0x10] sm:$0xff] %v1211_v13 }
 0x556   :  { %1254 = vst [vmem:[#allocation2 + $0x18] sm:$0xff] %v1213_v15  ;;  %v1216_v49 = vpop.f32.mrb[12].mxu0 }
 0x557   :  { %v1217_v25 = vadd.f32 %v1216_v49, %v1107_v3  ;;  %v1218_v26 = vpop.f32.mrb[13].mxu0 }
 0x558   :  { %v1275_v16 = vld [vmem:[#allocation2] sm:$0x3]  ;;  %v1219_v27 = vadd.f32 %v1218_v26, %v1111_v4 }
 0x559   :  { %v1367_v17 = vadd.f32 %v1362_v0, %v1275_v16  ;;  %v1276_v18 = vld [vmem:[#allocation2 + $0x8] sm:$0x3]  ;;  %1255 = vst [vmem:[#allocation2 + $0x20] sm:$0xff] %v1217_v25 }
 0x55a   :  { %v1368_v43 = vadd.f32 %v1364_v2, %v1276_v18  ;;  %v1222_v28 = vpop.f32.mrb[14].mxu0  ;;  %1256 = vst [vmem:[#allocation2 + $0x28] sm:$0xff] %v1219_v27 }
 0x55b   :  { %v1369_v19 = vmul.f32 0.5, %v1367_v17  ;;  %v1223_v30 = vadd.f32 %v1222_v28, %v1107_v3  ;;  %v1224_v31 = vpop.f32.mrb[15].mxu0 }
 0x55c   :  { %v1225_v32 = vadd.f32 %v1224_v31, %v1111_v4  ;;  %v1374_v54 = vmul.f32 0.5, %v1368_v43 }
 0x55d   :  { %3279 = vtanh.f32 %v1369_v19  ;;  %1257 = vst [vmem:[#allocation2 + $0x30] sm:$0xff] %v1223_v30  ;;  %v1394_v8 = vld [vmem:[#allocation2 + $0x18] sm:$0x3] }
 0x55e   :  { %3281 = vtanh.f32 %v1368_v43  ;;  %v1228_v33 = vpop.f32.mrb[16].mxu0  ;;  %1258 = vst [vmem:[#allocation2 + $0x38] sm:$0xff] %v1225_v32 }
 0x55f   :  { %v1229_v34 = vadd.f32 %v1228_v33, %v1107_v3  ;;  %v1230_v35 = vpop.f32.mrb[17].mxu0  ;;  %3283 = vtanh.f32 %v1374_v54 }
 0x560   :  { %v1231_v36 = vadd.f32 %v1230_v35, %v1111_v4  ;;  %v1509_v25 = vld [vmem:[#allocation2 + $0x20] sm:$0x3] }
 0x561   :  { %1259 = vst [vmem:[#allocation2 + $0x40] sm:$0xff] %v1229_v34  ;;  %v1510_v31 = vld [vmem:[#allocation2 + $0x28] sm:$0x3] }
 0x562   :  { %v1234_v37 = vpop.f32.mrb[18].mxu0  ;;  %1260 = vst [vmem:[#allocation2 + $0x48] sm:$0xff] %v1231_v36 }
 0x563   :  { %v1235_v40 = vadd.f32 %v1234_v37, %v1107_v3  ;;  %v1236_v41 = vpop.f32.mrb[19].mxu0 }
 0x564   :  { %v1237_v42 = vadd.f32 %v1236_v41, %v1111_v4 }
 0x565   :  { %1261 = vst [vmem:[#allocation2 + $0x50] sm:$0xff] %v1235_v40 }
 0x566   :  { %v1240_v44 = vpop.f32.mrb[20].mxu0  ;;  %1262 = vst [vmem:[#allocation2 + $0x58] sm:$0xff] %v1237_v42 }
 0x567   :  { %v3280_v61 = vpop.eup %3279  ;;  %v1241_v46 = vadd.f32 %v1240_v44, %v1107_v3  ;;  %v1242_v47 = vpop.f32.mrb[21].mxu0 }
 0x568   :  { %v1371_v45 = vadd.f32 1.0, %v3280_v61  ;;  %v3282_v22 = vpop.eup %3281  ;;  %v1243_v48 = vadd.f32 %v1242_v47, %v1111_v4 }
 0x569   :  { %1263 = vst [vmem:[#allocation2 + $0x60] sm:$0xff] %v1241_v46  ;;  %v3284_v59 = vpop.eup %3283 }
 0x56a   :  { %v1372_v20 = vmul.f32 0.5, %v1371_v45  ;;  %v1246_v50 = vpop.f32.mrb[22].mxu0  ;;  %1264 = vst [vmem:[#allocation2 + $0x68] sm:$0xff] %v1243_v48  ;;  %v1376_v60 = vadd.f32 1.0, %v3284_v59 }
 0x56b   :  { %v1247_v51 = vadd.f32 %v1246_v50, %v1107_v3  ;;  %v1248_v52 = vpop.f32.mrb[23].mxu0 }
 0x56c   :  { %v1379_v23 = vmul.f32 %v3282_v22, %v1372_v20  ;;  %v1249_v53 = vadd.f32 %v1248_v52, %v1111_v4  ;;  %v1378_v55 = vmul.f32 %v1372_v20, %v4141_v39  ;;  %v1377_v62 = vmul.f32 0.5, %v1376_v60  ;;  %v1393_v39 = vld [vmem:[#allocation2 + $0x10] sm:$0x3] }
 0x56d   :  { %1265 = vst [vmem:[#allocation2 + $0x70] sm:$0xff] %v1247_v51  ;;  %v1625_v52 = vld [vmem:[#allocation2 + $0x30] sm:$0x3] }
 0x56e   :  { %1381 = vrot.lane.b32.xlu0 %v1379_v23, %s3347_s17  ;;  %1266 = vst [vmem:[#allocation2 + $0x78] sm:$0xff] %v1249_v53 }
 0x5e0   :  { %v1382_v56 = vpop.permute.xlu0 %1381 }
 0x5e1   :  { %v1384_v57 = vadd.f32 %v1382_v56, %v1378_v55 }
 0x5e3   :  { %3285 = vtanh.f32 %v1384_v57 }
 0x5ed   :  { %v3286_v0 = vpop.eup %3285 }
 0x5ee   :  { %v1386_v1 = vmul.f32 %v3286_v0, %v1377_v62 }
 0x5f0   :  { %1388 = vrot.lane.b32.xlu0 %v1386_v1, %s3347_s17 }
 0x662   :  { %v1389_v2 = vpop.permute.xlu0 %1388 }
 0x663   :  { %1392 = vst.msk [vmem:[#allocation3] sm:$0x3] %vm1391_vm5, %v1389_v2  ;;  %2554 = vmatmul.mubr.msk.f32.vlgmr.msra.gmra.mrb[24].mxu1 %vm187_vm0, %v1389_v2 }
 0x664   :  { %3172 = vmatpush1.bf16.msra.mxu1 %v4064_v58  ;;  %1709 = vmatprep.mubr.f32.mxu1 %v3343_v7 }
 0x665   :  { %3174 = vmatprep.subr.bf16.mxu1 %v4066_v63 }
 0x668   :  { %3176 = vmatpush1.bf16.msra.mxu1 %v4083_v9 }
 0x669   :  { %3178 = vmatprep.subr.bf16.mxu1 %v4086_v12 }
 0x66c   :  { %3180 = vmatpush1.bf16.msra.mxu1 %v4103_v21 }
 0x66d   :  { %3182 = vmatprep.subr.bf16.mxu1 %v4106_v24 }
 0x670   :  { %3184 = vmatpush1.bf16.msra.mxu1 %v4121_v29 }
 0x671   :  { %3202 = vmatprep.subr.bf16.mxu1 %v4042_v38 }
 0x736   :  { %v1479_v3 = vpop.f32.mrb[24].mxu1 }
 0x737   :  { %v1484_v4 = vadd.f32 %v1479_v3, %v1393_v39  ;;  %v1481_v5 = vpop.f32.mrb[25].mxu1 }
 0x738   :  { %v1485_v10 = vadd.f32 %v1481_v5, %v1394_v8 }
 0x739   :  { %v1486_v6 = vmul.f32 0.5, %v1484_v4 }
 0x73a   :  { %v1491_v17 = vmul.f32 0.5, %v1485_v10 }
 0x73b   :  { %3287 = vtanh.f32 %v1486_v6 }
 0x73c   :  { %3289 = vtanh.f32 %v1485_v10 }
 0x73d   :  { %3291 = vtanh.f32 %v1491_v17 }
 0x745   :  { %v3288_v11 = vpop.eup %3287 }
 0x746   :  { %v1488_v13 = vadd.f32 1.0, %v3288_v11  ;;  %v3290_v15 = vpop.eup %3289 }
 0x747   :  { %v3292_v61 = vpop.eup %3291 }
 0x748   :  { %v1489_v14 = vmul.f32 0.5, %v1488_v13  ;;  %v1493_v45 = vadd.f32 1.0, %v3292_v61 }
 0x74a   :  { %v1496_v16 = vmul.f32 %v3290_v15, %v1489_v14  ;;  %v1495_v18 = vmul.f32 %v1489_v14, %v1384_v57  ;;  %v1494_v20 = vmul.f32 0.5, %v1493_v45  ;;  %v1626_v57 = vld [vmem:[#allocation2 + $0x38] sm:$0x3]  ;;  %v1741_v15 = vld [vmem:[#allocation2 + $0x40] sm:$0x3] }
 0x74c   :  { %1498 = vrot.lane.b32.xlu1 %v1496_v16, %s3347_s17 }
 0x7be   :  { %v1499_v19 = vpop.permute.xlu1 %1498 }
 0x7bf   :  { %v1501_v43 = vadd.f32 %v1499_v19, %v1495_v18 }
 0x7c1   :  { %3293 = vtanh.f32 %v1501_v43 }
 0x7cb   :  { %v3294_v22 = vpop.eup %3293 }
 0x7cc   :  { %v1503_v23 = vmul.f32 %v3294_v22, %v1494_v20 }
 0x7ce   :  { %1505 = vrot.lane.b32.xlu1 %v1503_v23, %s3347_s17 }
 0x840   :  { %v1506_v49 = vpop.permute.xlu1 %1505 }
 0x841   :  { %1508 = vst.msk [vmem:[#allocation3 + $0x8] sm:$0x3] %vm1391_vm5, %v1506_v49  ;;  %2555 = vmatmul.mubr.msk.f32.vlgmr.msra.gmra.mrb[24].mxu0 %vm187_vm0, %v1506_v49 }
 0x842   :  { %3188 = vmatpush1.bf16.msra.mxu0 %v4064_v58  ;;  %1825 = vmatprep.mubr.f32.mxu0 %v3343_v7 }
 0x843   :  { %3190 = vmatprep.subr.bf16.mxu0 %v4066_v63 }
 0x846   :  { %3192 = vmatpush1.bf16.msra.mxu0 %v4083_v9 }
 0x847   :  { %3194 = vmatprep.subr.bf16.mxu0 %v4086_v12 }
 0x84a   :  { %3196 = vmatpush1.bf16.msra.mxu0 %v4103_v21 }
 0x84b   :  { %3198 = vmatprep.subr.bf16.mxu0 %v4106_v24 }
 0x84e   :  { %3200 = vmatpush1.bf16.msra.mxu0 %v4121_v29 }
 0x84f   :  { %3218 = vmatprep.subr.bf16.mxu0 %v4042_v38 }
 0x914   :  { %v1595_v26 = vpop.f32.mrb[24].mxu0 }
 0x915   :  { %v1600_v27 = vadd.f32 %v1595_v26, %v1509_v25  ;;  %v1597_v28 = vpop.f32.mrb[25].mxu0 }
 0x916   :  { %v1601_v32 = vadd.f32 %v1597_v28, %v1510_v31  ;;  %v1857_v28 = vld [vmem:[#allocation2 + $0x50] sm:$0x3] }
 0x917   :  { %v1602_v30 = vmul.f32 0.5, %v1600_v27 }
 0x918   :  { %v1607_v40 = vmul.f32 0.5, %v1601_v32 }
 0x919   :  { %3295 = vtanh.f32 %v1602_v30 }
 0x91a   :  { %3297 = vtanh.f32 %v1601_v32 }
 0x91b   :  { %3299 = vtanh.f32 %v1607_v40 }
 0x923   :  { %v3296_v33 = vpop.eup %3295 }
 0x924   :  { %v1604_v34 = vadd.f32 1.0, %v3296_v33  ;;  %v3298_v36 = vpop.eup %3297 }
 0x925   :  { %v3300_v44 = vpop.eup %3299 }
 0x926   :  { %v1605_v35 = vmul.f32 0.5, %v1604_v34  ;;  %v1609_v46 = vadd.f32 1.0, %v3300_v44  ;;  %v1858_v34 = vld [vmem:[#allocation2 + $0x58] sm:$0x3] }
 0x928   :  { %v1612_v37 = vmul.f32 %v3298_v36, %v1605_v35  ;;  %v1611_v41 = vmul.f32 %v1605_v35, %v1501_v43  ;;  %v1610_v47 = vmul.f32 0.5, %v1609_v46 }
 0x92a   :  { %1614 = vrot.lane.b32.xlu0 %v1612_v37, %s3347_s17 }
 0x99c   :  { %v1615_v38 = vpop.permute.xlu0 %1614 }
 0x99d   :  { %v1617_v42 = vadd.f32 %v1615_v38, %v1611_v41 }
 0x99f   :  { %3301 = vtanh.f32 %v1617_v42 }
 0x9a9   :  { %v3302_v48 = vpop.eup %3301 }
 0x9aa   :  { %v1619_v50 = vmul.f32 %v3302_v48, %v1610_v47 }
 0x9ac   :  { %1621 = vrot.lane.b32.xlu1 %v1619_v50, %s3347_s17 }
 0xa1e   :  { %v1622_v51 = vpop.permute.xlu1 %1621 }
 0xa1f   :  { %1624 = vst.msk [vmem:[#allocation3 + $0x10] sm:$0x3] %vm1391_vm5, %v1622_v51  ;;  %2556 = vmatmul.mubr.msk.f32.vlgmr.msra.gmra.mrb[26].mxu1 %vm187_vm0, %v1622_v51 }
 0xa20   :  { %3204 = vmatpush1.bf16.msra.mxu1 %v4064_v58  ;;  %1941 = vmatprep.mubr.f32.mxu1 %v3343_v7 }
 0xa21   :  { %3206 = vmatprep.subr.bf16.mxu1 %v4066_v63 }
 0xa24   :  { %3208 = vmatpush1.bf16.msra.mxu1 %v4083_v9 }
 0xa25   :  { %3210 = vmatprep.subr.bf16.mxu1 %v4086_v12 }
 0xa28   :  { %3212 = vmatpush1.bf16.msra.mxu1 %v4103_v21 }
 0xa29   :  { %3214 = vmatprep.subr.bf16.mxu1 %v4106_v24 }
 0xa2c   :  { %3216 = vmatpush1.bf16.msra.mxu1 %v4121_v29 }
 0xaf2   :  { %v1711_v53 = vpop.f32.mrb[26].mxu1 }
 0xaf3   :  { %v1716_v54 = vadd.f32 %v1711_v53, %v1625_v52  ;;  %v1713_v55 = vpop.f32.mrb[27].mxu1 }
 0xaf4   :  { %v1717_v59 = vadd.f32 %v1713_v55, %v1626_v57  ;;  %v2216_v57 = vld [vmem:[%s4445_s19 + $0x18] sm:$0xff] }
 0xaf5   :  { %v1718_v56 = vmul.f32 0.5, %v1716_v54 }
 0xaf6   :  { %v1723_v39 = vmul.f32 0.5, %v1717_v59 }
 0xaf7   :  { %3303 = vtanh.f32 %v1718_v56  ;;  %v2215_v56 = vld [vmem:[%s4445_s19 + $0x10] sm:$0xff] }
 0xaf8   :  { %3305 = vtanh.f32 %v1717_v59  ;;  %v3253_v59 = vpack.c.bf16 %v2216_v57, %v2215_v56 }
 0xaf9   :  { %3307 = vtanh.f32 %v1723_v39  ;;  %v2219_v39 = vld [vmem:[%s4445_s19 + $0x30] sm:$0xff] }
 0xb01   :  { %v3304_v60 = vpop.eup %3303 }
 0xb02   :  { %v1720_v62 = vadd.f32 1.0, %v3304_v60  ;;  %v3306_v1 = vpop.eup %3305 }
 0xb03   :  { %v3308_v6 = vpop.eup %3307 }
 0xb04   :  { %v1721_v0 = vmul.f32 0.5, %v1720_v62  ;;  %v1725_v8 = vadd.f32 1.0, %v3308_v6  ;;  %v2217_v62 = vld [vmem:[%s4445_s19 + $0x20] sm:$0xff]  ;;  %v2207_v6 = vld [vmem:[#allocation3 + $0x10] sm:$0xff] }
 0xb06   :  { %v1728_v2 = vmul.f32 %v3306_v1, %v1721_v0  ;;  %v1727_v3 = vmul.f32 %v1721_v0, %v1617_v42  ;;  %v1726_v10 = vmul.f32 0.5, %v1725_v8  ;;  %v2214_v42 = vld [vmem:[%s4445_s19 + $0x8] sm:$0xff]  ;;  %v2205_v1 = vld [vmem:[#allocation3] sm:$0xff] }
 0xb07   :  { %v2218_v0 = vld [vmem:[%s4445_s19 + $0x28] sm:$0xff] }
 0xb08   :  { %1730 = vrot.lane.b32.xlu0 %v1728_v2, %s3347_s17  ;;  %v3257_v2 = vpack.c.bf16 %v2218_v0, %v2217_v62 }
 0xb7a   :  { %v1731_v4 = vpop.permute.xlu0 %1730 }
 0xb7b   :  { %v1733_v5 = vadd.f32 %v1731_v4, %v1727_v3  ;;  %v2220_v3 = vld [vmem:[%s4445_s19 + $0x38] sm:$0xff] }
 0xb7c   :  { %v3261_v4 = vpack.c.bf16 %v2220_v3, %v2219_v39  ;;  %v2368_v3 = vld [vmem:[%s4446_s21 + $0x18] sm:$0xff] }
 0xb7d   :  { %3309 = vtanh.f32 %v1733_v5 }
 0xb87   :  { %v3310_v11 = vpop.eup %3309 }
 0xb88   :  { %v1735_v13 = vmul.f32 %v3310_v11, %v1726_v10 }
 0xb8a   :  { %1737 = vrot.lane.b32.xlu1 %v1735_v13, %s3347_s17  ;;  %v1973_v13 = vld [vmem:[#allocation2 + $0x60] sm:$0x3] }
 0xbfc   :  { %v1738_v14 = vpop.permute.xlu1 %1737 }
 0xbfd   :  { %1740 = vst.msk [vmem:[#allocation3 + $0x18] sm:$0x3] %vm1391_vm5, %v1738_v14  ;;  %2557 = vmatmul.mubr.msk.f32.vlgmr.msra.gmra.mrb[26].mxu0 %vm187_vm0, %v1738_v14 }
 0xbfe   :  { %3220 = vmatpush1.bf16.msra.mxu0 %v4064_v58  ;;  %2057 = vmatprep.mubr.f32.mxu0 %v3343_v7  ;;  %v1742_v58 = vld [vmem:[#allocation2 + $0x48] sm:$0x3] }
 0xbff   :  { %3222 = vmatprep.subr.bf16.mxu0 %v4066_v63 }
 0xc02   :  { %3224 = vmatpush1.bf16.msra.mxu0 %v4083_v9 }
 0xc03   :  { %3226 = vmatprep.subr.bf16.mxu0 %v4086_v12 }
 0xc04   :  { %v2208_v8 = vld [vmem:[#allocation3 + $0x18] sm:$0xff] }
 0xc06   :  { %3228 = vmatpush1.bf16.msra.mxu0 %v4103_v21 }
 0xc07   :  { %3230 = vmatprep.subr.bf16.mxu0 %v4106_v24 }
 0xc0a   :  { %3232 = vmatpush1.bf16.msra.mxu0 %v4121_v29 }
 0xcd0   :  { %v1827_v16 = vpop.f32.mrb[26].mxu0 }
 0xcd1   :  { %v1832_v17 = vadd.f32 %v1827_v16, %v1741_v15  ;;  %v1829_v18 = vpop.f32.mrb[27].mxu0 }
 0xcd2   :  { %v1833_v43 = vadd.f32 %v1829_v18, %v1742_v58  ;;  %v1974_v18 = vld [vmem:[#allocation2 + $0x68] sm:$0x3] }
 0xcd3   :  { %v1834_v19 = vmul.f32 0.5, %v1832_v17 }
 0xcd4   :  { %v1839_v21 = vmul.f32 0.5, %v1833_v43 }
 0xcd5   :  { %3311 = vtanh.f32 %v1834_v19 }
 0xcd6   :  { %3313 = vtanh.f32 %v1833_v43 }
 0xcd7   :  { %3315 = vtanh.f32 %v1839_v21 }
 0xcdf   :  { %v3312_v63 = vpop.eup %3311 }
 0xce0   :  { %v1836_v61 = vadd.f32 1.0, %v3312_v63  ;;  %v3314_v45 = vpop.eup %3313 }
 0xce1   :  { %v3316_v22 = vpop.eup %3315 }
 0xce2   :  { %v1837_v9 = vmul.f32 0.5, %v1836_v61  ;;  %v1841_v23 = vadd.f32 1.0, %v3316_v22  ;;  %v2094_v22 = vld [vmem:[%s4438_s18 + $0x18] sm:$0xff] }
 0xce4   :  { %v1844_v12 = vmul.f32 %v3314_v45, %v1837_v9  ;;  %v1843_v24 = vmul.f32 %v1837_v9, %v1733_v5  ;;  %v1842_v49 = vmul.f32 0.5, %v1841_v23  ;;  %v2206_v5 = vld [vmem:[#allocation3 + $0x8] sm:$0xff]  ;;  %v2091_v23 = vld [vmem:[%s4438_s18] sm:$0xff] }
 0xce6   :  { %1846 = vrot.lane.b32.xlu0 %v1844_v12, %s3347_s17 }
 0xd58   :  { %v1847_v29 = vpop.permute.xlu0 %1846 }
 0xd59   :  { %v1849_v20 = vadd.f32 %v1847_v29, %v1843_v24 }
 0xd5b   :  { %3317 = vtanh.f32 %v1849_v20 }
 0xd65   :  { %v3318_v25 = vpop.eup %3317 }
 0xd66   :  { %v1851_v26 = vmul.f32 %v3318_v25, %v1842_v49 }
 0xd68   :  { %1853 = vrot.lane.b32.xlu1 %v1851_v26, %s3347_s17  ;;  %v2093_v26 = vld [vmem:[%s4438_s18 + $0x10] sm:$0xff] }
 0xdda   :  { %v1854_v27 = vpop.permute.xlu1 %1853 }
 0xddb   :  { %1856 = vst.msk [vmem:[#allocation3 + $0x20] sm:$0x3] %vm1391_vm5, %v1854_v27  ;;  %2558 = vmatmul.mubr.msk.f32.vlgmr.msra.gmra.mrb[28].mxu1 %vm187_vm0, %v1854_v27  ;;  %v2096_v27 = vld [vmem:[%s4438_s18 + $0x28] sm:$0xff] }
 0xddc   :  { %2173 = vmatprep.mubr.f32.mxu1 %v3343_v7  ;;  %v2213_v7 = vld [vmem:[%s4445_s19] sm:$0xff] }
 0xddd   :  { %v3249_v44 = vpack.c.bf16 %v2214_v42, %v2213_v7  ;;  %v2106_v7 = vld [vmem:[%s4438_s18 + $0x78] sm:$0xff] }
 0xddf   :  { %3250 = vmatprep.subr.bf16.mxu0 %v3249_v44 }
 0xde2   :  { %v2209_v10 = vld [vmem:[#allocation3 + $0x20] sm:$0xff] }
 0xeae   :  { %v1943_v30 = vpop.f32.mrb[28].mxu1 }
 0xeaf   :  { %v1948_v31 = vadd.f32 %v1943_v30, %v1857_v28  ;;  %v1945_v32 = vpop.f32.mrb[29].mxu1  ;;  %v2098_v28 = vld [vmem:[%s4438_s18 + $0x38] sm:$0xff]  ;;  %v3235_v30 = vpack.c.bf16 %v2093_v26, %v2091_v23 }
 0xeb0   :  { %v1949_v35 = vadd.f32 %v1945_v32, %v1858_v34  ;;  %v2095_v32 = vld [vmem:[%s4438_s18 + $0x20] sm:$0xff]  ;;  %v2100_v34 = vld [vmem:[%s4438_s18 + $0x48] sm:$0xff] }
 0xeb1   :  { %v1950_v33 = vmul.f32 0.5, %v1948_v31  ;;  %v3237_v31 = vpack.c.bf16 %v2098_v28, %v2096_v27 }
 0xeb2   :  { %v1955_v46 = vmul.f32 0.5, %v1949_v35 }
 0xeb3   :  { %3319 = vtanh.f32 %v1950_v33  ;;  %v2097_v33 = vld [vmem:[%s4438_s18 + $0x30] sm:$0xff] }
 0xeb4   :  { %3321 = vtanh.f32 %v1949_v35  ;;  %v2102_v35 = vld [vmem:[%s4438_s18 + $0x58] sm:$0xff] }
 0xeb5   :  { %3323 = vtanh.f32 %v1955_v46  ;;  %v2103_v46 = vld [vmem:[%s4438_s18 + $0x60] sm:$0xff] }
 0xebd   :  { %v3320_v36 = vpop.eup %3319 }
 0xebe   :  { %v1952_v37 = vadd.f32 1.0, %v3320_v36  ;;  %v3322_v41 = vpop.eup %3321  ;;  %v3239_v36 = vpack.c.bf16 %v2097_v33, %v2095_v32 }
 0xebf   :  { %v3324_v51 = vpop.eup %3323 }
 0xec0   :  { %v1953_v40 = vmul.f32 0.5, %v1952_v37  ;;  %v1957_v52 = vadd.f32 1.0, %v3324_v51  ;;  %v3241_v37 = vpack.c.bf16 %v2102_v35, %v2100_v34  ;;  %v2366_v51 = vld [vmem:[%s4446_s21 + $0x8] sm:$0xff] }
 0xec2   :  { %v1960_v38 = vmul.f32 %v3322_v41, %v1953_v40  ;;  %v1959_v47 = vmul.f32 %v1953_v40, %v1849_v20  ;;  %v1958_v53 = vmul.f32 0.5, %v1957_v52  ;;  %v2092_v20 = vld [vmem:[%s4438_s18 + $0x8] sm:$0xff]  ;;  %v2099_v40 = vld [vmem:[%s4438_s18 + $0x40] sm:$0xff]  ;;  %v2101_v41 = vld [vmem:[%s4438_s18 + $0x50] sm:$0xff] }
 0xec3   :  { %v3233_v25 = vpack.c.bf16 %v2094_v22, %v2092_v20  ;;  %v3243_v42 = vpack.c.bf16 %v2101_v41, %v2099_v40 }
 0xec4   :  { %1962 = vrot.lane.b32.xlu0 %v1960_v38, %s3347_s17  ;;  %v2104_v38 = vld [vmem:[%s4438_s18 + $0x68] sm:$0xff] }
 0xec5   :  { %3234 = vmatprep.subr.bf16.mxu1 %v3233_v25 }
 0xec6   :  { %3236 = vmatpush1.bf16.msra.mxu1 %v3235_v30 }
 0xec7   :  { %3238 = vmatprep.subr.bf16.mxu1 %v3237_v31 }
 0xeca   :  { %3240 = vmatpush1.bf16.msra.mxu1 %v3239_v36 }
 0xecb   :  { %3242 = vmatprep.subr.bf16.mxu1 %v3241_v37 }
 0xece   :  { %3244 = vmatpush1.bf16.msra.mxu1 %v3243_v42 }
 0xf36   :  { %v1963_v48 = vpop.permute.xlu0 %1962 }
 0xf37   :  { %v4251_v50 = vadd.f32 %v1963_v48, %v1959_v47  ;;  %v2105_v47 = vld [vmem:[%s4438_s18 + $0x70] sm:$0xff]  ;;  %v2365_v48 = vld [vmem:[%s4446_s21] sm:$0xff] }
 0xf38   :  { %v3247_v52 = vpack.c.bf16 %v2105_v47, %v2103_v46 }
 0xf39   :  { %3325 = vtanh.f32 %v4251_v50 }
 0xf43   :  { %v3326_v54 = vpop.eup %3325 }
 0xf44   :  { %v1967_v55 = vmul.f32 %v3326_v54, %v1958_v53  ;;  %v3265_v53 = vpack.c.bf16 %v2366_v51, %v2365_v48 }
 0xf46   :  { %1969 = vrot.lane.b32.xlu1 %v1967_v55, %s3347_s17 }
 0xfb8   :  { %v1970_v60 = vpop.permute.xlu1 %1969 }
 0xfb9   :  { %1972 = vst.msk [vmem:[#allocation3 + $0x28] sm:$0x3] %vm1391_vm5, %v1970_v60  ;;  %2559 = vmatmul.mubr.msk.f32.vlgmr.msra.gmra.mrb[28].mxu0 %vm187_vm0, %v1970_v60 }
 0xfba   :  { %3252 = vmatpush3.bf16.msra.mxu0 %v3249_v44  ;;  %2909 = vmatprep.mubr.msk.f32.mxu0 %vm187_vm0, %v2205_v1  ;;  %v3245_v44 = vpack.c.bf16 %v2106_v7, %v2104_v38 }
 0xfbb   :  { %3254 = vmatprep.subr.bf16.mxu0 %v3253_v59 }
 0xfbc   :  { %3246 = vmatprep.subr.bf16.mxu1 %v3245_v44 }
 0xfbd   :  { %3248 = vmatpush1.bf16.msra.mxu1 %v3247_v52 }
 0xfbe   :  { %3256 = vmatpush3.bf16.msra.mxu0 %v3253_v59  ;;  %3266 = vmatprep.subr.bf16.mxu1 %v3265_v53 }
 0xfbf   :  { %3258 = vmatprep.subr.bf16.mxu0 %v3257_v2 }
 0xfc0   :  { %v2210_v11 = vld [vmem:[#allocation3 + $0x28] sm:$0xff] }
 0xfc2   :  { %3260 = vmatpush3.bf16.msra.mxu0 %v3257_v2  ;;  %v4354_v2 = vld [vmem:[%s4447_s20] ss:$0 sm:$0xff] }
 0xfc3   :  { %3262 = vmatprep.subr.bf16.mxu0 %v3261_v4 }
 0xfc6   :  { %3264 = vmatpush3.bf16.msra.mxu0 %v3261_v4 }
 0xfc9   :  { %2910 = vmatmul.mubr.msk.f32.vlgmr.msra.gmra.mrb[30].mxu0 %vm187_vm0, %v2206_v5 }
 0xfca   :  { %2912 = vmatprep.mubr.msk.f32.mxu0 %vm187_vm0, %v2207_v6 }
 0xfcd   :  { %2913 = vmatmul.mubr.msk.f32.gmra.mrb[32].mxu0 %vm187_vm0, %v2208_v8 }
 0xfce   :  { %2915 = vmatprep.mubr.msk.f32.mxu0 %vm187_vm0, %v2209_v10 }
 0xfd1   :  { %2916 = vmatmul.mubr.msk.f32.gmra.mrb[34].mxu0 %vm187_vm0, %v2210_v11 }
0x108c   :  { %v2059_v14 = vpop.f32.mrb[28].mxu0 }
0x108d   :  { %v2064_v15 = vadd.f32 %v2059_v14, %v1973_v13  ;;  %v2061_v16 = vpop.f32.mrb[29].mxu0 }
0x108e   :  { %v2065_v19 = vadd.f32 %v2061_v16, %v1974_v18 }
0x108f   :  { %v2066_v17 = vmul.f32 0.5, %v2064_v15 }
0x1090   :  { %v2071_v54 = vmul.f32 0.5, %v2065_v19 }
0x1091   :  { %3327 = vtanh.f32 %v2066_v17 }
0x1092   :  { %3329 = vtanh.f32 %v2065_v19 }
0x1093   :  { %3331 = vtanh.f32 %v2071_v54 }
0x109b   :  { %v3328_v58 = vpop.eup %3327 }
0x109c   :  { %v2068_v43 = vadd.f32 1.0, %v3328_v58  ;;  %v4281_v63 = vpop.f32.mrb[30].mxu0  ;;  %v3330_v45 = vpop.eup %3329 }
0x109d   :  { %v2318_v61 = vpop.f32.mrb[31].mxu0  ;;  %v3332_v59 = vpop.eup %3331  ;;  %v2324_v8 = vadd.f32 %v4281_v63, %v4354_v2  ;;  %v2089_v63 = vld [vmem:[#allocation2 + $0x70] sm:$0x3] }
0x109e   :  { %v2069_v9 = vmul.f32 0.5, %v2068_v43  ;;  %v2073_v60 = vadd.f32 1.0, %v3332_v59  ;;  %v2319_v39 = vadd.f32 %v4354_v2, %v2318_v61  ;;  %v28_v43 = vstv %s4448_s22 }
0x109f   :  { %v2358_v11 = vmax.f32 %v2324_v8, 0.0  ;;  %29 = vst [vmem:[#allocation4] sm:$0x1] %v28_v43 }
0x10a0   :  { %v4283_v12 = vpop.f32.mrb[32].mxu0  ;;  %v2076_v21 = vmul.f32 %v3330_v45, %v2069_v9  ;;  %v2075_v55 = vmul.f32 %v2069_v9, %v4251_v50  ;;  %v2074_v62 = vmul.f32 0.5, %v2073_v60  ;;  %v2367_v50 = vld [vmem:[%s4446_s21 + $0x10] sm:$0xff]  ;;  %v2357_v5 = vmax.f32 %v2319_v39, 0.0 }
0x10a1   :  { %v4285_v24 = vpop.f32.mrb[33].mxu0  ;;  %v3269_v4 = vpack.c.bf16 %v2368_v3, %v2367_v50  ;;  %v2334_v13 = vadd.f32 %v4283_v12, %v4354_v2 }
0x10a2   :  { %2078 = vrot.lane.b32.xlu0 %v2076_v21, %s3347_s17  ;;  %v2329_v10 = vadd.f32 %v4354_v2, %v4285_v24  ;;  %v2090_v21 = vld [vmem:[#allocation2 + $0x78] sm:$0x3] }
0x10a3   :  { %v2360_v17 = vmax.f32 %v2334_v13, 0.0 }
0x10a4   :  { %v4288_v29 = vpop.f32.mrb[34].mxu0  ;;  %v2359_v14 = vmax.f32 %v2329_v10, 0.0 }
0x10a5   :  { %v4299_v49 = vpop.f32.mrb[35].mxu0  ;;  %v2344_v18 = vadd.f32 %v4288_v29, %v4354_v2 }
0x10a6   :  { %v2339_v15 = vadd.f32 %v4354_v2, %v4299_v49  ;;  %v2570_v29 = vld [vmem:[#allocation4] ss:$0 sm:$0xff] }
0x10a7   :  { %v2362_v58 = vmax.f32 %v2344_v18, 0.0 }
0x10a8   :  { %v2361_v19 = vmax.f32 %v2339_v15, 0.0 }
0x1114   :  { %v2079_v56 = vpop.permute.xlu0 %2078 }
0x1115   :  { %v4347_v57 = vadd.f32 %v2079_v56, %v2075_v55 }
0x1117   :  { %3333 = vtanh.f32 %v4347_v57 }
0x1121   :  { %v3334_v0 = vpop.eup %3333 }
0x1122   :  { %v2083_v1 = vmul.f32 %v3334_v0, %v2074_v62 }
0x1124   :  { %2085 = vrot.lane.b32.xlu1 %v2083_v1, %s3347_s17 }
0x1196   :  { %v2086_v6 = vpop.permute.xlu1 %2085 }
0x1197   :  { %2088 = vst.msk [vmem:[#allocation3 + $0x30] sm:$0x3] %vm1391_vm5, %v2086_v6  ;;  %2560 = vmatmul.mubr.msk.f32.vlgmr.msra.gmra.mrb[30].mxu1 %vm187_vm0, %v2086_v6 }
0x1198   :  { %3268 = vmatpush3.bf16.msra.mxu1 %v3265_v53  ;;  %2929 = vmatprep.mubr.msk.f32.mxu1 %vm2376_vm6, %v2357_v5 }
0x1199   :  { %3270 = vmatprep.subr.bf16.mxu1 %v3269_v4 }
0x119c   :  { %3272 = vmatpush3.bf16.msra.mxu1 %v3269_v4 }
0x119e   :  { %v2211_v16 = vld [vmem:[#allocation3 + $0x30] sm:$0xff] }
0x119f   :  { %2930 = vmatmul.mubr.msk.f32.vlgmr.msra.gmra.mrb[32].mxu1 %vm2376_vm6, %v2358_v11  ;;  %2918 = vmatprep.mubr.msk.f32.mxu0 %vm187_vm0, %v2211_v16 }
0x11a0   :  { %2932 = vmatprep.mubr.msk.f32.mxu1 %vm2376_vm6, %v2359_v14 }
0x11a3   :  { %2933 = vmatmul.mubr.msk.f32.gmra.mrb[34].mxu1 %vm2376_vm6, %v2360_v17 }
0x11a4   :  { %2935 = vmatprep.mubr.msk.f32.mxu1 %vm2376_vm6, %v2361_v19 }
0x11a7   :  { %2936 = vmatmul.mubr.msk.f32.gmra.mrb[36].mxu1 %vm2376_vm6, %v2362_v58 }
0x126a   :  { %v2175_v61 = vpop.f32.mrb[30].mxu1 }
0x126b   :  { %v2180_v9 = vadd.f32 %v2175_v61, %v2089_v63  ;;  %v2177_v45 = vpop.f32.mrb[31].mxu1 }
0x126c   :  { %v2181_v24 = vadd.f32 %v2177_v45, %v2090_v21 }
0x126d   :  { %v2182_v12 = vmul.f32 0.5, %v2180_v9 }
0x126e   :  { %v2187_v41 = vmul.f32 0.5, %v2181_v24 }
0x126f   :  { %3335 = vtanh.f32 %v2182_v12 }
0x1270   :  { %3337 = vtanh.f32 %v2181_v24 }
0x1271   :  { %3339 = vtanh.f32 %v2187_v41 }
0x1272   :  { %v2931_v20 = vpop.f32.mrb[32].mxu1 }
0x1273   :  { %v2473_v22 = vadd.f32 %v2931_v20, %v2570_v29  ;;  %v2467_v23 = vpop.f32.mrb[33].mxu1 }
0x1274   :  { %v2468_v49 = vadd.f32 %v2570_v29, %v2467_v23 }
0x1275   :  { %2508 = vst.msk [vmem:[%s4449_s23 + $0x8] sm:$0xff] %vm2506_vm7, %v2473_v22 }
0x1276   :  { %2507 = vst.msk [vmem:[%s4449_s23] sm:$0xff] %vm2506_vm7, %v2468_v49  ;;  %v2934_v25 = vpop.f32.mrb[34].mxu1 }
0x1277   :  { %v2483_v26 = vadd.f32 %v2934_v25, %v2570_v29  ;;  %v2477_v27 = vpop.f32.mrb[35].mxu1 }
0x1278   :  { %v2478_v28 = vadd.f32 %v2570_v29, %v2477_v27 }
0x1279   :  { %v3336_v30 = vpop.eup %3335  ;;  %2510 = vst.msk [vmem:[%s4449_s23 + $0x18] sm:$0xff] %vm2506_vm7, %v2483_v26 }
0x127a   :  { %v2184_v31 = vadd.f32 1.0, %v3336_v30  ;;  %2509 = vst.msk [vmem:[%s4449_s23 + $0x10] sm:$0xff] %vm2506_vm7, %v2478_v28  ;;  %v2937_v32 = vpop.f32.mrb[36].mxu1  ;;  %v3338_v37 = vpop.eup %3337 }
0x127b   :  { %v2493_v33 = vadd.f32 %v2937_v32, %v2570_v29  ;;  %v2487_v34 = vpop.f32.mrb[37].mxu1  ;;  %v3340_v44 = vpop.eup %3339 }
0x127c   :  { %v2185_v35 = vmul.f32 0.5, %v2184_v31  ;;  %v2488_v36 = vadd.f32 %v2570_v29, %v2487_v34  ;;  %v2189_v46 = vadd.f32 1.0, %v3340_v44 }
0x127d   :  { %2512 = vst.msk [vmem:[%s4449_s23 + $0x28] sm:$0xff] %vm2506_vm7, %v2493_v33 }
0x127e   :  { %2511 = vst.msk [vmem:[%s4449_s23 + $0x20] sm:$0xff] %vm2506_vm7, %v2488_v36  ;;  %v2192_v40 = vmul.f32 %v3338_v37, %v2185_v35  ;;  %v2191_v38 = vmul.f32 %v2185_v35, %v4347_v57  ;;  %v2190_v47 = vmul.f32 0.5, %v2189_v46 }
0x1280   :  { %2194 = vrot.lane.b32.xlu0 %v2192_v40, %s3347_s17 }
0x12f2   :  { %v2195_v7 = vpop.permute.xlu0 %2194 }
0x12f3   :  { %v2197_v42 = vadd.f32 %v2195_v7, %v2191_v38 }
0x12f5   :  { %3341 = vtanh.f32 %v2197_v42 }
0x12ff   :  { %v3342_v48 = vpop.eup %3341 }
0x1300   :  { %v2199_v51 = vmul.f32 %v3342_v48, %v2190_v47 }
0x1302   :  { %2201 = vrot.lane.b32.xlu1 %v2199_v51, %s3347_s17 }
0x1374   :  { %v2202_v52 = vpop.permute.xlu1 %2201 }
0x1375   :  { %2204 = vst.msk [vmem:[#allocation3 + $0x38] sm:$0x3] %vm1391_vm5, %v2202_v52 }
0x137c   :  { %v2212_v53 = vld [vmem:[#allocation3 + $0x38] sm:$0xff] }
0x137d   :  { %2919 = vmatmul.mubr.msk.f32.gmra.mrb[36].mxu0 %vm187_vm0, %v2212_v53 }
0x1450   :  { %v2920_v54 = vpop.f32.mrb[36].mxu0 }
0x1451   :  { %v2354_v55 = vadd.f32 %v2920_v54, %v4354_v2  ;;  %v2348_v56 = vpop.f32.mrb[37].mxu0 }
0x1452   :  { %v2349_v57 = vadd.f32 %v4354_v2, %v2348_v56 }
0x1453   :  { %v2364_v60 = vmax.f32 %v2354_v55, 0.0 }
0x1454   :  { %v2363_v59 = vmax.f32 %v2349_v57, 0.0 }
0x1456   :  { %2938 = vmatprep.mubr.msk.f32.mxu1 %vm2376_vm6, %v2363_v59 }
0x1457   :  { %2939 = vmatmul.mubr.msk.f32.gmra.mrb[38].mxu1 %vm2376_vm6, %v2364_v60 }
0x152a   :  { %v2940_v62 = vpop.f32.mrb[38].mxu1 }
0x152b   :  { %v2503_v0 = vadd.f32 %v2940_v62, %v2570_v29  ;;  %v2497_v1 = vpop.f32.mrb[39].mxu1 }
0x152c   :  { %v2498_v39 = vadd.f32 %v2570_v29, %v2497_v1 }
0x152d   :  { %2514 = vst.msk [vmem:[%s4449_s23 + $0x38] sm:$0xff] %vm2506_vm7, %v2503_v0 }
0x152e   :  { %2513 = vst.msk [vmem:[%s4449_s23 + $0x30] sm:$0xff] %vm2506_vm7, %v2498_v39 }

</bundles_post_ra>
